<compile_context>
chip_gen: v7x
topology: tpu7x:2x2x1
jax: 0.10.0
libtpu: 0.0.40
codegen_flags: <defaults>
</compile_context>

<pallas_src>
import functools

import jax
import jax.numpy as jnp
from jax.experimental import pallas as pl
from jax.experimental.pallas import tpu as pltpu


# --------------------------------------------------------------------------
# Kernel
# --------------------------------------------------------------------------
def _edge_mlp_kernel(x_ref, w1_ref, b1_ref, w2_ref, b2_ref, w3_ref, b3_ref,
                     w3g_ref, b3g_ref, g_ref, gamma_ref, beta_ref, out_ref,
                     *, eps, inv_embed, act_dtype):
    # MXU matmul with f32 accumulation; LHS cast to the weight dtype (bf16/f32)
    # on the VPU (inputs are DMA'd as f32 -> no wrapper-side cast pass).
    def mm(lhs, w_ref):
        w = w_ref[...]
        return jnp.dot(lhs.astype(w.dtype), w, preferred_element_type=jnp.float32)

    # Layer 1: ONE block-diagonal matmul over the per-edge-interleaved input.
    h = mm(x_ref[...], w1_ref) + b1_ref[...]
    h = jnp.tanh(h.astype(act_dtype))
    # Layer 2
    h = mm(h, w2_ref) + b2_ref[...]
    h = jnp.tanh(h.astype(act_dtype))
    # Layer 3 and the folded group-mean: two independent matmuls off `h`,
    # so they pipeline back-to-back on the MXU.
    y = mm(h, w3_ref) + b3_ref[...]
    mean = mm(h, w3g_ref) + b3g_ref[...]          # == per-edge mean of y
    c = y - mean
    # Grouped variance: one f32 matmul against the 0/1 group-sum matrix G.
    var = jnp.dot(c * c, g_ref[...], preferred_element_type=jnp.float32) * inv_embed
    out = c * jax.lax.rsqrt(var + eps) * gamma_ref[...] + beta_ref[...]
    out_ref[...] = out.astype(out_ref.dtype)


# --------------------------------------------------------------------------
# One-time parameter packing
# --------------------------------------------------------------------------
def _block_diag(w, pack):
    """(a, b) -> (pack*a, pack*b) block-diagonal replication of w."""
    a, b = w.shape
    eye = jnp.eye(pack, dtype=w.dtype)
    return (eye[:, None, :, None] * w[None, :, None, :]).reshape(pack * a, pack * b)


def _group_matrix(embed, pack):
    """G[i, j] = 1 iff lanes i and j belong to the same edge's embed-group."""
    grp = jnp.arange(pack * embed) // embed
    return (grp[:, None] == grp[None, :]).astype(jnp.float32)


def pack_edge_model_params(params, *, pack=8, mm_dtype=jnp.float32):
    """Build packed-row parameters ONCE; reuse across forward calls."""
    w1, b1, w2, b2, w3, b3, gamma, beta = params
    embed = w3.shape[1]
    inv_embed = 1.0 / embed
    g = _group_matrix(embed, pack)                       # f32 0/1 group matrix

    bd = lambda w: _block_diag(w.astype(jnp.float32), pack)
    tile = lambda v: jnp.tile(v.astype(jnp.float32).reshape(1, -1), (1, pack))

    w1p, w2p, w3p = bd(w1), bd(w2), bd(w3)
    b1p, b2p, b3p = tile(b1), tile(b2), tile(b3)
    # Fold the LayerNorm group-mean into layer 3:  mean(y) = h @ W3G + b3G.
    w3gp = (w3p @ g) * inv_embed
    b3gp = (b3p @ g) * inv_embed
    return (w1p.astype(mm_dtype), b1p,
            w2p.astype(mm_dtype), b2p,
            w3p.astype(mm_dtype), b3p,
            w3gp.astype(mm_dtype), b3gp,
            g, tile(gamma), tile(beta))


# --------------------------------------------------------------------------
# Generation-aware tiling heuristics
# --------------------------------------------------------------------------
def _tpu_generation():
    """Best-effort TPU generation from device_kind ('v5'/'v6'/'v7' -> 5/6/7)."""
    try:
        kind = jax.devices()[0].device_kind.lower()
    except Exception:
        return 0
    for g in (7, 6, 5):
        if "v%d" % g in kind:
            return g
    return 0


def _auto_tile_rows(rows_p, gen):
    """Few large grid steps: 1 on single-TC chips (v5e/v6e), 2 balanced on v7x."""
    if gen == 7:
        target_steps, cap = 2, 2048      # two TensorCores share the grid
    elif gen == 6:
        target_steps, cap = 1, 2048
    else:                                # v5e / unknown: tighter scoped VMEM
        target_steps, cap = 1, 1024
    t = pl.cdiv(rows_p, target_steps)
    t = -(-t // 16) * 16                 # round up to 16 (bf16 sublane tile)
    return int(max(16, min(cap, t)))


def _vmem_limit_bytes(gen):
    if gen == 7:
        return 48 * 1024 * 1024          # 64 MiB physical per TC on v7x
    if gen in (5, 6):
        return 64 * 1024 * 1024          # 128 MiB physical; 16/32 MiB scoped default
    return 32 * 1024 * 1024


# --------------------------------------------------------------------------
# Forward wrapper
# --------------------------------------------------------------------------
@functools.partial(jax.jit,
                   static_argnames=("pack", "eps", "use_bf16_matmul", "tile_rows"))
def edge_model_forward(edge_attr, sender, receiver, params, packed_params=None,
                       *, pack=8, eps=1e-5, use_bf16_matmul=False, tile_rows=None):
    """Pallas implementation of EdgeModel.forward.

    pack=8 puts 8 edges in each output row (8 * embed_dim = 128 lanes for
    embed_dim=16 -> fully lane-dense stores).  Works for arbitrary num_edges
    (cdiv grid + masked tail tile; rows padded to a multiple of `pack` and
    sliced off at the end).  Pass `packed_params` (from pack_edge_model_params)
    to avoid repacking weights every call.
    """
    n, _ = edge_attr.shape
    w1 = params[0]
    embed = params[4].shape[1]
    cat_dim = w1.shape[0]                      # 3 * input_dim
    mm_dtype = jnp.bfloat16 if use_bf16_matmul else jnp.float32
    act_dtype = mm_dtype                       # bf16 tanh on the bf16 path

    if packed_params is None:
        packed_params = pack_edge_model_params(params, pack=pack, mm_dtype=mm_dtype)

    # Per-edge interleaved concat (one trivial (n, 3d) f32 copy), pad the edge
    # count to a multiple of `pack`, then FREE row-major reshape so each row
    # holds `pack` edges.  Inputs stay f32 in HBM; dtype cast happens in-kernel.
    x = jnp.concatenate([edge_attr, sender, receiver], axis=1)
    n_pad = pl.cdiv(n, pack) * pack
    if n_pad != n:
        x = jnp.pad(x, ((0, n_pad - n), (0, 0)))
    rows_p = n_pad // pack
    x2 = x.reshape(rows_p, pack * cat_dim)

    gen = _tpu_generation()
    if tile_rows is None:
        tile_rows = _auto_tile_rows(rows_p, gen)
    tile_rows = max(16, (int(tile_rows) // 16) * 16)
    grid = (pl.cdiv(rows_p, tile_rows),)

    # Constant-index blocks: fetched once, reused across grid steps.
    param_specs = [pl.BlockSpec(p.shape, lambda i: (0, 0)) for p in packed_params]

    kernel = functools.partial(_edge_mlp_kernel, eps=eps, inv_embed=1.0 / embed,
                               act_dtype=act_dtype)

    out_packed = pl.pallas_call(
        kernel,
        out_shape=jax.ShapeDtypeStruct((rows_p, pack * embed), jnp.float32),
        grid_spec=pltpu.PrefetchScalarGridSpec(
            num_scalar_prefetch=0,
            grid=grid,
            in_specs=[pl.BlockSpec((tile_rows, pack * cat_dim), lambda i: (i, 0))]
                     + param_specs,
            out_specs=pl.BlockSpec((tile_rows, pack * embed), lambda i: (i, 0)),
        ),
        compiler_params=pltpu.CompilerParams(
            dimension_semantics=("parallel",),
            vmem_limit_bytes=_vmem_limit_bytes(gen)),
    )(x2, *packed_params)

    out = out_packed.reshape(n_pad, embed)     # free row-major reshape back
    return out[:n] if n_pad != n else out


# --------------------------------------------------------------------------
# Init + reference
# --------------------------------------------------------------------------
def init_edge_model_params(key, input_dim, hidden_dim, embed_dim):
    """Deterministic init mirroring the PyTorch module.

    Linear weights: Xavier-normal (EdgeModel.init_weights); biases: zeros
    (deterministic); LayerNorm gamma=1, beta=0.  Weights stored
    (in_features, out_features) = transpose of torch layout.
    """
    cat_dim = input_dim * 2 + input_dim  # 3 * input_dim

    def xavier_normal(k, fan_in, fan_out):
        std = (2.0 / (fan_in + fan_out)) ** 0.5
        return std * jax.random.normal(k, (fan_in, fan_out), dtype=jnp.float32)

    k1, k2, k3 = jax.random.split(key, 3)
    w1 = xavier_normal(k1, cat_dim, hidden_dim)
    b1 = jnp.zeros((1, hidden_dim), jnp.float32)
    w2 = xavier_normal(k2, hidden_dim, hidden_dim)
    b2 = jnp.zeros((1, hidden_dim), jnp.float32)
    w3 = xavier_normal(k3, hidden_dim, embed_dim)
    b3 = jnp.zeros((1, embed_dim), jnp.float32)
    gamma = jnp.ones((1, embed_dim), jnp.float32)
    beta = jnp.zeros((1, embed_dim), jnp.float32)
    return (w1, b1, w2, b2, w3, b3, gamma, beta)


def _reference_forward(edge_attr, sender, receiver, params, eps=1e-5):
    """Pure-JAX reference for a correctness check."""
    w1, b1, w2, b2, w3, b3, gamma, beta = params
    x = jnp.concatenate([edge_attr, sender, receiver], axis=1)
    h = jnp.tanh(x @ w1 + b1)
    h = jnp.tanh(h @ w2 + b2)
    h = h @ w3 + b3
    mean = h.mean(-1, keepdims=True)
    var = ((h - mean) ** 2).mean(-1, keepdims=True)
    return (h - mean) * jax.lax.rsqrt(var + eps) * gamma + beta


if __name__ == "__main__":
    input_dim, hidden_dim, embed_dim = 4, 32, 16
    pack = 8   # 8 edges * embed_dim(16) = 128 lanes -> fully lane-dense output

    key = jax.random.PRNGKey(0)
    k_p, k_e, k_s, k_r = jax.random.split(key, 4)
    params = init_edge_model_params(k_p, input_dim, hidden_dim, embed_dim)

    n = 4096
    edge_attr = jax.random.normal(k_e, (n, input_dim), jnp.float32)
    sender = jax.random.normal(k_s, (n, input_dim), jnp.float32)
    receiver = jax.random.normal(k_r, (n, input_dim), jnp.float32)

    # Pack parameters ONCE (per review: no per-call repacking).
    packed_f32 = pack_edge_model_params(params, pack=pack, mm_dtype=jnp.float32)
    packed_bf16 = pack_edge_model_params(params, pack=pack, mm_dtype=jnp.bfloat16)

    # 1) f32 MXU path, aligned edge count, generation-aware auto tiling.
    out = edge_model_forward(edge_attr, sender, receiver, params, packed_f32,
                             pack=pack)
    out = jax.block_until_ready(out)
    ref = _reference_forward(edge_attr, sender, receiver, params)
    assert out.shape == (n, embed_dim)
    assert jnp.allclose(out, ref, atol=1e-4, rtol=1e-4), "f32 mismatch vs reference"

    # 2) Ragged edge count (masked tail tile + pack padding) with bf16 MXU
    #    operands (f32 HBM inputs cast in-kernel, bf16 tanh) -> looser tolerance.
    n2 = 1003
    out2 = edge_model_forward(edge_attr[:n2], sender[:n2], receiver[:n2],
                              params, packed_bf16, pack=pack,
                              use_bf16_matmul=True)
    out2 = jax.block_until_ready(out2)
    ref2 = _reference_forward(edge_attr[:n2], sender[:n2], receiver[:n2], params)
    assert out2.shape == (n2, embed_dim)
    assert jnp.allclose(out2, ref2, atol=7.5e-2, rtol=5e-2), "bf16 mismatch vs reference"

    print("KERNEL_OK")
</pallas_src>

<mosaic_0001>
module attributes {stable_mosaic.version = 11 : i64} {
  func.func @_edge_mlp_kernel(%arg0: i32, %arg1: memref<512x96xf32, #tpu.memory_space<vmem>>, %arg2: memref<96x256xf32, #tpu.memory_space<vmem>>, %arg3: memref<1x256xf32, #tpu.memory_space<vmem>>, %arg4: memref<256x256xf32, #tpu.memory_space<vmem>>, %arg5: memref<1x256xf32, #tpu.memory_space<vmem>>, %arg6: memref<256x128xf32, #tpu.memory_space<vmem>>, %arg7: memref<1x128xf32, #tpu.memory_space<vmem>>, %arg8: memref<256x128xf32, #tpu.memory_space<vmem>>, %arg9: memref<1x128xf32, #tpu.memory_space<vmem>>, %arg10: memref<128x128xf32, #tpu.memory_space<vmem>>, %arg11: memref<1x128xf32, #tpu.memory_space<vmem>>, %arg12: memref<1x128xf32, #tpu.memory_space<vmem>>, %arg13: memref<512x128xf32, #tpu.memory_space<vmem>>) attributes {dimension_semantics = [#tpu.dimension_semantics<parallel>], iteration_bounds = array<i64: 1>, scalar_prefetch = 0 : i64, scratch_operands = 0 : i64, tpu.core_type = #tpu.core_type<tc>, window_params = [{transform_indices = @transform_0, window_bounds = array<i64: 512, 96>}, {pipeline_mode = #tpu.pipeline_mode<synchronous>, transform_indices = @transform_1, window_bounds = array<i64: 96, 256>}, {pipeline_mode = #tpu.pipeline_mode<synchronous>, transform_indices = @transform_2, window_bounds = array<i64: 1, 256>}, {pipeline_mode = #tpu.pipeline_mode<synchronous>, transform_indices = @transform_3, window_bounds = array<i64: 256, 256>}, {pipeline_mode = #tpu.pipeline_mode<synchronous>, transform_indices = @transform_4, window_bounds = array<i64: 1, 256>}, {pipeline_mode = #tpu.pipeline_mode<synchronous>, transform_indices = @transform_5, window_bounds = array<i64: 256, 128>}, {pipeline_mode = #tpu.pipeline_mode<synchronous>, transform_indices = @transform_6, window_bounds = array<i64: 1, 128>}, {pipeline_mode = #tpu.pipeline_mode<synchronous>, transform_indices = @transform_7, window_bounds = array<i64: 256, 128>}, {pipeline_mode = #tpu.pipeline_mode<synchronous>, transform_indices = @transform_8, window_bounds = array<i64: 1, 128>}, {pipeline_mode = #tpu.pipeline_mode<synchronous>, transform_indices = @transform_9, window_bounds = array<i64: 128, 128>}, {pipeline_mode = #tpu.pipeline_mode<synchronous>, transform_indices = @transform_10, window_bounds = array<i64: 1, 128>}, {pipeline_mode = #tpu.pipeline_mode<synchronous>, transform_indices = @transform_11, window_bounds = array<i64: 1, 128>}, {transform_indices = @transform_12, window_bounds = array<i64: 512, 128>}]} {
    %c0 = arith.constant 0 : index
    %c0_0 = arith.constant 0 : index
    %0 = vector.load %arg1[%c0, %c0_0] : memref<512x96xf32, #tpu.memory_space<vmem>>, vector<512x96xf32>
    %c0_1 = arith.constant 0 : index
    %c0_2 = arith.constant 0 : index
    %1 = vector.load %arg2[%c0_1, %c0_2] : memref<96x256xf32, #tpu.memory_space<vmem>>, vector<96x256xf32>
    %cst = arith.constant dense<0.000000e+00> : vector<512x256xf32>
    %2 = tpu.matmul %0, %1, %cst {dimension_numbers = #tpu.dot_dimension_numbers<[1], [0], [0], [1], [0, 0, 1, 1], [], []>} : vector<512x96xf32>, vector<96x256xf32>, vector<512x256xf32> -> vector<512x256xf32>
    %c0_3 = arith.constant 0 : index
    %c0_4 = arith.constant 0 : index
    %3 = vector.load %arg3[%c0_3, %c0_4] : memref<1x256xf32, #tpu.memory_space<vmem>>, vector<1x256xf32>
    %4 = vector.broadcast %3 : vector<1x256xf32> to vector<512x256xf32>
    %5 = arith.addf %2, %4 : vector<512x256xf32>
    %6 = math.tanh %5 : vector<512x256xf32>
    %c0_5 = arith.constant 0 : index
    %c0_6 = arith.constant 0 : index
    %7 = vector.load %arg4[%c0_5, %c0_6] : memref<256x256xf32, #tpu.memory_space<vmem>>, vector<256x256xf32>
    %cst_7 = arith.constant dense<0.000000e+00> : vector<512x256xf32>
    %8 = tpu.matmul %6, %7, %cst_7 {dimension_numbers = #tpu.dot_dimension_numbers<[1], [0], [0], [1], [0, 0, 1, 1], [], []>} : vector<512x256xf32>, vector<256x256xf32>, vector<512x256xf32> -> vector<512x256xf32>
    %c0_8 = arith.constant 0 : index
    %c0_9 = arith.constant 0 : index
    %9 = vector.load %arg5[%c0_8, %c0_9] : memref<1x256xf32, #tpu.memory_space<vmem>>, vector<1x256xf32>
    %10 = vector.broadcast %9 : vector<1x256xf32> to vector<512x256xf32>
    %11 = arith.addf %8, %10 : vector<512x256xf32>
    %12 = math.tanh %11 : vector<512x256xf32>
    %c0_10 = arith.constant 0 : index
    %c0_11 = arith.constant 0 : index
    %13 = vector.load %arg6[%c0_10, %c0_11] : memref<256x128xf32, #tpu.memory_space<vmem>>, vector<256x128xf32>
    %cst_12 = arith.constant dense<0.000000e+00> : vector<512x128xf32>
    %14 = tpu.matmul %12, %13, %cst_12 {dimension_numbers = #tpu.dot_dimension_numbers<[1], [0], [0], [1], [0, 0, 1, 1], [], []>} : vector<512x256xf32>, vector<256x128xf32>, vector<512x128xf32> -> vector<512x128xf32>
    %c0_13 = arith.constant 0 : index
    %c0_14 = arith.constant 0 : index
    %15 = vector.load %arg7[%c0_13, %c0_14] : memref<1x128xf32, #tpu.memory_space<vmem>>, vector<1x128xf32>
    %16 = vector.broadcast %15 : vector<1x128xf32> to vector<512x128xf32>
    %17 = arith.addf %14, %16 : vector<512x128xf32>
    %c0_15 = arith.constant 0 : index
    %c0_16 = arith.constant 0 : index
    %18 = vector.load %arg8[%c0_15, %c0_16] : memref<256x128xf32, #tpu.memory_space<vmem>>, vector<256x128xf32>
    %cst_17 = arith.constant dense<0.000000e+00> : vector<512x128xf32>
    %19 = tpu.matmul %12, %18, %cst_17 {dimension_numbers = #tpu.dot_dimension_numbers<[1], [0], [0], [1], [0, 0, 1, 1], [], []>} : vector<512x256xf32>, vector<256x128xf32>, vector<512x128xf32> -> vector<512x128xf32>
    %c0_18 = arith.constant 0 : index
    %c0_19 = arith.constant 0 : index
    %20 = vector.load %arg9[%c0_18, %c0_19] : memref<1x128xf32, #tpu.memory_space<vmem>>, vector<1x128xf32>
    %21 = vector.broadcast %20 : vector<1x128xf32> to vector<512x128xf32>
    %22 = arith.addf %19, %21 : vector<512x128xf32>
    %23 = arith.subf %17, %22 : vector<512x128xf32>
    %24 = arith.mulf %23, %23 : vector<512x128xf32>
    %c0_20 = arith.constant 0 : index
    %c0_21 = arith.constant 0 : index
    %25 = vector.load %arg10[%c0_20, %c0_21] : memref<128x128xf32, #tpu.memory_space<vmem>>, vector<128x128xf32>
    %cst_22 = arith.constant dense<0.000000e+00> : vector<512x128xf32>
    %26 = tpu.matmul %24, %25, %cst_22 {dimension_numbers = #tpu.dot_dimension_numbers<[1], [0], [0], [1], [0, 0, 1, 1], [], []>} : vector<512x128xf32>, vector<128x128xf32>, vector<512x128xf32> -> vector<512x128xf32>
    %cst_23 = arith.constant 6.250000e-02 : f32
    %27 = vector.broadcast %cst_23 : f32 to vector<512x128xf32>
    %28 = arith.mulf %26, %27 : vector<512x128xf32>
    %cst_24 = arith.constant 9.99999974E-6 : f32
    %29 = vector.broadcast %cst_24 : f32 to vector<512x128xf32>
    %30 = arith.addf %28, %29 : vector<512x128xf32>
    %31 = math.rsqrt %30 : vector<512x128xf32>
    %32 = arith.mulf %23, %31 : vector<512x128xf32>
    %c0_25 = arith.constant 0 : index
    %c0_26 = arith.constant 0 : index
    %33 = vector.load %arg11[%c0_25, %c0_26] : memref<1x128xf32, #tpu.memory_space<vmem>>, vector<1x128xf32>
    %34 = vector.broadcast %33 : vector<1x128xf32> to vector<512x128xf32>
    %35 = arith.mulf %32, %34 : vector<512x128xf32>
    %c0_27 = arith.constant 0 : index
    %c0_28 = arith.constant 0 : index
    %36 = vector.load %arg12[%c0_27, %c0_28] : memref<1x128xf32, #tpu.memory_space<vmem>>, vector<1x128xf32>
    %37 = vector.broadcast %36 : vector<1x128xf32> to vector<512x128xf32>
    %38 = arith.addf %35, %37 : vector<512x128xf32>
    %c0_29 = arith.constant 0 : index
    %c0_30 = arith.constant 0 : index
    %39 = vector.load %arg13[%c0_29, %c0_30] : memref<512x128xf32, #tpu.memory_space<vmem>>, vector<512x128xf32>
    tpu.vector_store %arg13[%c0_29, %c0_30], %38 {strides = array<i32>} : memref<512x128xf32, #tpu.memory_space<vmem>>, vector<512x128xf32>,
    return
  }
  func.func @transform_0(%arg0: i32) -> (i32, i32) {
    %c0_i32 = arith.constant 0 : i32
    %c0_i32_0 = arith.constant 0 : i32
    return %arg0, %c0_i32 : i32, i32
  }
  func.func @transform_1(%arg0: i32) -> (i32, i32) {
    %c0_i32 = arith.constant 0 : i32
    %c0_i32_0 = arith.constant 0 : i32
    %c0_i32_1 = arith.constant 0 : i32
    return %c0_i32, %c0_i32_0 : i32, i32
  }
  func.func @transform_2(%arg0: i32) -> (i32, i32) {
    %c0_i32 = arith.constant 0 : i32
    %c0_i32_0 = arith.constant 0 : i32
    %c0_i32_1 = arith.constant 0 : i32
    return %c0_i32, %c0_i32_0 : i32, i32
  }
  func.func @transform_3(%arg0: i32) -> (i32, i32) {
    %c0_i32 = arith.constant 0 : i32
    %c0_i32_0 = arith.constant 0 : i32
    %c0_i32_1 = arith.constant 0 : i32
    return %c0_i32, %c0_i32_0 : i32, i32
  }
  func.func @transform_4(%arg0: i32) -> (i32, i32) {
    %c0_i32 = arith.constant 0 : i32
    %c0_i32_0 = arith.constant 0 : i32
    %c0_i32_1 = arith.constant 0 : i32
    return %c0_i32, %c0_i32_0 : i32, i32
  }
  func.func @transform_5(%arg0: i32) -> (i32, i32) {
    %c0_i32 = arith.constant 0 : i32
    %c0_i32_0 = arith.constant 0 : i32
    %c0_i32_1 = arith.constant 0 : i32
    return %c0_i32, %c0_i32_0 : i32, i32
  }
  func.func @transform_6(%arg0: i32) -> (i32, i32) {
    %c0_i32 = arith.constant 0 : i32
    %c0_i32_0 = arith.constant 0 : i32
    %c0_i32_1 = arith.constant 0 : i32
    return %c0_i32, %c0_i32_0 : i32, i32
  }
  func.func @transform_7(%arg0: i32) -> (i32, i32) {
    %c0_i32 = arith.constant 0 : i32
    %c0_i32_0 = arith.constant 0 : i32
    %c0_i32_1 = arith.constant 0 : i32
    return %c0_i32, %c0_i32_0 : i32, i32
  }
  func.func @transform_8(%arg0: i32) -> (i32, i32) {
    %c0_i32 = arith.constant 0 : i32
    %c0_i32_0 = arith.constant 0 : i32
    %c0_i32_1 = arith.constant 0 : i32
    return %c0_i32, %c0_i32_0 : i32, i32
  }
  func.func @transform_9(%arg0: i32) -> (i32, i32) {
    %c0_i32 = arith.constant 0 : i32
    %c0_i32_0 = arith.constant 0 : i32
    %c0_i32_1 = arith.constant 0 : i32
    return %c0_i32, %c0_i32_0 : i32, i32
  }
  func.func @transform_10(%arg0: i32) -> (i32, i32) {
    %c0_i32 = arith.constant 0 : i32
    %c0_i32_0 = arith.constant 0 : i32
    %c0_i32_1 = arith.constant 0 : i32
    return %c0_i32, %c0_i32_0 : i32, i32
  }
  func.func @transform_11(%arg0: i32) -> (i32, i32) {
    %c0_i32 = arith.constant 0 : i32
    %c0_i32_0 = arith.constant 0 : i32
    %c0_i32_1 = arith.constant 0 : i32
    return %c0_i32, %c0_i32_0 : i32, i32
  }
  func.func @transform_12(%arg0: i32) -> (i32, i32) {
    %c0_i32 = arith.constant 0 : i32
    %c0_i32_0 = arith.constant 0 : i32
    return %arg0, %c0_i32 : i32, i32
  }
}

</mosaic_0001>

<bundles_post_ra>
// kernel: edge_model_forward.1
= control target key start
LH: loop header
LB: loop body
LE: loop exit
PB: predicated region body
PF: predicated region fallthrough
CT: control target
= control target key end

     0   :  { %v4557_v3 = vmov 0.0   ;;  %vm141_vm0 = vcmask 785408   ;;  %s7358_s1 = inlined_call_operand.vmem [shape: f32[96,256], index: 1, kind: input, shape index: {}]   ;;  %s7359_s0 = inlined_call_operand.vmem [shape: f32[512,96], index: 0, kind: input, shape index: {}]   ;;  %s7360_s3 = inlined_call_operand.vmem [shape: f32[256,256], index: 3, kind: input, shape index: {}]   ;;  %s7361_s5 = inlined_call_operand.vmem [shape: f32[256,128], index: 5, kind: input, shape index: {}]   ;;  %s7362_s2 = inlined_call_operand.vmem [shape: f32[1,256], index: 2, kind: input, shape index: {}]   ;;  %s7363_s7 = inlined_call_operand.vmem [shape: f32[256,128], index: 7, kind: input, shape index: {}]   ;;  %s7364_s4 = inlined_call_operand.vmem [shape: f32[1,256], index: 4, kind: input, shape index: {}]   ;;  %s7365_s9 = inlined_call_operand.vmem [shape: f32[128,128], index: 9, kind: input, shape index: {}]   ;;  %s7366_s6 = inlined_call_operand.vmem [shape: f32[1,128], index: 6, kind: input, shape index: {}]   ;;  %s7367_s8 = inlined_call_operand.vmem [shape: f32[1,128], index: 8, kind: input, shape index: {}]   ;;  %s7368_s10 = inlined_call_operand.vmem [shape: f32[1,128], index: 10, kind: input, shape index: {}]   ;;  %s7369_s11 = inlined_call_operand.vmem [shape: f32[1,128], index: 11, kind: input, shape index: {}]   ;;  %s7370_s12 = inlined_call_operand.vmem [shape: f32[512,128], index: 12, kind: output, shape index: {}]  }
   0x1   :  { %v106_v0 = vld [vmem:[%s7358_s1 + $0x8] sm:$0xff]  ;;  %v108_v1 = vld [vmem:[%s7358_s1 + $0x18] sm:$0xff]  ;;  %v105_v2 = vld [vmem:[%s7358_s1] sm:$0xff]  ;;  %398 = vmatprep.mubr.f32.mxu0 %v4557_v3  ;;  %686 = vmatprep.mubr.f32.mxu1 %v4557_v3 }
   0x2   :  { %v3683_v4 = vpack.c.bf16 %v108_v1, %v106_v0  ;;  %v107_v5 = vld [vmem:[%s7358_s1 + $0x10] sm:$0xff]  ;;  %v110_v6 = vld [vmem:[%s7358_s1 + $0x28] sm:$0xff]  ;;  %v112_v7 = vld [vmem:[%s7358_s1 + $0x38] sm:$0xff] }
   0x3   :  { %v3685_v8 = vpack.c.bf16 %v107_v5, %v105_v2  ;;  %v3687_v9 = vpack.c.bf16 %v112_v7, %v110_v6  ;;  %v109_v10 = vld [vmem:[%s7358_s1 + $0x20] sm:$0xff]  ;;  %v111_v11 = vld [vmem:[%s7358_s1 + $0x30] sm:$0xff]  ;;  %v114_v12 = vld [vmem:[%s7358_s1 + $0x48] sm:$0xff] }
   0x4   :  { %3684 = vmatprep.subr.bf16.mxu0 %v3683_v4  ;;  %v116_v13 = vld [vmem:[%s7358_s1 + $0x58] sm:$0xff]  ;;  %3899 = vmatprep.subr.bf16.mxu1 %v3683_v4  ;;  %v3689_v14 = vpack.c.bf16 %v111_v11, %v109_v10  ;;  %v113_v16 = vld [vmem:[%s7358_s1 + $0x40] sm:$0xff]  ;;  %v115_v17 = vld [vmem:[%s7358_s1 + $0x50] sm:$0xff] }
   0x5   :  { %3686 = vmatpush1.bf16.msra.mxu0 %v3685_v8  ;;  %3905 = vmatpush1.bf16.msra.mxu1 %v3685_v8  ;;  %v3691_v15 = vpack.c.bf16 %v116_v13, %v114_v12  ;;  %v118_v18 = vld [vmem:[%s7358_s1 + $0x68] sm:$0xff]  ;;  %v120_v19 = vld [vmem:[%s7358_s1 + $0x78] sm:$0xff]  ;;  %v3693_v20 = vpack.c.bf16 %v115_v17, %v113_v16  ;;  %v117_v22 = vld [vmem:[%s7358_s1 + $0x60] sm:$0xff] }
   0x6   :  { %3688 = vmatprep.subr.bf16.mxu0 %v3687_v9  ;;  %3900 = vmatprep.subr.bf16.mxu1 %v3687_v9  ;;  %v3695_v21 = vpack.c.bf16 %v120_v19, %v118_v18  ;;  %v119_v23 = vld [vmem:[%s7358_s1 + $0x70] sm:$0xff]  ;;  %v122_v24 = vld [vmem:[%s7358_s1 + $0x88] sm:$0xff]  ;;  %v124_v25 = vld [vmem:[%s7358_s1 + $0x98] sm:$0xff] }
   0x7   :  { %v3697_v26 = vpack.c.bf16 %v119_v23, %v117_v22  ;;  %v3699_v27 = vpack.c.bf16 %v124_v25, %v122_v24  ;;  %v121_v28 = vld [vmem:[%s7358_s1 + $0x80] sm:$0xff]  ;;  %v123_v29 = vld [vmem:[%s7358_s1 + $0x90] sm:$0xff]  ;;  %v126_v30 = vld [vmem:[%s7358_s1 + $0xa8] sm:$0xff] }
   0x8   :  { %v128_v31 = vld [vmem:[%s7358_s1 + $0xb8] sm:$0xff]  ;;  %v3701_v32 = vpack.c.bf16 %v123_v29, %v121_v28  ;;  %v125_v34 = vld [vmem:[%s7358_s1 + $0xa0] sm:$0xff]  ;;  %v127_v35 = vld [vmem:[%s7358_s1 + $0xb0] sm:$0xff] }
   0x9   :  { %3690 = vmatpush1.bf16.msra.mxu0 %v3689_v14  ;;  %3906 = vmatpush1.bf16.msra.mxu1 %v3689_v14  ;;  %v3703_v33 = vpack.c.bf16 %v128_v31, %v126_v30  ;;  %v3705_v36 = vpack.c.bf16 %v127_v35, %v125_v34  ;;  %v41_v37 = vld [vmem:[%s7359_s0] sm:$0xff]  ;;  %v42_v38 = vld [vmem:[%s7359_s0 + $0x8] sm:$0xff]  ;;  %v43_v39 = vld [vmem:[%s7359_s0 + $0x10] sm:$0xff] }
   0xa   :  { %3692 = vmatprep.subr.bf16.mxu0 %v3691_v15  ;;  %3901 = vmatprep.subr.bf16.mxu1 %v3691_v15  ;;  %v44_v40 = vld [vmem:[%s7359_s0 + $0x18] sm:$0xff]  ;;  %v45_v41 = vld [vmem:[%s7359_s0 + $0x20] sm:$0xff]  ;;  %v46_v42 = vld [vmem:[%s7359_s0 + $0x28] sm:$0xff] }
   0xb   :  { %v47_v43 = vld [vmem:[%s7359_s0 + $0x30] sm:$0xff]  ;;  %v48_v44 = vld [vmem:[%s7359_s0 + $0x38] sm:$0xff]  ;;  %v49_v45 = vld [vmem:[%s7359_s0 + $0x40] sm:$0xff] }
   0xc   :  { %v89_v46 = vld [vmem:[%s7359_s0 + $0x180] sm:$0xff]  ;;  %v912_v47 = vld [vmem:[%s7360_s3 + $0x8] sm:$0xff]  ;;  %v914_v48 = vld [vmem:[%s7360_s3 + $0x18] sm:$0xff] }
   0xd   :  { %3694 = vmatpush1.bf16.msra.mxu0 %v3693_v20  ;;  %3907 = vmatpush1.bf16.msra.mxu1 %v3693_v20  ;;  %v50_v49 = vld [vmem:[%s7359_s0 + $0x48] sm:$0xff]  ;;  %v3707_v50 = vpack.c.bf16 %v914_v48, %v912_v47  ;;  %v911_v51 = vld [vmem:[%s7360_s3] sm:$0xff]  ;;  %v913_v52 = vld [vmem:[%s7360_s3 + $0x10] sm:$0xff] }
   0xe   :  { %3696 = vmatprep.subr.bf16.mxu0 %v3695_v21  ;;  %3902 = vmatprep.subr.bf16.mxu1 %v3695_v21  ;;  %v3709_v53 = vpack.c.bf16 %v913_v52, %v911_v51  ;;  %v90_v54 = vld [vmem:[%s7359_s0 + $0x188] sm:$0xff]  ;;  %v918_v56 = vld [vmem:[%s7360_s3 + $0x38] sm:$0xff]  ;;  %v51_v57 = vld [vmem:[%s7359_s0 + $0x50] sm:$0xff] }
   0xf   :  { %v916_v55 = vld [vmem:[%s7360_s3 + $0x28] sm:$0xff]  ;;  %v915_v59 = vld [vmem:[%s7360_s3 + $0x20] sm:$0xff]  ;;  %v917_v60 = vld [vmem:[%s7360_s3 + $0x30] sm:$0xff] }
  0x10   :  { %v3711_v58 = vpack.c.bf16 %v918_v56, %v916_v55  ;;  %v3713_v61 = vpack.c.bf16 %v917_v60, %v915_v59  ;;  %v91_v62 = vld [vmem:[%s7359_s0 + $0x190] sm:$0xff]  ;;  %v920_v63 = vld [vmem:[%s7360_s3 + $0x48] sm:$0xff]  ;;  %v922_v0 = vld [vmem:[%s7360_s3 + $0x58] sm:$0xff] }
  0x11   :  { %3698 = vmatpush1.bf16.msra.mxu0 %v3697_v26  ;;  %3908 = vmatpush1.bf16.msra.mxu1 %v3697_v26  ;;  %v52_v1 = vld [vmem:[%s7359_s0 + $0x58] sm:$0xff]  ;;  %v3715_v2 = vpack.c.bf16 %v922_v0, %v920_v63  ;;  %v919_v4 = vld [vmem:[%s7360_s3 + $0x40] sm:$0xff]  ;;  %v921_v5 = vld [vmem:[%s7360_s3 + $0x50] sm:$0xff] }
  0x12   :  { %3700 = vmatprep.subr.bf16.mxu0 %v3699_v27  ;;  %3903 = vmatprep.subr.bf16.mxu1 %v3699_v27  ;;  %v3717_v6 = vpack.c.bf16 %v921_v5, %v919_v4  ;;  %v92_v7 = vld [vmem:[%s7359_s0 + $0x198] sm:$0xff]  ;;  %v924_v8 = vld [vmem:[%s7360_s3 + $0x68] sm:$0xff]  ;;  %v53_v10 = vld [vmem:[%s7359_s0 + $0x60] sm:$0xff] }
  0x13   :  { %v926_v9 = vld [vmem:[%s7360_s3 + $0x78] sm:$0xff]  ;;  %v923_v12 = vld [vmem:[%s7360_s3 + $0x60] sm:$0xff]  ;;  %v925_v13 = vld [vmem:[%s7360_s3 + $0x70] sm:$0xff] }
  0x14   :  { %v3719_v11 = vpack.c.bf16 %v926_v9, %v924_v8  ;;  %v3721_v14 = vpack.c.bf16 %v925_v13, %v923_v12  ;;  %v93_v15 = vld [vmem:[%s7359_s0 + $0x1a0] sm:$0xff]  ;;  %v928_v16 = vld [vmem:[%s7360_s3 + $0x88] sm:$0xff]  ;;  %v930_v17 = vld [vmem:[%s7360_s3 + $0x98] sm:$0xff] }
  0x15   :  { %3702 = vmatpush1.bf16.msra.mxu0 %v3701_v32  ;;  %3909 = vmatpush1.bf16.msra.mxu1 %v3701_v32  ;;  %v54_v18 = vld [vmem:[%s7359_s0 + $0x68] sm:$0xff]  ;;  %v3723_v19 = vpack.c.bf16 %v930_v17, %v928_v16  ;;  %v927_v20 = vld [vmem:[%s7360_s3 + $0x80] sm:$0xff]  ;;  %v929_v21 = vld [vmem:[%s7360_s3 + $0x90] sm:$0xff] }
  0x16   :  { %3704 = vmatprep.subr.bf16.mxu0 %v3703_v33  ;;  %3904 = vmatprep.subr.bf16.mxu1 %v3703_v33  ;;  %v3725_v22 = vpack.c.bf16 %v929_v21, %v927_v20  ;;  %v94_v23 = vld [vmem:[%s7359_s0 + $0x1a8] sm:$0xff]  ;;  %v934_v25 = vld [vmem:[%s7360_s3 + $0xb8] sm:$0xff]  ;;  %v55_v26 = vld [vmem:[%s7359_s0 + $0x70] sm:$0xff] }
  0x17   :  { %v932_v24 = vld [vmem:[%s7360_s3 + $0xa8] sm:$0xff]  ;;  %v931_v28 = vld [vmem:[%s7360_s3 + $0xa0] sm:$0xff]  ;;  %v933_v29 = vld [vmem:[%s7360_s3 + $0xb0] sm:$0xff] }
  0x18   :  { %v3727_v27 = vpack.c.bf16 %v934_v25, %v932_v24  ;;  %v3729_v30 = vpack.c.bf16 %v933_v29, %v931_v28  ;;  %v95_v31 = vld [vmem:[%s7359_s0 + $0x1b0] sm:$0xff]  ;;  %v936_v32 = vld [vmem:[%s7360_s3 + $0xc8] sm:$0xff]  ;;  %v938_v33 = vld [vmem:[%s7360_s3 + $0xd8] sm:$0xff] }
  0x19   :  { %3706 = vmatpush1.bf16.msra.mxu0 %v3705_v36  ;;  %3910 = vmatpush1.bf16.msra.mxu1 %v3705_v36  ;;  %v56_v34 = vld [vmem:[%s7359_s0 + $0x78] sm:$0xff]  ;;  %v3731_v35 = vpack.c.bf16 %v938_v33, %v936_v32  ;;  %v935_v36 = vld [vmem:[%s7360_s3 + $0xc0] sm:$0xff]  ;;  %v944_v48 = vld [vmem:[%s7360_s3 + $0x108] sm:$0xff] }
  0x1a   :  { %3708 = vmatprep.subr.bf16.mxu1 %v3707_v50  ;;  %v943_v50 = vld [vmem:[%s7360_s3 + $0x100] sm:$0xff]  ;;  %v945_v52 = vld [vmem:[%s7360_s3 + $0x110] sm:$0xff]  ;;  %v950_v55 = vld [vmem:[%s7360_s3 + $0x138] sm:$0xff] }
  0x1b   :  { %v58_v56 = vld [vmem:[%s7359_s0 + $0x88] sm:$0xff]  ;;  %v59_v0 = vld [vmem:[%s7359_s0 + $0x90] sm:$0xff]  ;;  %v60_v9 = vld [vmem:[%s7359_s0 + $0x98] sm:$0xff] }
  0x1c   :  { %3407 = vmatmul.mubr.msk.f32.vlgmr.msra.gmra.mrb[0].mxu0 %vm141_vm0, %v41_v37  ;;  %3455 = vmatmul.mubr.msk.f32.vlgmr.msra.gmra.mrb[0].mxu1 %vm141_vm0, %v89_v46  ;;  %v937_v37 = vld [vmem:[%s7360_s3 + $0xd0] sm:$0xff]  ;;  %v97_v46 = vld [vmem:[%s7359_s0 + $0x1c0] sm:$0xff]  ;;  %v98_v59 = vld [vmem:[%s7359_s0 + $0x1c8] sm:$0xff] }
  0x1d   :  { %404 = vmatprep.mubr.f32.mxu0 %v4557_v3  ;;  %692 = vmatprep.mubr.f32.mxu1 %v4557_v3  ;;  %v99_v4 = vld [vmem:[%s7359_s0 + $0x1d0] sm:$0xff]  ;;  %v100_v12 = vld [vmem:[%s7359_s0 + $0x1d8] sm:$0xff]  ;;  %v61_v17 = vld [vmem:[%s7359_s0 + $0xa0] sm:$0xff] }
  0x1e   :  { %3710 = vmatpush1.bf16.msra.mxu1 %v3709_v53  ;;  %v948_v53 = vld [vmem:[%s7360_s3 + $0x128] sm:$0xff]  ;;  %v959_v21 = vld [vmem:[%s7360_s3 + $0x180] sm:$0xff]  ;;  %v63_v24 = vld [vmem:[%s7359_s0 + $0xb0] sm:$0xff] }
  0x1f   :  { %3712 = vmatprep.subr.bf16.mxu1 %v3711_v58  ;;  %v949_v58 = vld [vmem:[%s7360_s3 + $0x130] sm:$0xff]  ;;  %v3743_v60 = vpack.c.bf16 %v950_v55, %v948_v53  ;;  %v62_v20 = vld [vmem:[%s7359_s0 + $0xa8] sm:$0xff]  ;;  %v963_v29 = vld [vmem:[%s7360_s3 + $0x1a0] sm:$0xff] }
  0x20   :  { %3408 = vmatmul.mubr.msk.f32.gmra.mrb[2].mxu0 %vm141_vm0, %v42_v38  ;;  %3456 = vmatmul.mubr.msk.f32.gmra.mrb[2].mxu1 %vm141_vm0, %v90_v54  ;;  %v3733_v38 = vpack.c.bf16 %v937_v37, %v935_v36  ;;  %v3741_v54 = vpack.c.bf16 %v945_v52, %v943_v50  ;;  %v964_v25 = vld [vmem:[%s7360_s3 + $0x1a8] sm:$0xff]  ;;  %v64_v32 = vld [vmem:[%s7359_s0 + $0xb8] sm:$0xff]  ;;  %v967_v37 = vld [vmem:[%s7360_s3 + $0x1c0] sm:$0xff] }
  0x21   :  { %410 = vmatprep.mubr.f32.mxu0 %v4557_v3  ;;  %698 = vmatprep.mubr.f32.mxu1 %v4557_v3  ;;  %v968_v33 = vld [vmem:[%s7360_s3 + $0x1c8] sm:$0xff]  ;;  %v67_v50 = vld [vmem:[%s7359_s0 + $0xd0] sm:$0xff]  ;;  %v69_v52 = vld [vmem:[%s7359_s0 + $0xe0] sm:$0xff] }
  0x22   :  { %3714 = vmatpush1.bf16.msra.mxu1 %v3713_v61  ;;  %v952_v61 = vld [vmem:[%s7360_s3 + $0x148] sm:$0xff]  ;;  %v72_v55 = vld [vmem:[%s7359_s0 + $0xf8] sm:$0xff] }
  0x23   :  { %3716 = vmatprep.subr.bf16.mxu1 %v3715_v2  ;;  %v953_v2 = vld [vmem:[%s7360_s3 + $0x150] sm:$0xff]  ;;  %v70_v53 = vld [vmem:[%s7359_s0 + $0xe8] sm:$0xff] }
  0x24   :  { %3409 = vmatmul.mubr.msk.f32.gmra.mrb[4].mxu0 %vm141_vm0, %v43_v39  ;;  %3457 = vmatmul.mubr.msk.f32.gmra.mrb[4].mxu1 %vm141_vm0, %v91_v62  ;;  %v57_v39 = vld [vmem:[%s7359_s0 + $0x80] sm:$0xff]  ;;  %v954_v62 = vld [vmem:[%s7360_s3 + $0x158] sm:$0xff] }
  0x25   :  { %416 = vmatprep.mubr.f32.mxu0 %v4557_v3  ;;  %704 = vmatprep.mubr.f32.mxu1 %v4557_v3  ;;  %v3747_v5 = vpack.c.bf16 %v954_v62, %v952_v61  ;;  %v78_v61 = vld [vmem:[%s7359_s0 + $0x128] sm:$0xff]  ;;  %v79_v62 = vld [vmem:[%s7359_s0 + $0x130] sm:$0xff] }
  0x26   :  { %3718 = vmatpush1.bf16.msra.mxu1 %v3717_v6  ;;  %v956_v6 = vld [vmem:[%s7360_s3 + $0x168] sm:$0xff] }
  0x27   :  { %3720 = vmatprep.subr.bf16.mxu1 %v3719_v11  ;;  %v957_v11 = vld [vmem:[%s7360_s3 + $0x170] sm:$0xff] }
  0x28   :  { %3410 = vmatmul.mubr.msk.f32.gmra.mrb[6].mxu0 %vm141_vm0, %v44_v40  ;;  %3458 = vmatmul.mubr.msk.f32.gmra.mrb[6].mxu1 %vm141_vm0, %v92_v7  ;;  %v96_v40 = vld [vmem:[%s7359_s0 + $0x1b8] sm:$0xff] }
  0x29   :  { %422 = vmatprep.mubr.f32.mxu0 %v4557_v3  ;;  %710 = vmatprep.mubr.f32.mxu1 %v4557_v3  ;;  %v958_v7 = vld [vmem:[%s7360_s3 + $0x178] sm:$0xff] }
  0x2a   :  { %3722 = vmatpush1.bf16.msra.mxu1 %v3721_v14  ;;  %v3751_v13 = vpack.c.bf16 %v958_v7, %v956_v6  ;;  %v960_v14 = vld [vmem:[%s7360_s3 + $0x188] sm:$0xff]  ;;  %v84_v7 = vld [vmem:[%s7359_s0 + $0x158] sm:$0xff] }
  0x2b   :  { %3724 = vmatprep.subr.bf16.mxu1 %v3723_v19 }
  0x2c   :  { %3411 = vmatmul.mubr.msk.f32.gmra.mrb[8].mxu0 %vm141_vm0, %v45_v41  ;;  %3459 = vmatmul.mubr.msk.f32.gmra.mrb[8].mxu1 %vm141_vm0, %v93_v15  ;;  %v940_v41 = vld [vmem:[%s7360_s3 + $0xe8] sm:$0xff]  ;;  %v962_v15 = vld [vmem:[%s7360_s3 + $0x198] sm:$0xff] }
  0x2d   :  { %428 = vmatprep.mubr.f32.mxu0 %v4557_v3  ;;  %716 = vmatprep.mubr.f32.mxu1 %v4557_v3  ;;  %v3755_v19 = vpack.c.bf16 %v962_v15, %v960_v14  ;;  %v88_v14 = vld [vmem:[%s7359_s0 + $0x178] sm:$0xff]  ;;  %v1568_v15 = vld [vmem:[%s7361_s5 + $0x20] sm:$0xff] }
  0x2e   :  { %3726 = vmatpush1.bf16.msra.mxu1 %v3725_v22  ;;  %v961_v22 = vld [vmem:[%s7360_s3 + $0x190] sm:$0xff] }
  0x2f   :  { %3728 = vmatprep.subr.bf16.mxu1 %v3727_v27  ;;  %v102_v27 = vld [vmem:[%s7359_s0 + $0x1e8] sm:$0xff] }
  0x30   :  { %3412 = vmatmul.mubr.msk.f32.gmra.mrb[10].mxu0 %vm141_vm0, %v46_v42  ;;  %3460 = vmatmul.mubr.msk.f32.gmra.mrb[10].mxu1 %vm141_vm0, %v94_v23  ;;  %v942_v42 = vld [vmem:[%s7360_s3 + $0xf8] sm:$0xff]  ;;  %v3757_v23 = vpack.c.bf16 %v961_v22, %v959_v21 }
  0x31   :  { %434 = vmatprep.mubr.f32.mxu0 %v4557_v3  ;;  %722 = vmatprep.mubr.f32.mxu1 %v4557_v3 }
  0x32   :  { %3730 = vmatpush1.bf16.msra.mxu1 %v3729_v30  ;;  %v965_v30 = vld [vmem:[%s7360_s3 + $0x1b0] sm:$0xff] }
  0x33   :  { %3732 = vmatprep.subr.bf16.mxu1 %v3731_v35  ;;  %v103_v35 = vld [vmem:[%s7359_s0 + $0x1f0] sm:$0xff] }
  0x34   :  { %3413 = vmatmul.mubr.msk.f32.gmra.mrb[12].mxu0 %vm141_vm0, %v47_v43  ;;  %3461 = vmatmul.mubr.msk.f32.gmra.mrb[12].mxu1 %vm141_vm0, %v95_v31  ;;  %v3735_v43 = vpack.c.bf16 %v942_v42, %v940_v41  ;;  %v3761_v31 = vpack.c.bf16 %v965_v30, %v963_v29  ;;  %v972_v41 = vld [vmem:[%s7360_s3 + $0x1e8] sm:$0xff]  ;;  %v974_v42 = vld [vmem:[%s7360_s3 + $0x1f8] sm:$0xff] }
  0x35   :  { %440 = vmatprep.mubr.f32.mxu0 %v4557_v3  ;;  %728 = vmatprep.mubr.f32.mxu1 %v4557_v3 }
  0x36   :  { %3734 = vmatpush1.bf16.msra.mxu1 %v3733_v38  ;;  %v969_v38 = vld [vmem:[%s7360_s3 + $0x1d0] sm:$0xff] }
  0x37   :  { %3736 = vmatprep.subr.bf16.mxu1 %v3735_v43  ;;  %v104_v43 = vld [vmem:[%s7359_s0 + $0x1f8] sm:$0xff] }
  0x38   :  { %3414 = vmatmul.mubr.msk.f32.gmra.mrb[14].mxu0 %vm141_vm0, %v48_v44  ;;  %3462 = vmatmul.mubr.msk.f32.gmra.mrb[14].mxu1 %vm141_vm0, %v96_v40  ;;  %v939_v44 = vld [vmem:[%s7360_s3 + $0xe0] sm:$0xff] }
  0x39   :  { %446 = vmatprep.mubr.f32.mxu0 %v4557_v3  ;;  %734 = vmatprep.mubr.f32.mxu1 %v4557_v3  ;;  %v65_v40 = vld [vmem:[%s7359_s0 + $0xc0] sm:$0xff] }
  0x3c   :  { %3415 = vmatmul.mubr.msk.f32.gmra.mrb[16].mxu0 %vm141_vm0, %v49_v45  ;;  %v941_v45 = vld [vmem:[%s7360_s3 + $0xf0] sm:$0xff]  ;;  %3463 = vmatmul.mubr.msk.f32.gmra.mrb[16].mxu1 %vm141_vm0, %v97_v46 }
  0x3d   :  { %452 = vmatprep.mubr.f32.mxu0 %v4557_v3  ;;  %v3737_v47 = vpack.c.bf16 %v941_v45, %v939_v44  ;;  %740 = vmatprep.mubr.f32.mxu1 %v4557_v3  ;;  %v3767_v44 = vpack.c.bf16 %v974_v42, %v972_v41  ;;  %v971_v45 = vld [vmem:[%s7360_s3 + $0x1e0] sm:$0xff]  ;;  %v973_v46 = vld [vmem:[%s7360_s3 + $0x1f0] sm:$0xff] }
  0x3e   :  { %v1988_v42 = vld [vmem:[%s7363_s7] sm:$0xff] }
  0x3f   :  { %3738 = vmatpush1.bf16.msra.mxu1 %v3737_v47  ;;  %v3769_v47 = vpack.c.bf16 %v973_v46, %v971_v45 }
  0x40   :  { %3416 = vmatmul.mubr.msk.f32.gmra.mrb[18].mxu0 %vm141_vm0, %v50_v49  ;;  %v946_v49 = vld [vmem:[%s7360_s3 + $0x118] sm:$0xff]  ;;  %3464 = vmatmul.mubr.msk.f32.gmra.mrb[18].mxu1 %vm141_vm0, %v98_v59 }
  0x41   :  { %458 = vmatprep.mubr.f32.mxu0 %v4557_v3  ;;  %v3739_v51 = vpack.c.bf16 %v946_v49, %v944_v48  ;;  %746 = vmatprep.mubr.f32.mxu1 %v4557_v3  ;;  %v66_v48 = vld [vmem:[%s7359_s0 + $0xc8] sm:$0xff]  ;;  %v4558_v49 = vmov 0.0|0.0   ;;  %v76_v59 = vld [vmem:[%s7359_s0 + $0x118] sm:$0xff] }
  0x42   :  { %3771 = vmatprep.subr.bf16.mxu0 %v4558_v49 }
  0x43   :  { %3740 = vmatprep.subr.bf16.mxu1 %v3739_v51  ;;  %v68_v51 = vld [vmem:[%s7359_s0 + $0xd8] sm:$0xff] }
  0x44   :  { %3417 = vmatmul.mubr.msk.f32.gmra.mrb[20].mxu0 %vm141_vm0, %v51_v57  ;;  %v947_v57 = vld [vmem:[%s7360_s3 + $0x120] sm:$0xff]  ;;  %3742 = vmatpush1.bf16.msra.mxu1 %v3741_v54  ;;  %v71_v54 = vld [vmem:[%s7359_s0 + $0xf0] sm:$0xff] }
  0x45   :  { %464 = vmatprep.mubr.f32.mxu0 %v4557_v3  ;;  %v3745_v63 = vpack.c.bf16 %v949_v58, %v947_v57  ;;  %3744 = vmatprep.subr.bf16.mxu1 %v3743_v60  ;;  %v74_v57 = vld [vmem:[%s7359_s0 + $0x108] sm:$0xff]  ;;  %v75_v58 = vld [vmem:[%s7359_s0 + $0x110] sm:$0xff]  ;;  %v77_v60 = vld [vmem:[%s7359_s0 + $0x120] sm:$0xff] }
  0x46   :  { %3465 = vmatmul.mubr.msk.f32.gmra.mrb[20].mxu1 %vm141_vm0, %v99_v4  ;;  %v1564_v4 = vld [vmem:[%s7361_s5] sm:$0xff] }
  0x47   :  { %752 = vmatprep.mubr.f32.mxu1 %v4557_v3 }
  0x48   :  { %3418 = vmatmul.mubr.msk.f32.gmra.mrb[22].mxu0 %vm141_vm0, %v52_v1  ;;  %v951_v1 = vld [vmem:[%s7360_s3 + $0x140] sm:$0xff]  ;;  %3746 = vmatpush1.bf16.msra.mxu1 %v3745_v63  ;;  %v80_v63 = vld [vmem:[%s7359_s0 + $0x138] sm:$0xff] }
  0x49   :  { %470 = vmatprep.mubr.f32.mxu0 %v4557_v3  ;;  %v3749_v8 = vpack.c.bf16 %v953_v2, %v951_v1  ;;  %3748 = vmatprep.subr.bf16.mxu1 %v3747_v5  ;;  %v82_v1 = vld [vmem:[%s7359_s0 + $0x148] sm:$0xff]  ;;  %v83_v2 = vld [vmem:[%s7359_s0 + $0x150] sm:$0xff] }
  0x4a   :  { %3466 = vmatmul.mubr.msk.f32.gmra.mrb[22].mxu1 %vm141_vm0, %v100_v12  ;;  %v1565_v5 = vld [vmem:[%s7361_s5 + $0x8] sm:$0xff] }
  0x4b   :  { %758 = vmatprep.mubr.f32.mxu1 %v4557_v3  ;;  %v3772_v6 = vpack.c.bf16 %v1565_v5, %v1564_v4 }
  0x4c   :  { %3419 = vmatmul.mubr.msk.f32.gmra.mrb[24].mxu0 %vm141_vm0, %v53_v10  ;;  %v955_v10 = vld [vmem:[%s7360_s3 + $0x160] sm:$0xff]  ;;  %3750 = vmatpush1.bf16.msra.mxu1 %v3749_v8 }
  0x4d   :  { %476 = vmatprep.mubr.f32.mxu0 %v4557_v3  ;;  %v3753_v16 = vpack.c.bf16 %v957_v11, %v955_v10  ;;  %3752 = vmatprep.subr.bf16.mxu1 %v3751_v13  ;;  %v85_v8 = vld [vmem:[%s7359_s0 + $0x160] sm:$0xff]  ;;  %v1566_v10 = vld [vmem:[%s7361_s5 + $0x10] sm:$0xff]  ;;  %v1567_v11 = vld [vmem:[%s7361_s5 + $0x18] sm:$0xff] }
  0x4e   :  { %3773 = vmatpush1.bf16.msra.mxu0 %v3772_v6  ;;  %v3775_v12 = vpack.c.bf16 %v1567_v11, %v1566_v10  ;;  %v87_v13 = vld [vmem:[%s7359_s0 + $0x170] sm:$0xff]  ;;  %v1995_v10 = vld [vmem:[%s7363_s7 + $0x38] sm:$0xff] }
  0x4f   :  { %3774 = vmatprep.subr.bf16.mxu0 %v4558_v49 }
  0x50   :  { %3420 = vmatmul.mubr.msk.f32.gmra.mrb[26].mxu0 %vm141_vm0, %v54_v18  ;;  %v101_v18 = vld [vmem:[%s7359_s0 + $0x1e0] sm:$0xff]  ;;  %3754 = vmatpush1.bf16.msra.mxu1 %v3753_v16  ;;  %v1569_v16 = vld [vmem:[%s7361_s5 + $0x28] sm:$0xff] }
  0x51   :  { %482 = vmatprep.mubr.f32.mxu0 %v4557_v3  ;;  %3467 = vmatmul.mubr.msk.f32.gmra.mrb[24].mxu1 %vm141_vm0, %v101_v18  ;;  %v131_v18 = vlaneseq }
  0x52   :  { %3756 = vmatprep.subr.bf16.mxu1 %v3755_v19  ;;  %764 = vmatprep.mubr.f32.mxu1 %v4557_v3  ;;  %v1570_v19 = vld [vmem:[%s7361_s5 + $0x30] sm:$0xff] }
  0x53   :  { %3776 = vmatpush1.bf16.msra.mxu0 %v3775_v12 }
  0x54   :  { %3421 = vmatmul.mubr.msk.f32.gmra.mrb[28].mxu0 %vm141_vm0, %v55_v26  ;;  %3758 = vmatpush1.bf16.msra.mxu1 %v3757_v23  ;;  %v966_v26 = vld [vmem:[%s7360_s3 + $0x1b8] sm:$0xff]  ;;  %v129_v23 = vld [vmem:[%s7362_s2] sm:$0x3] }
  0x55   :  { %488 = vmatprep.mubr.f32.mxu0 %v4557_v3  ;;  %v3759_v28 = vpack.c.bf16 %v966_v26, %v964_v25  ;;  %3468 = vmatmul.mubr.msk.f32.gmra.mrb[26].mxu1 %vm141_vm0, %v102_v27 }
  0x56   :  { %770 = vmatprep.mubr.f32.mxu1 %v4557_v3  ;;  %3777 = vmatprep.subr.bf16.mxu0 %v4558_v49 }
  0x57   :  { %3760 = vmatprep.subr.bf16.mxu1 %v3759_v28 }
  0x58   :  { %3422 = vmatmul.mubr.msk.f32.gmra.mrb[30].mxu0 %vm141_vm0, %v56_v34  ;;  %3762 = vmatpush1.bf16.msra.mxu1 %v3761_v31  ;;  %v970_v34 = vld [vmem:[%s7360_s3 + $0x1d8] sm:$0xff]  ;;  %v1572_v31 = vld [vmem:[%s7361_s5 + $0x40] sm:$0xff] }
  0x59   :  { %494 = vmatprep.mubr.f32.mxu0 %v4557_v3  ;;  %v3763_v36 = vpack.c.bf16 %v970_v34, %v968_v33  ;;  %3469 = vmatmul.mubr.msk.f32.gmra.mrb[28].mxu1 %vm141_vm0, %v103_v35 }
  0x5a   :  { %776 = vmatprep.mubr.f32.mxu1 %v4557_v3 }
  0x5b   :  { %3764 = vmatprep.subr.bf16.mxu1 %v3763_v36 }
  0x5c   :  { %3423 = vmatmul.mubr.msk.f32.gmra.mrb[32].mxu0 %vm141_vm0, %v57_v39  ;;  %v3765_v39 = vpack.c.bf16 %v969_v38, %v967_v37 }
  0x5d   :  { %500 = vmatprep.mubr.f32.mxu0 %v4557_v3  ;;  %3470 = vmatmul.mubr.msk.f32.gmra.mrb[30].mxu1 %vm141_vm0, %v104_v43  ;;  %v1989_v43 = vld [vmem:[%s7363_s7 + $0x8] sm:$0xff] }
  0x5e   :  { %3766 = vmatpush1.bf16.msra.mxu1 %v3765_v39 }
  0x5f   :  { %3768 = vmatprep.subr.bf16.mxu1 %v3767_v44 }
  0x60   :  { %3424 = vmatmul.mubr.msk.f32.gmra.mrb[34].mxu0 %vm141_vm0, %v58_v56  ;;  %v73_v56 = vld [vmem:[%s7359_s0 + $0x100] sm:$0xff] }
  0x61   :  { %506 = vmatprep.mubr.f32.mxu0 %v4557_v3 }
  0x62   :  { %3770 = vmatpush1.bf16.msra.mxu1 %v3769_v47  ;;  %v3820_v47 = vpack.c.bf16 %v1989_v43, %v1988_v42  ;;  %v2000_v43 = vld [vmem:[%s7363_s7 + $0x60] sm:$0xff] }
  0x63   :  { %3819 = vmatprep.subr.bf16.mxu1 %v4558_v49 }
  0x64   :  { %3425 = vmatmul.mubr.msk.f32.gmra.mrb[36].mxu0 %vm141_vm0, %v59_v0  ;;  %v81_v0 = vld [vmem:[%s7359_s0 + $0x140] sm:$0xff] }
  0x65   :  { %512 = vmatprep.mubr.f32.mxu0 %v4557_v3 }
  0x68   :  { %3426 = vmatmul.mubr.msk.f32.gmra.mrb[38].mxu0 %vm141_vm0, %v60_v9  ;;  %v86_v9 = vld [vmem:[%s7359_s0 + $0x168] sm:$0xff] }
  0x69   :  { %518 = vmatprep.mubr.f32.mxu0 %v4557_v3 }
  0x6c   :  { %3427 = vmatmul.mubr.msk.f32.gmra.mrb[40].mxu0 %vm141_vm0, %v61_v17  ;;  %v3778_v17 = vpack.c.bf16 %v1569_v16, %v1568_v15 }
  0x6d   :  { %524 = vmatprep.mubr.f32.mxu0 %v4557_v3 }
  0x6e   :  { %3779 = vmatpush1.bf16.msra.mxu0 %v3778_v17 }
  0x6f   :  { %3780 = vmatprep.subr.bf16.mxu0 %v4558_v49 }
  0x70   :  { %3428 = vmatmul.mubr.msk.f32.gmra.mrb[42].mxu0 %vm141_vm0, %v62_v20  ;;  %v1571_v20 = vld [vmem:[%s7361_s5 + $0x38] sm:$0xff] }
  0x71   :  { %530 = vmatprep.mubr.f32.mxu0 %v4557_v3  ;;  %v3781_v21 = vpack.c.bf16 %v1571_v20, %v1570_v19  ;;  %v1997_v19 = vld [vmem:[%s7363_s7 + $0x48] sm:$0xff] }
  0x73   :  { %3782 = vmatpush1.bf16.msra.mxu0 %v3781_v21  ;;  %v1576_v21 = vld [vmem:[%s7361_s5 + $0x60] sm:$0xff] }
  0x74   :  { %3429 = vmatmul.mubr.msk.f32.gmra.mrb[44].mxu0 %vm141_vm0, %v63_v24  ;;  %3783 = vmatprep.subr.bf16.mxu0 %v4558_v49 }
  0x75   :  { %536 = vmatprep.mubr.f32.mxu0 %v4557_v3 }
  0x78   :  { %3430 = vmatmul.mubr.msk.f32.gmra.mrb[46].mxu0 %vm141_vm0, %v64_v32  ;;  %v1573_v32 = vld [vmem:[%s7361_s5 + $0x48] sm:$0xff] }
  0x79   :  { %542 = vmatprep.mubr.f32.mxu0 %v4557_v3  ;;  %v3784_v34 = vpack.c.bf16 %v1573_v32, %v1572_v31 }
  0x7b   :  { %3785 = vmatpush1.bf16.msra.mxu0 %v3784_v34  ;;  %v1998_v34 = vld [vmem:[%s7363_s7 + $0x50] sm:$0xff] }
  0x7c   :  { %3431 = vmatmul.mubr.msk.f32.gmra.mrb[48].mxu0 %vm141_vm0, %v65_v40  ;;  %3786 = vmatprep.subr.bf16.mxu0 %v4558_v49 }
  0x7d   :  { %548 = vmatprep.mubr.f32.mxu0 %v4557_v3 }
  0x80   :  { %3432 = vmatmul.mubr.msk.f32.gmra.mrb[50].mxu0 %vm141_vm0, %v66_v48 }
  0x81   :  { %554 = vmatprep.mubr.f32.mxu0 %v4557_v3 }
  0x84   :  { %3433 = vmatmul.mubr.msk.f32.gmra.mrb[52].mxu0 %vm141_vm0, %v67_v50 }
  0x85   :  { %560 = vmatprep.mubr.f32.mxu0 %v4557_v3 }
  0x88   :  { %3434 = vmatmul.mubr.msk.f32.gmra.mrb[54].mxu0 %vm141_vm0, %v68_v51  ;;  %v1990_v51 = vld [vmem:[%s7363_s7 + $0x10] sm:$0xff] }
  0x89   :  { %566 = vmatprep.mubr.f32.mxu0 %v4557_v3 }
  0x8c   :  { %3435 = vmatmul.mubr.msk.f32.gmra.mrb[56].mxu0 %vm141_vm0, %v69_v52  ;;  %v1991_v52 = vld [vmem:[%s7363_s7 + $0x18] sm:$0xff] }
  0x8d   :  { %572 = vmatprep.mubr.f32.mxu0 %v4557_v3 }
  0x90   :  { %3436 = vmatmul.mubr.msk.f32.gmra.mrb[58].mxu0 %vm141_vm0, %v70_v53 }
  0x91   :  { %578 = vmatprep.mubr.f32.mxu0 %v4557_v3 }
  0x94   :  { %3437 = vmatmul.mubr.msk.f32.gmra.mrb[60].mxu0 %vm141_vm0, %v71_v54  ;;  %v1574_v54 = vld [vmem:[%s7361_s5 + $0x50] sm:$0xff] }
  0x95   :  { %584 = vmatprep.mubr.f32.mxu0 %v4557_v3 }
  0x98   :  { %3438 = vmatmul.mubr.msk.f32.gmra.mrb[62].mxu0 %vm141_vm0, %v72_v55  ;;  %v1575_v55 = vld [vmem:[%s7361_s5 + $0x58] sm:$0xff] }
  0x99   :  { %590 = vmatprep.mubr.f32.mxu0 %v4557_v3 }
  0x9c   :  { %3439 = vmatmul.mubr.msk.f32.gmra.mrb[64].mxu0 %vm141_vm0, %v73_v56 }
  0x9d   :  { %596 = vmatprep.mubr.f32.mxu0 %v4557_v3 }
  0xa0   :  { %3440 = vmatmul.mubr.msk.f32.gmra.mrb[66].mxu0 %vm141_vm0, %v74_v57  ;;  %v3787_v57 = vpack.c.bf16 %v1575_v55, %v1574_v54  ;;  %v2002_v55 = vld [vmem:[%s7363_s7 + $0x70] sm:$0xff] }
  0xa1   :  { %602 = vmatprep.mubr.f32.mxu0 %v4557_v3 }
  0xa2   :  { %3788 = vmatpush1.bf16.msra.mxu0 %v3787_v57 }
  0xa3   :  { %3789 = vmatprep.subr.bf16.mxu0 %v4558_v49 }
  0xa4   :  { %3441 = vmatmul.mubr.msk.f32.gmra.mrb[68].mxu0 %vm141_vm0, %v75_v58 }
  0xa5   :  { %608 = vmatprep.mubr.f32.mxu0 %v4557_v3 }
  0xa8   :  { %3442 = vmatmul.mubr.msk.f32.gmra.mrb[70].mxu0 %vm141_vm0, %v76_v59 }
  0xa9   :  { %614 = vmatprep.mubr.f32.mxu0 %v4557_v3 }
  0xac   :  { %3443 = vmatmul.mubr.msk.f32.gmra.mrb[72].mxu0 %vm141_vm0, %v77_v60  ;;  %v3823_v60 = vpack.c.bf16 %v1991_v52, %v1990_v51 }
  0xad   :  { %620 = vmatprep.mubr.f32.mxu0 %v4557_v3 }
  0xb0   :  { %3444 = vmatmul.mubr.msk.f32.gmra.mrb[74].mxu0 %vm141_vm0, %v78_v61 }
  0xb1   :  { %626 = vmatprep.mubr.f32.mxu0 %v4557_v3 }
  0xb4   :  { %3445 = vmatmul.mubr.msk.f32.gmra.mrb[76].mxu0 %vm141_vm0, %v79_v62 }
  0xb5   :  { %632 = vmatprep.mubr.f32.mxu0 %v4557_v3 }
  0xb8   :  { %3446 = vmatmul.mubr.msk.f32.gmra.mrb[78].mxu0 %vm141_vm0, %v80_v63  ;;  %v1992_v63 = vld [vmem:[%s7363_s7 + $0x20] sm:$0xff] }
  0xb9   :  { %638 = vmatprep.mubr.f32.mxu0 %v4557_v3 }
  0xbc   :  { %3447 = vmatmul.mubr.msk.f32.gmra.mrb[80].mxu0 %vm141_vm0, %v81_v0  ;;  %v1993_v0 = vld [vmem:[%s7363_s7 + $0x28] sm:$0xff] }
  0xbd   :  { %644 = vmatprep.mubr.f32.mxu0 %v4557_v3  ;;  %v3826_v6 = vpack.c.bf16 %v1993_v0, %v1992_v63 }
  0xc0   :  { %3448 = vmatmul.mubr.msk.f32.gmra.mrb[82].mxu0 %vm141_vm0, %v82_v1 }
  0xc1   :  { %650 = vmatprep.mubr.f32.mxu0 %v4557_v3 }
  0xc4   :  { %3449 = vmatmul.mubr.msk.f32.gmra.mrb[84].mxu0 %vm141_vm0, %v83_v2 }
  0xc5   :  { %656 = vmatprep.mubr.f32.mxu0 %v4557_v3 }
  0xc8   :  { %3450 = vmatmul.mubr.msk.f32.gmra.mrb[86].mxu0 %vm141_vm0, %v84_v7 }
  0xc9   :  { %662 = vmatprep.mubr.f32.mxu0 %v4557_v3 }
  0xcc   :  { %3451 = vmatmul.mubr.msk.f32.gmra.mrb[88].mxu0 %vm141_vm0, %v85_v8 }
  0xcd   :  { %668 = vmatprep.mubr.f32.mxu0 %v4557_v3 }
  0xd0   :  { %3452 = vmatmul.mubr.msk.f32.gmra.mrb[90].mxu0 %vm141_vm0, %v86_v9  ;;  %v1994_v9 = vld [vmem:[%s7363_s7 + $0x30] sm:$0xff] }
  0xd1   :  { %674 = vmatprep.mubr.f32.mxu0 %v4557_v3  ;;  %v3829_v15 = vpack.c.bf16 %v1995_v10, %v1994_v9 }
  0xd4   :  { %3453 = vmatmul.mubr.msk.f32.gmra.mrb[92].mxu0 %vm141_vm0, %v87_v13 }
  0xd5   :  { %680 = vmatprep.mubr.f32.mxu0 %v4557_v3  ;;  %v5231_v3 = vshrl.u32 %v131_v18, 7  ;;  %v1996_v18 = vld [vmem:[%s7363_s7 + $0x40] sm:$0xff] }
  0xd6   :  { %v3832_v31 = vpack.c.bf16 %v1997_v19, %v1996_v18  ;;  %v2007_v18 = vld [vmem:[%s7363_s7 + $0x98] sm:$0xff] }
  0xd7   :  { %v133_v22 = vsub.s32 0, %v5231_v3  ;;  %v137_v24 = vsub.s32 1, %v5231_v3 }
  0xd8   :  { %3454 = vmatmul.mubr.msk.f32.gmra.mrb[94].mxu0 %vm141_vm0, %v88_v14 }
  0xd9   :  { %v5247_v25 = vrot.slane %v129_v23, %v133_v22  ;;  %v5251_v26 = vrot.slane %v129_v23, %v137_v24  ;;  %v1577_v23 = vld [vmem:[%s7361_s5 + $0x68] sm:$0xff] }
  0xef   :  { %v400_v27 = vpop.f32.mrb[0].mxu0 }
  0xf0   :  { %v401_v28 = vadd.f32 %v400_v27, %v5247_v25  ;;  %v402_v29 = vpop.f32.mrb[1].mxu0 }
  0xf1   :  { %v403_v30 = vadd.f32 %v402_v29, %v5251_v26 }
  0xf3   :  { %3913 = vtanh.f32 %v403_v30  ;;  %v406_v33 = vpop.f32.mrb[2].mxu0 }
  0xf4   :  { %3915 = vtanh.f32 %v401_v28  ;;  %v407_v35 = vadd.f32 %v406_v33, %v5247_v25  ;;  %v408_v36 = vpop.f32.mrb[3].mxu0  ;;  %v3790_v28 = vpack.c.bf16 %v1577_v23, %v1576_v21 }
  0xf5   :  { %v409_v37 = vadd.f32 %v408_v36, %v5251_v26 }
  0xf6   :  { %3791 = vmatpush1.bf16.msra.mxu0 %v3790_v28 }
  0xf7   :  { %3917 = vtanh.f32 %v409_v37  ;;  %v412_v38 = vpop.f32.mrb[4].mxu0  ;;  %3792 = vmatprep.subr.bf16.mxu0 %v4558_v49 }
  0xf8   :  { %3919 = vtanh.f32 %v407_v35  ;;  %v413_v39 = vadd.f32 %v412_v38, %v5247_v25  ;;  %v414_v40 = vpop.f32.mrb[5].mxu0  ;;  %v1999_v35 = vld [vmem:[%s7363_s7 + $0x58] sm:$0xff] }
  0xf9   :  { %v415_v41 = vadd.f32 %v414_v40, %v5251_v26  ;;  %v3835_v40 = vpack.c.bf16 %v1999_v35, %v1998_v34  ;;  %v1580_v34 = vld [vmem:[%s7361_s5 + $0x80] sm:$0xff]  ;;  %v1581_v35 = vld [vmem:[%s7361_s5 + $0x88] sm:$0xff] }
  0xfb   :  { %3921 = vtanh.f32 %v415_v41  ;;  %v418_v44 = vpop.f32.mrb[6].mxu0 }
  0xfc   :  { %3923 = vtanh.f32 %v413_v39  ;;  %v419_v45 = vadd.f32 %v418_v44, %v5247_v25  ;;  %v420_v46 = vpop.f32.mrb[7].mxu0  ;;  %v2001_v44 = vld [vmem:[%s7363_s7 + $0x68] sm:$0xff] }
  0xfd   :  { %v3914_v48 = vpop.eup %3913  ;;  %v421_v50 = vadd.f32 %v420_v46, %v5251_v26  ;;  %v3838_v52 = vpack.c.bf16 %v2001_v44, %v2000_v43 }
  0xfe   :  { %v3916_v53 = vpop.eup %3915  ;;  %1051 = vmatprep.mubr.f32.mxu1 %v3914_v48 }
  0xff   :  { %3925 = vtanh.f32 %v421_v50  ;;  %v424_v56 = vpop.f32.mrb[8].mxu0  ;;  %1052 = vmatmul.mubr.f32.vlgmr.msra.gmra.mrb[32].mxu1 %v3916_v53 }
 0x100   :  { %3927 = vtanh.f32 %v419_v45  ;;  %v425_v58 = vadd.f32 %v424_v56, %v5247_v25  ;;  %3821 = vmatpush1.bf16.msra.mxu1 %v3820_v47  ;;  %v426_v59 = vpop.f32.mrb[9].mxu0  ;;  %v5339_v45 = vpop.f32.mrb[0].mxu1  ;;  %v2003_v56 = vld [vmem:[%s7363_s7 + $0x78] sm:$0xff] }
 0x101   :  { %v3918_v61 = vpop.eup %3917  ;;  %v427_v62 = vadd.f32 %v426_v59, %v5251_v26  ;;  %3822 = vmatprep.subr.bf16.mxu1 %v4558_v49  ;;  %v5341_v47 = vpop.f32.mrb[1].mxu1  ;;  %v1578_v59 = vld [vmem:[%s7361_s5 + $0x70] sm:$0xff] }
 0x102   :  { %v3920_v1 = vpop.eup %3919  ;;  %1057 = vmatprep.mubr.f32.mxu1 %v3918_v61  ;;  %v5352_v57 = vpop.f32.mrb[2].mxu1 }
 0x103   :  { %3929 = vtanh.f32 %v427_v62  ;;  %v430_v2 = vpop.f32.mrb[10].mxu0  ;;  %1058 = vmatmul.mubr.f32.gmra.mrb[34].mxu1 %v3920_v1  ;;  %v5360_v61 = vpop.f32.mrb[3].mxu1 }
 0x104   :  { %3931 = vtanh.f32 %v425_v58  ;;  %v431_v4 = vadd.f32 %v430_v2, %v5247_v25  ;;  %v432_v5 = vpop.f32.mrb[11].mxu0  ;;  %3824 = vmatpush1.bf16.msra.mxu1 %v3823_v60  ;;  %v1579_v60 = vld [vmem:[%s7361_s5 + $0x78] sm:$0xff]  ;;  %v3841_v2 = vpack.c.bf16 %v2003_v56, %v2002_v55 }
 0x105   :  { %v3922_v7 = vpop.eup %3921  ;;  %v433_v8 = vadd.f32 %v432_v5, %v5251_v26  ;;  %3825 = vmatprep.subr.bf16.mxu1 %v4558_v49  ;;  %v3793_v63 = vpack.c.bf16 %v1579_v60, %v1578_v59 }
 0x106   :  { %v3924_v11 = vpop.eup %3923  ;;  %1063 = vmatprep.mubr.f32.mxu1 %v3922_v7  ;;  %v2005_v7 = vld [vmem:[%s7363_s7 + $0x88] sm:$0xff] }
 0x107   :  { %3933 = vtanh.f32 %v433_v8  ;;  %v436_v12 = vpop.f32.mrb[12].mxu0  ;;  %1064 = vmatmul.mubr.f32.gmra.mrb[36].mxu1 %v3924_v11  ;;  %3794 = vmatpush1.bf16.msra.mxu0 %v3793_v63  ;;  %v5371_v8 = vpop.f32.mrb[4].mxu1 }
 0x108   :  { %3935 = vtanh.f32 %v431_v4  ;;  %v437_v13 = vadd.f32 %v436_v12, %v5247_v25  ;;  %v438_v14 = vpop.f32.mrb[13].mxu0  ;;  %3827 = vmatpush1.bf16.msra.mxu1 %v3826_v6  ;;  %v2004_v6 = vld [vmem:[%s7363_s7 + $0x80] sm:$0xff]  ;;  %v5373_v10 = vpop.f32.mrb[5].mxu1  ;;  %3795 = vmatprep.subr.bf16.mxu0 %v4558_v49 }
 0x109   :  { %v3926_v16 = vpop.eup %3925  ;;  %v439_v17 = vadd.f32 %v438_v14, %v5251_v26  ;;  %3828 = vmatprep.subr.bf16.mxu1 %v4558_v49  ;;  %v3844_v14 = vpack.c.bf16 %v2005_v7, %v2004_v6  ;;  %v5385_v19 = vpop.f32.mrb[6].mxu1  ;;  %v1582_v6 = vld [vmem:[%s7361_s5 + $0x90] sm:$0xff]  ;;  %v1583_v7 = vld [vmem:[%s7361_s5 + $0x98] sm:$0xff] }
 0x10a   :  { %v3928_v20 = vpop.eup %3927  ;;  %1069 = vmatprep.mubr.f32.mxu1 %v3926_v16  ;;  %v5387_v21 = vpop.f32.mrb[7].mxu1 }
 0x10b   :  { %3937 = vtanh.f32 %v439_v17  ;;  %v442_v27 = vpop.f32.mrb[14].mxu0  ;;  %1070 = vmatmul.mubr.f32.gmra.mrb[38].mxu1 %v3928_v20  ;;  %v2006_v17 = vld [vmem:[%s7363_s7 + $0x90] sm:$0xff] }
 0x10c   :  { %3939 = vtanh.f32 %v437_v13  ;;  %v443_v29 = vadd.f32 %v442_v27, %v5247_v25  ;;  %v444_v30 = vpop.f32.mrb[15].mxu0  ;;  %3830 = vmatpush1.bf16.msra.mxu1 %v3829_v15 }
 0x10d   :  { %v3930_v32 = vpop.eup %3929  ;;  %v445_v33 = vadd.f32 %v444_v30, %v5251_v26  ;;  %3831 = vmatprep.subr.bf16.mxu1 %v4558_v49 }
 0x10e   :  { %v3932_v36 = vpop.eup %3931  ;;  %1075 = vmatprep.mubr.f32.mxu1 %v3930_v32  ;;  %v5392_v32 = vpop.f32.mrb[8].mxu1 }
 0x10f   :  { %3941 = vtanh.f32 %v445_v33  ;;  %v448_v37 = vpop.f32.mrb[16].mxu0  ;;  %1076 = vmatmul.mubr.f32.gmra.mrb[40].mxu1 %v3932_v36  ;;  %v2008_v36 = vld [vmem:[%s7363_s7 + $0xa0] sm:$0xff] }
 0x110   :  { %3943 = vtanh.f32 %v443_v29  ;;  %v449_v38 = vadd.f32 %v448_v37, %v5247_v25  ;;  %v450_v39 = vpop.f32.mrb[17].mxu0  ;;  %3833 = vmatpush1.bf16.msra.mxu1 %v3832_v31  ;;  %v3847_v29 = vpack.c.bf16 %v2007_v18, %v2006_v17  ;;  %v5403_v37 = vpop.f32.mrb[9].mxu1 }
 0x111   :  { %v3934_v41 = vpop.eup %3933  ;;  %v451_v42 = vadd.f32 %v450_v39, %v5251_v26  ;;  %3834 = vmatprep.subr.bf16.mxu1 %v4558_v49  ;;  %v3796_v39 = vpack.c.bf16 %v1581_v35, %v1580_v34 }
 0x112   :  { %v3936_v46 = vpop.eup %3935  ;;  %1081 = vmatprep.mubr.f32.mxu1 %v3934_v41 }
 0x113   :  { %3945 = vtanh.f32 %v451_v42  ;;  %v454_v48 = vpop.f32.mrb[18].mxu0  ;;  %1082 = vmatmul.mubr.f32.gmra.mrb[42].mxu1 %v3936_v46  ;;  %3797 = vmatpush1.bf16.msra.mxu0 %v3796_v39 }
 0x114   :  { %3947 = vtanh.f32 %v449_v38  ;;  %v455_v50 = vadd.f32 %v454_v48, %v5247_v25  ;;  %v456_v51 = vpop.f32.mrb[19].mxu0  ;;  %3836 = vmatpush1.bf16.msra.mxu1 %v3835_v40  ;;  %v2009_v40 = vld [vmem:[%s7363_s7 + $0xa8] sm:$0xff]  ;;  %v5411_v48 = vpop.f32.mrb[10].mxu1  ;;  %3798 = vmatprep.subr.bf16.mxu0 %v4558_v49 }
 0x115   :  { %v3938_v53 = vpop.eup %3937  ;;  %v457_v54 = vadd.f32 %v456_v51, %v5251_v26  ;;  %3837 = vmatprep.subr.bf16.mxu1 %v4558_v49  ;;  %v3850_v43 = vpack.c.bf16 %v2009_v40, %v2008_v36  ;;  %v5413_v51 = vpop.f32.mrb[11].mxu1  ;;  %v1584_v40 = vld [vmem:[%s7361_s5 + $0xa0] sm:$0xff] }
 0x116   :  { %v3940_v58 = vpop.eup %3939  ;;  %1087 = vmatprep.mubr.f32.mxu1 %v3938_v53 }
 0x117   :  { %3949 = vtanh.f32 %v457_v54  ;;  %v460_v62 = vpop.f32.mrb[20].mxu0  ;;  %1088 = vmatmul.mubr.f32.gmra.mrb[44].mxu1 %v3940_v58  ;;  %v5418_v58 = vpop.f32.mrb[12].mxu1 }
 0x118   :  { %3951 = vtanh.f32 %v455_v50  ;;  %v461_v0 = vadd.f32 %v460_v62, %v5247_v25  ;;  %v462_v1 = vpop.f32.mrb[21].mxu0  ;;  %3839 = vmatpush1.bf16.msra.mxu1 %v3838_v52  ;;  %v5421_v60 = vpop.f32.mrb[13].mxu1 }
 0x119   :  { %v3942_v4 = vpop.eup %3941  ;;  %v463_v5 = vadd.f32 %v462_v1, %v5251_v26  ;;  %3840 = vmatprep.subr.bf16.mxu1 %v4558_v49 }
 0x11a   :  { %v3944_v9 = vpop.eup %3943  ;;  %1093 = vmatprep.mubr.f32.mxu1 %v3942_v4  ;;  %v5425_v4 = vpop.f32.mrb[14].mxu1 }
 0x11b   :  { %3953 = vtanh.f32 %v463_v5  ;;  %v466_v11 = vpop.f32.mrb[22].mxu0  ;;  %1094 = vmatmul.mubr.f32.gmra.mrb[46].mxu1 %v3944_v9  ;;  %v5433_v9 = vpop.f32.mrb[15].mxu1 }
 0x11c   :  { %3955 = vtanh.f32 %v461_v0  ;;  %v467_v12 = vadd.f32 %v466_v11, %v5247_v25  ;;  %v468_v13 = vpop.f32.mrb[23].mxu0  ;;  %3842 = vmatpush1.bf16.msra.mxu1 %v3841_v2  ;;  %v5442_v18 = vpop.f32.mrb[16].mxu1 }
 0x11d   :  { %v3946_v15 = vpop.eup %3945  ;;  %v469_v16 = vadd.f32 %v468_v13, %v5251_v26  ;;  %3843 = vmatprep.subr.bf16.mxu1 %v4558_v49  ;;  %v2010_v13 = vld [vmem:[%s7363_s7 + $0xb0] sm:$0xff] }
 0x11e   :  { %v3948_v20 = vpop.eup %3947  ;;  %1099 = vmatprep.mubr.f32.mxu1 %v3946_v15 }
 0x11f   :  { %3957 = vtanh.f32 %v469_v16  ;;  %v472_v23 = vpop.f32.mrb[24].mxu0  ;;  %1100 = vmatmul.mubr.f32.gmra.mrb[48].mxu1 %v3948_v20 }
 0x120   :  { %3959 = vtanh.f32 %v467_v12  ;;  %v473_v27 = vadd.f32 %v472_v23, %v5247_v25  ;;  %v474_v28 = vpop.f32.mrb[25].mxu0  ;;  %3845 = vmatpush1.bf16.msra.mxu1 %v3844_v14  ;;  %v3799_v12 = vpack.c.bf16 %v1583_v7, %v1582_v6  ;;  %v2011_v14 = vld [vmem:[%s7363_s7 + $0xb8] sm:$0xff]  ;;  %v2012_v6 = vld [vmem:[%s7363_s7 + $0xc0] sm:$0xff]  ;;  %v2013_v7 = vld [vmem:[%s7363_s7 + $0xc8] sm:$0xff] }
 0x121   :  { %v3950_v30 = vpop.eup %3949  ;;  %v475_v31 = vadd.f32 %v474_v28, %v5251_v26  ;;  %3846 = vmatprep.subr.bf16.mxu1 %v4558_v49  ;;  %v3853_v17 = vpack.c.bf16 %v2011_v14, %v2010_v13  ;;  %v3856_v13 = vpack.c.bf16 %v2013_v7, %v2012_v6 }
 0x122   :  { %v3952_v33 = vpop.eup %3951  ;;  %1105 = vmatprep.mubr.f32.mxu1 %v3950_v30  ;;  %3800 = vmatpush1.bf16.msra.mxu0 %v3799_v12 }
 0x123   :  { %3961 = vtanh.f32 %v475_v31  ;;  %v478_v38 = vpop.f32.mrb[26].mxu0  ;;  %1106 = vmatmul.mubr.f32.gmra.mrb[50].mxu1 %v3952_v33  ;;  %3801 = vmatprep.subr.bf16.mxu0 %v4558_v49 }
 0x124   :  { %3963 = vtanh.f32 %v473_v27  ;;  %v479_v41 = vadd.f32 %v478_v38, %v5247_v25  ;;  %v480_v42 = vpop.f32.mrb[27].mxu0  ;;  %3848 = vmatpush1.bf16.msra.mxu1 %v3847_v29  ;;  %v5445_v27 = vpop.f32.mrb[17].mxu1 }
 0x125   :  { %v3954_v44 = vpop.eup %3953  ;;  %v481_v46 = vadd.f32 %v480_v42, %v5251_v26  ;;  %3849 = vmatprep.subr.bf16.mxu1 %v4558_v49  ;;  %v5449_v33 = vpop.f32.mrb[18].mxu1 }
 0x126   :  { %v3956_v50 = vpop.eup %3955  ;;  %1111 = vmatprep.mubr.f32.mxu1 %v3954_v44  ;;  %v5453_v36 = vpop.f32.mrb[19].mxu1 }
 0x127   :  { %3965 = vtanh.f32 %v481_v46  ;;  %v484_v52 = vpop.f32.mrb[28].mxu0  ;;  %1112 = vmatmul.mubr.f32.gmra.mrb[52].mxu1 %v3956_v50  ;;  %v5462_v46 = vpop.f32.mrb[20].mxu1 }
 0x128   :  { %3967 = vtanh.f32 %v479_v41  ;;  %v485_v53 = vadd.f32 %v484_v52, %v5247_v25  ;;  %v486_v54 = vpop.f32.mrb[29].mxu0  ;;  %3851 = vmatpush1.bf16.msra.mxu1 %v3850_v43  ;;  %v1585_v41 = vld [vmem:[%s7361_s5 + $0xa8] sm:$0xff] }
 0x129   :  { %v3958_v55 = vpop.eup %3957  ;;  %v487_v56 = vadd.f32 %v486_v54, %v5251_v26  ;;  %3852 = vmatprep.subr.bf16.mxu1 %v4558_v49  ;;  %v3802_v44 = vpack.c.bf16 %v1585_v41, %v1584_v40 }
 0x12a   :  { %v3960_v59 = vpop.eup %3959  ;;  %1117 = vmatprep.mubr.f32.mxu1 %v3958_v55 }
 0x12b   :  { %3969 = vtanh.f32 %v487_v56  ;;  %v490_v62 = vpop.f32.mrb[30].mxu0  ;;  %1118 = vmatmul.mubr.f32.gmra.mrb[54].mxu1 %v3960_v59  ;;  %3803 = vmatpush1.bf16.msra.mxu0 %v3802_v44 }
 0x12c   :  { %3971 = vtanh.f32 %v485_v53  ;;  %v491_v63 = vadd.f32 %v490_v62, %v5247_v25  ;;  %v492_v0 = vpop.f32.mrb[31].mxu0  ;;  %3854 = vmatpush1.bf16.msra.mxu1 %v3853_v17  ;;  %v5465_v53 = vpop.f32.mrb[21].mxu1  ;;  %3804 = vmatprep.subr.bf16.mxu0 %v4558_v49 }
 0x12d   :  { %v3962_v1 = vpop.eup %3961  ;;  %v493_v2 = vadd.f32 %v492_v0, %v5251_v26  ;;  %3855 = vmatprep.subr.bf16.mxu1 %v4558_v49  ;;  %v5469_v62 = vpop.f32.mrb[22].mxu1  ;;  %v751_v3 = vadd.f32 %v5465_v53, %v5251_v26 }
 0x12e   :  { %v3964_v5 = vpop.eup %3963  ;;  %1123 = vmatprep.mubr.f32.mxu1 %v3962_v1  ;;  %v5472_v1 = vpop.f32.mrb[23].mxu1 }
 0x12f   :  { %3973 = vtanh.f32 %v493_v2  ;;  %v496_v11 = vpop.f32.mrb[32].mxu0  ;;  %1124 = vmatmul.mubr.f32.gmra.mrb[56].mxu1 %v3964_v5  ;;  %v5481_v14 = vpop.f32.mrb[24].mxu1  ;;  %v757_v53 = vadd.f32 %v5472_v1, %v5251_v26  ;;  %v755_v1 = vadd.f32 %v5469_v62, %v5247_v25 }
 0x130   :  { %3975 = vtanh.f32 %v491_v63  ;;  %v497_v15 = vadd.f32 %v496_v11, %v5247_v25  ;;  %v498_v16 = vpop.f32.mrb[33].mxu0  ;;  %v5484_v17 = vpop.f32.mrb[25].mxu1  ;;  %3857 = vmatpush1.bf16.msra.mxu1 %v3856_v13  ;;  %v1588_v13 = vld [vmem:[%s7361_s5 + $0xc0] sm:$0xff]  ;;  %v761_v62 = vadd.f32 %v5481_v14, %v5247_v25 }
 0x131   :  { %v3966_v20 = vpop.eup %3965  ;;  %v499_v23 = vadd.f32 %v498_v16, %v5251_v26  ;;  %3858 = vmatprep.subr.bf16.mxu1 %v4558_v49 }
 0x132   :  { %v3968_v28 = vpop.eup %3967  ;;  %1129 = vmatprep.mubr.f32.mxu1 %v3966_v20 }
 0x133   :  { %3977 = vtanh.f32 %v499_v23  ;;  %v502_v29 = vpop.f32.mrb[34].mxu0  ;;  %1130 = vmatmul.mubr.f32.gmra.mrb[58].mxu1 %v3968_v28  ;;  %v1586_v28 = vld [vmem:[%s7361_s5 + $0xb0] sm:$0xff] }
 0x134   :  { %3979 = vtanh.f32 %v497_v15  ;;  %v503_v30 = vadd.f32 %v502_v29, %v5247_v25  ;;  %v504_v31 = vpop.f32.mrb[35].mxu0  ;;  %v1587_v29 = vld [vmem:[%s7361_s5 + $0xb8] sm:$0xff] }
 0x135   :  { %v3970_v34 = vpop.eup %3969  ;;  %v505_v35 = vadd.f32 %v504_v31, %v5251_v26 }
 0x136   :  { %v3972_v38 = vpop.eup %3971  ;;  %1135 = vmatprep.mubr.f32.mxu1 %v3970_v34  ;;  %v3805_v34 = vpack.c.bf16 %v1587_v29, %v1586_v28  ;;  %v2015_v29 = vld [vmem:[%s7363_s7 + $0xd8] sm:$0xff] }
 0x137   :  { %3981 = vtanh.f32 %v505_v35  ;;  %v508_v39 = vpop.f32.mrb[36].mxu0  ;;  %1136 = vmatmul.mubr.f32.gmra.mrb[60].mxu1 %v3972_v38 }
 0x138   :  { %3983 = vtanh.f32 %v503_v30  ;;  %v509_v42 = vadd.f32 %v508_v39, %v5247_v25  ;;  %v510_v43 = vpop.f32.mrb[37].mxu0  ;;  %v5495_v39 = vpop.f32.mrb[26].mxu1  ;;  %3806 = vmatpush1.bf16.msra.mxu0 %v3805_v34 }
 0x139   :  { %v3974_v50 = vpop.eup %3973  ;;  %v511_v52 = vadd.f32 %v510_v43, %v5251_v26  ;;  %v5497_v41 = vpop.f32.mrb[27].mxu1  ;;  %3807 = vmatprep.subr.bf16.mxu0 %v4558_v49 }
 0x13a   :  { %v3976_v54 = vpop.eup %3975  ;;  %1141 = vmatprep.mubr.f32.mxu1 %v3974_v50 }
 0x13b   :  { %3985 = vtanh.f32 %v511_v52  ;;  %v514_v55 = vpop.f32.mrb[38].mxu0  ;;  %1142 = vmatmul.mubr.f32.gmra.mrb[62].mxu1 %v3976_v54  ;;  %v5502_v54 = vpop.f32.mrb[28].mxu1 }
 0x13c   :  { %3987 = vtanh.f32 %v509_v42  ;;  %v515_v56 = vadd.f32 %v514_v55, %v5247_v25  ;;  %v516_v59 = vpop.f32.mrb[39].mxu0 }
 0x13d   :  { %v3978_v63 = vpop.eup %3977  ;;  %v517_v0 = vadd.f32 %v516_v59, %v5251_v26 }
 0x13e   :  { %v3980_v2 = vpop.eup %3979  ;;  %1147 = vmatprep.mubr.f32.mxu1 %v3978_v63 }
 0x13f   :  { %3989 = vtanh.f32 %v517_v0  ;;  %v520_v5 = vpop.f32.mrb[40].mxu0  ;;  %1148 = vmatmul.mubr.f32.gmra.mrb[64].mxu1 %v3980_v2 }
 0x140   :  { %3991 = vtanh.f32 %v515_v56  ;;  %v521_v11 = vadd.f32 %v520_v5, %v5247_v25  ;;  %v522_v12 = vpop.f32.mrb[41].mxu0  ;;  %v5504_v56 = vpop.f32.mrb[29].mxu1 }
 0x141   :  { %v3982_v15 = vpop.eup %3981  ;;  %v523_v16 = vadd.f32 %v522_v12, %v5251_v26  ;;  %v5508_v6 = vpop.f32.mrb[30].mxu1 }
 0x142   :  { %v3984_v20 = vpop.eup %3983  ;;  %1153 = vmatprep.mubr.f32.mxu1 %v3982_v15  ;;  %v1589_v15 = vld [vmem:[%s7361_s5 + $0xc8] sm:$0xff] }
 0x143   :  { %3993 = vtanh.f32 %v523_v16  ;;  %v526_v23 = vpop.f32.mrb[42].mxu0  ;;  %1154 = vmatmul.mubr.f32.gmra.mrb[66].mxu1 %v3984_v20  ;;  %v2014_v16 = vld [vmem:[%s7363_s7 + $0xd0] sm:$0xff]  ;;  %v3808_v28 = vpack.c.bf16 %v1589_v15, %v1588_v13 }
 0x144   :  { %3995 = vtanh.f32 %v521_v11  ;;  %v527_v30 = vadd.f32 %v526_v23, %v5247_v25  ;;  %v528_v31 = vpop.f32.mrb[43].mxu0  ;;  %v5510_v11 = vpop.f32.mrb[31].mxu1  ;;  %v3859_v34 = vpack.c.bf16 %v2015_v29, %v2014_v16  ;;  %v1594_v29 = vld [vmem:[%s7361_s5 + $0xf0] sm:$0xff] }
 0x145   :  { %v3986_v35 = vpop.eup %3985  ;;  %v529_v38 = vadd.f32 %v528_v31, %v5251_v26  ;;  %3809 = vmatpush1.bf16.msra.mxu0 %v3808_v28 }
 0x146   :  { %v3988_v40 = vpop.eup %3987  ;;  %1159 = vmatprep.mubr.f32.mxu1 %v3986_v35  ;;  %3810 = vmatprep.subr.bf16.mxu0 %v4558_v49 }
 0x147   :  { %3997 = vtanh.f32 %v529_v38  ;;  %v532_v42 = vpop.f32.mrb[44].mxu0  ;;  %1160 = vmatmul.mubr.f32.gmra.mrb[68].mxu1 %v3988_v40 }
 0x148   :  { %3999 = vtanh.f32 %v527_v30  ;;  %v533_v43 = vadd.f32 %v532_v42, %v5247_v25  ;;  %v534_v44 = vpop.f32.mrb[45].mxu0  ;;  %3860 = vmatpush1.bf16.msra.mxu1 %v3859_v34 }
 0x149   :  { %v3990_v50 = vpop.eup %3989  ;;  %v535_v52 = vadd.f32 %v534_v44, %v5251_v26  ;;  %v1591_v44 = vld [vmem:[%s7361_s5 + $0xd8] sm:$0xff]  ;;  %3861 = vmatprep.subr.bf16.mxu1 %v4558_v49 }
 0x14a   :  { %v3992_v55 = vpop.eup %3991  ;;  %1165 = vmatprep.mubr.f32.mxu1 %v3990_v50 }
 0x14b   :  { %4001 = vtanh.f32 %v535_v52  ;;  %v538_v59 = vpop.f32.mrb[46].mxu0  ;;  %1166 = vmatmul.mubr.f32.gmra.mrb[70].mxu1 %v3992_v55 }
 0x14c   :  { %4003 = vtanh.f32 %v533_v43  ;;  %v539_v63 = vadd.f32 %v538_v59, %v5247_v25  ;;  %v540_v0 = vpop.f32.mrb[47].mxu0  ;;  %v1590_v43 = vld [vmem:[%s7361_s5 + $0xd0] sm:$0xff] }
 0x14d   :  { %v3994_v2 = vpop.eup %3993  ;;  %v541_v5 = vadd.f32 %v540_v0, %v5251_v26  ;;  %v3811_v55 = vpack.c.bf16 %v1591_v44, %v1590_v43 }
 0x14e   :  { %v3996_v7 = vpop.eup %3995  ;;  %1171 = vmatprep.mubr.f32.mxu1 %v3994_v2 }
 0x14f   :  { %4005 = vtanh.f32 %v541_v5  ;;  %v544_v12 = vpop.f32.mrb[48].mxu0  ;;  %1172 = vmatmul.mubr.f32.gmra.mrb[72].mxu1 %v3996_v7  ;;  %3812 = vmatpush1.bf16.msra.mxu0 %v3811_v55  ;;  %v1592_v5 = vld [vmem:[%s7361_s5 + $0xe0] sm:$0xff]  ;;  %v1593_v7 = vld [vmem:[%s7361_s5 + $0xe8] sm:$0xff] }
 0x150   :  { %4007 = vtanh.f32 %v539_v63  ;;  %v545_v20 = vadd.f32 %v544_v12, %v5247_v25  ;;  %v546_v23 = vpop.f32.mrb[49].mxu0  ;;  %3813 = vmatprep.subr.bf16.mxu0 %v4558_v49  ;;  %v3814_v15 = vpack.c.bf16 %v1593_v7, %v1592_v5  ;;  %v2016_v55 = vld [vmem:[%s7363_s7 + $0xe0] sm:$0xff] }
 0x151   :  { %v3998_v30 = vpop.eup %3997  ;;  %v547_v31 = vadd.f32 %v546_v23, %v5251_v26 }
 0x152   :  { %v4000_v35 = vpop.eup %3999  ;;  %1177 = vmatprep.mubr.f32.mxu1 %v3998_v30  ;;  %v1595_v30 = vld [vmem:[%s7361_s5 + $0xf8] sm:$0xff] }
 0x153   :  { %4009 = vtanh.f32 %v547_v31  ;;  %v550_v38 = vpop.f32.mrb[50].mxu0  ;;  %1178 = vmatmul.mubr.f32.gmra.mrb[74].mxu1 %v4000_v35  ;;  %3815 = vmatpush1.bf16.msra.mxu0 %v3814_v15  ;;  %v3817_v35 = vpack.c.bf16 %v1595_v30, %v1594_v29 }
 0x154   :  { %4011 = vtanh.f32 %v545_v20  ;;  %v551_v40 = vadd.f32 %v550_v38, %v5247_v25  ;;  %v552_v42 = vpop.f32.mrb[51].mxu0  ;;  %3816 = vmatprep.subr.bf16.mxu0 %v4558_v49 }
 0x155   :  { %v4002_v50 = vpop.eup %4001  ;;  %v553_v52 = vadd.f32 %v552_v42, %v5251_v26 }
 0x156   :  { %v4004_v59 = vpop.eup %4003  ;;  %1183 = vmatprep.mubr.f32.mxu1 %v4002_v50 }
 0x157   :  { %4013 = vtanh.f32 %v553_v52  ;;  %v556_v63 = vpop.f32.mrb[52].mxu0  ;;  %1184 = vmatmul.mubr.f32.gmra.mrb[76].mxu1 %v4004_v59  ;;  %3818 = vmatpush1.bf16.msra.mxu0 %v3817_v35  ;;  %v2017_v59 = vld [vmem:[%s7363_s7 + $0xe8] sm:$0xff] }
 0x158   :  { %4015 = vtanh.f32 %v551_v40  ;;  %v557_v0 = vadd.f32 %v556_v63, %v5247_v25  ;;  %v558_v2 = vpop.f32.mrb[53].mxu0 }
 0x159   :  { %v4006_v12 = vpop.eup %4005  ;;  %v559_v13 = vadd.f32 %v558_v2, %v5251_v26 }
 0x15a   :  { %v4008_v16 = vpop.eup %4007  ;;  %1189 = vmatprep.mubr.f32.mxu1 %v4006_v12 }
 0x15b   :  { %4017 = vtanh.f32 %v559_v13  ;;  %v562_v20 = vpop.f32.mrb[54].mxu0  ;;  %1190 = vmatmul.mubr.f32.gmra.mrb[78].mxu1 %v4008_v16 }
 0x15c   :  { %4019 = vtanh.f32 %v557_v0  ;;  %v563_v23 = vadd.f32 %v562_v20, %v5247_v25  ;;  %v564_v28 = vpop.f32.mrb[55].mxu0  ;;  %v3862_v0 = vpack.c.bf16 %v2017_v59, %v2016_v55  ;;  %v2018_v55 = vld [vmem:[%s7363_s7 + $0xf0] sm:$0xff]  ;;  %v2019_v59 = vld [vmem:[%s7363_s7 + $0xf8] sm:$0xff] }
 0x15d   :  { %v4010_v31 = vpop.eup %4009  ;;  %v565_v34 = vadd.f32 %v564_v28, %v5251_v26 }
 0x15e   :  { %v4012_v38 = vpop.eup %4011  ;;  %1195 = vmatprep.mubr.f32.mxu1 %v4010_v31  ;;  %3863 = vmatpush1.bf16.msra.mxu1 %v3862_v0  ;;  %v3865_v0 = vpack.c.bf16 %v2019_v59, %v2018_v55 }
 0x15f   :  { %4021 = vtanh.f32 %v565_v34  ;;  %v568_v40 = vpop.f32.mrb[56].mxu0  ;;  %1196 = vmatmul.mubr.f32.gmra.mrb[80].mxu1 %v4012_v38  ;;  %3864 = vmatprep.subr.bf16.mxu1 %v4558_v49 }
 0x160   :  { %4023 = vtanh.f32 %v563_v23  ;;  %v569_v42 = vadd.f32 %v568_v40, %v5247_v25  ;;  %v570_v43 = vpop.f32.mrb[57].mxu0 }
 0x161   :  { %v4014_v44 = vpop.eup %4013  ;;  %v571_v50 = vadd.f32 %v570_v43, %v5251_v26 }
 0x162   :  { %v4016_v52 = vpop.eup %4015  ;;  %1201 = vmatprep.mubr.f32.mxu1 %v4014_v44  ;;  %3866 = vmatpush1.bf16.msra.mxu1 %v3865_v0 }
 0x163   :  { %4025 = vtanh.f32 %v571_v50  ;;  %v574_v63 = vpop.f32.mrb[58].mxu0  ;;  %1202 = vmatmul.mubr.f32.gmra.mrb[82].mxu1 %v4016_v52 }
 0x164   :  { %4027 = vtanh.f32 %v569_v42  ;;  %v575_v2 = vadd.f32 %v574_v63, %v5247_v25  ;;  %v576_v5 = vpop.f32.mrb[59].mxu0 }
 0x165   :  { %v4018_v7 = vpop.eup %4017  ;;  %v577_v12 = vadd.f32 %v576_v5, %v5251_v26 }
 0x166   :  { %v4020_v13 = vpop.eup %4019  ;;  %1207 = vmatprep.mubr.f32.mxu1 %v4018_v7 }
 0x167   :  { %4029 = vtanh.f32 %v577_v12  ;;  %v580_v15 = vpop.f32.mrb[60].mxu0  ;;  %1208 = vmatmul.mubr.f32.gmra.mrb[84].mxu1 %v4020_v13 }
 0x168   :  { %4031 = vtanh.f32 %v575_v2  ;;  %v581_v16 = vadd.f32 %v580_v15, %v5247_v25  ;;  %v582_v20 = vpop.f32.mrb[61].mxu0 }
 0x169   :  { %v4022_v23 = vpop.eup %4021  ;;  %v583_v28 = vadd.f32 %v582_v20, %v5251_v26 }
 0x16a   :  { %v4024_v29 = vpop.eup %4023  ;;  %1213 = vmatprep.mubr.f32.mxu1 %v4022_v23 }
 0x16b   :  { %4033 = vtanh.f32 %v583_v28  ;;  %v586_v30 = vpop.f32.mrb[62].mxu0  ;;  %1214 = vmatmul.mubr.f32.gmra.mrb[86].mxu1 %v4024_v29 }
 0x16c   :  { %4035 = vtanh.f32 %v581_v16  ;;  %v587_v31 = vadd.f32 %v586_v30, %v5247_v25  ;;  %v588_v34 = vpop.f32.mrb[63].mxu0 }
 0x16d   :  { %v4026_v49 = vpop.eup %4025  ;;  %v589_v35 = vadd.f32 %v588_v34, %v5251_v26 }
 0x16e   :  { %v4028_v38 = vpop.eup %4027  ;;  %1219 = vmatprep.mubr.f32.mxu1 %v4026_v49 }
 0x16f   :  { %4037 = vtanh.f32 %v589_v35  ;;  %v592_v40 = vpop.f32.mrb[64].mxu0  ;;  %1220 = vmatmul.mubr.f32.gmra.mrb[88].mxu1 %v4028_v38 }
 0x170   :  { %4039 = vtanh.f32 %v587_v31  ;;  %v593_v42 = vadd.f32 %v592_v40, %v5247_v25  ;;  %v594_v43 = vpop.f32.mrb[65].mxu0 }
 0x171   :  { %v4030_v44 = vpop.eup %4029  ;;  %v595_v50 = vadd.f32 %v594_v43, %v5251_v26 }
 0x172   :  { %v4032_v52 = vpop.eup %4031  ;;  %1225 = vmatprep.mubr.f32.mxu1 %v4030_v44 }
 0x173   :  { %4041 = vtanh.f32 %v595_v50  ;;  %v598_v63 = vpop.f32.mrb[66].mxu0  ;;  %1226 = vmatmul.mubr.f32.gmra.mrb[90].mxu1 %v4032_v52 }
 0x174   :  { %4043 = vtanh.f32 %v593_v42  ;;  %v599_v2 = vadd.f32 %v598_v63, %v5247_v25  ;;  %v600_v5 = vpop.f32.mrb[67].mxu0 }
 0x175   :  { %v4034_v7 = vpop.eup %4033  ;;  %v601_v12 = vadd.f32 %v600_v5, %v5251_v26 }
 0x176   :  { %v4036_v13 = vpop.eup %4035  ;;  %1231 = vmatprep.mubr.f32.mxu1 %v4034_v7 }
 0x177   :  { %4045 = vtanh.f32 %v601_v12  ;;  %v604_v15 = vpop.f32.mrb[68].mxu0  ;;  %1232 = vmatmul.mubr.f32.gmra.mrb[92].mxu1 %v4036_v13 }
 0x178   :  { %4047 = vtanh.f32 %v599_v2  ;;  %v605_v16 = vadd.f32 %v604_v15, %v5247_v25  ;;  %v606_v20 = vpop.f32.mrb[69].mxu0 }
 0x179   :  { %v4038_v23 = vpop.eup %4037  ;;  %v607_v28 = vadd.f32 %v606_v20, %v5251_v26 }
 0x17a   :  { %v4040_v29 = vpop.eup %4039  ;;  %1237 = vmatprep.mubr.f32.mxu1 %v4038_v23 }
 0x17b   :  { %4049 = vtanh.f32 %v607_v28  ;;  %v610_v30 = vpop.f32.mrb[70].mxu0  ;;  %1238 = vmatmul.mubr.f32.gmra.mrb[94].mxu1 %v4040_v29 }
 0x17c   :  { %4051 = vtanh.f32 %v605_v16  ;;  %v611_v31 = vadd.f32 %v610_v30, %v5247_v25  ;;  %v612_v34 = vpop.f32.mrb[71].mxu0 }
 0x17d   :  { %v4042_v49 = vpop.eup %4041  ;;  %v613_v35 = vadd.f32 %v612_v34, %v5251_v26 }
 0x17e   :  { %v4044_v38 = vpop.eup %4043  ;;  %1243 = vmatprep.mubr.f32.mxu1 %v4042_v49 }
 0x17f   :  { %4053 = vtanh.f32 %v613_v35  ;;  %v616_v40 = vpop.f32.mrb[72].mxu0  ;;  %1244 = vmatmul.mubr.f32.gmra.mrb[96].mxu1 %v4044_v38 }
 0x180   :  { %4055 = vtanh.f32 %v611_v31  ;;  %v617_v42 = vadd.f32 %v616_v40, %v5247_v25  ;;  %v618_v43 = vpop.f32.mrb[73].mxu0 }
 0x181   :  { %v4046_v44 = vpop.eup %4045  ;;  %v619_v50 = vadd.f32 %v618_v43, %v5251_v26 }
 0x182   :  { %v4048_v52 = vpop.eup %4047  ;;  %1249 = vmatprep.mubr.f32.mxu1 %v4046_v44 }
 0x183   :  { %4057 = vtanh.f32 %v619_v50  ;;  %v622_v55 = vpop.f32.mrb[74].mxu0  ;;  %1250 = vmatmul.mubr.f32.gmra.mrb[98].mxu1 %v4048_v52 }
 0x184   :  { %4059 = vtanh.f32 %v617_v42  ;;  %v623_v59 = vadd.f32 %v622_v55, %v5247_v25  ;;  %v624_v63 = vpop.f32.mrb[75].mxu0 }
 0x185   :  { %v4050_v0 = vpop.eup %4049  ;;  %v625_v2 = vadd.f32 %v624_v63, %v5251_v26 }
 0x186   :  { %v4052_v5 = vpop.eup %4051  ;;  %1255 = vmatprep.mubr.f32.mxu1 %v4050_v0 }
 0x187   :  { %4061 = vtanh.f32 %v625_v2  ;;  %v628_v7 = vpop.f32.mrb[76].mxu0  ;;  %1256 = vmatmul.mubr.f32.gmra.mrb[100].mxu1 %v4052_v5 }
 0x188   :  { %4063 = vtanh.f32 %v623_v59  ;;  %v629_v12 = vadd.f32 %v628_v7, %v5247_v25  ;;  %v630_v13 = vpop.f32.mrb[77].mxu0 }
 0x189   :  { %v4054_v15 = vpop.eup %4053  ;;  %v631_v16 = vadd.f32 %v630_v13, %v5251_v26 }
 0x18a   :  { %v4056_v20 = vpop.eup %4055  ;;  %1261 = vmatprep.mubr.f32.mxu1 %v4054_v15 }
 0x18b   :  { %4065 = vtanh.f32 %v631_v16  ;;  %v634_v23 = vpop.f32.mrb[78].mxu0  ;;  %1262 = vmatmul.mubr.f32.gmra.mrb[102].mxu1 %v4056_v20 }
 0x18c   :  { %4067 = vtanh.f32 %v629_v12  ;;  %v635_v28 = vadd.f32 %v634_v23, %v5247_v25  ;;  %v636_v29 = vpop.f32.mrb[79].mxu0 }
 0x18d   :  { %v4058_v30 = vpop.eup %4057  ;;  %v637_v31 = vadd.f32 %v636_v29, %v5251_v26 }
 0x18e   :  { %v4060_v34 = vpop.eup %4059  ;;  %1267 = vmatprep.mubr.f32.mxu1 %v4058_v30 }
 0x18f   :  { %4069 = vtanh.f32 %v637_v31  ;;  %v640_v49 = vpop.f32.mrb[80].mxu0  ;;  %1268 = vmatmul.mubr.f32.gmra.mrb[104].mxu1 %v4060_v34 }
 0x190   :  { %4071 = vtanh.f32 %v635_v28  ;;  %v641_v35 = vadd.f32 %v640_v49, %v5247_v25  ;;  %v642_v38 = vpop.f32.mrb[81].mxu0 }
 0x191   :  { %v4062_v40 = vpop.eup %4061  ;;  %v643_v42 = vadd.f32 %v642_v38, %v5251_v26 }
 0x192   :  { %v4064_v43 = vpop.eup %4063  ;;  %1273 = vmatprep.mubr.f32.mxu1 %v4062_v40 }
 0x193   :  { %4073 = vtanh.f32 %v643_v42  ;;  %v646_v44 = vpop.f32.mrb[82].mxu0  ;;  %1274 = vmatmul.mubr.f32.gmra.mrb[106].mxu1 %v4064_v43 }
 0x194   :  { %4075 = vtanh.f32 %v641_v35  ;;  %v647_v50 = vadd.f32 %v646_v44, %v5247_v25  ;;  %v648_v52 = vpop.f32.mrb[83].mxu0 }
 0x195   :  { %v4066_v55 = vpop.eup %4065  ;;  %v649_v59 = vadd.f32 %v648_v52, %v5251_v26 }
 0x196   :  { %v4068_v63 = vpop.eup %4067  ;;  %1279 = vmatprep.mubr.f32.mxu1 %v4066_v55 }
 0x197   :  { %4077 = vtanh.f32 %v649_v59  ;;  %v652_v0 = vpop.f32.mrb[84].mxu0  ;;  %1280 = vmatmul.mubr.f32.gmra.mrb[108].mxu1 %v4068_v63 }
 0x198   :  { %4079 = vtanh.f32 %v647_v50  ;;  %v653_v2 = vadd.f32 %v652_v0, %v5247_v25  ;;  %v654_v5 = vpop.f32.mrb[85].mxu0 }
 0x199   :  { %v4070_v7 = vpop.eup %4069  ;;  %v655_v12 = vadd.f32 %v654_v5, %v5251_v26 }
 0x19a   :  { %v4072_v13 = vpop.eup %4071  ;;  %1285 = vmatprep.mubr.f32.mxu1 %v4070_v7 }
 0x19b   :  { %4081 = vtanh.f32 %v655_v12  ;;  %v658_v15 = vpop.f32.mrb[86].mxu0  ;;  %1286 = vmatmul.mubr.f32.gmra.mrb[110].mxu1 %v4072_v13 }
 0x19c   :  { %4083 = vtanh.f32 %v653_v2  ;;  %v659_v16 = vadd.f32 %v658_v15, %v5247_v25  ;;  %v660_v20 = vpop.f32.mrb[87].mxu0 }
 0x19d   :  { %v4074_v23 = vpop.eup %4073  ;;  %v661_v28 = vadd.f32 %v660_v20, %v5251_v26 }
 0x19e   :  { %v4076_v29 = vpop.eup %4075  ;;  %1291 = vmatprep.mubr.f32.mxu1 %v4074_v23 }
 0x19f   :  { %4085 = vtanh.f32 %v661_v28  ;;  %v664_v30 = vpop.f32.mrb[88].mxu0  ;;  %1292 = vmatmul.mubr.f32.gmra.mrb[112].mxu1 %v4076_v29  ;;  %v689_v28 = vadd.f32 %v5339_v45, %v5247_v25  ;;  %v701_v45 = vadd.f32 %v5371_v8, %v5247_v25 }
 0x1a0   :  { %4087 = vtanh.f32 %v659_v16  ;;  %v665_v31 = vadd.f32 %v664_v30, %v5247_v25  ;;  %v666_v34 = vpop.f32.mrb[89].mxu0  ;;  %v691_v16 = vadd.f32 %v5341_v47, %v5251_v26  ;;  %v697_v30 = vadd.f32 %v5360_v61, %v5251_v26 }
 0x1a1   :  { %v4078_v49 = vpop.eup %4077  ;;  %v667_v35 = vadd.f32 %v666_v34, %v5251_v26  ;;  %v695_v47 = vadd.f32 %v5352_v57, %v5247_v25 }
 0x1a2   :  { %v4080_v38 = vpop.eup %4079  ;;  %1297 = vmatprep.mubr.f32.mxu1 %v4078_v49  ;;  %v703_v49 = vadd.f32 %v5373_v10, %v5251_v26  ;;  %v707_v10 = vadd.f32 %v5385_v19, %v5247_v25  ;;  %v719_v19 = vadd.f32 %v5411_v48, %v5247_v25  ;;  %v731_v48 = vadd.f32 %v5425_v4, %v5247_v25 }
 0x1a3   :  { %4089 = vtanh.f32 %v667_v35  ;;  %v670_v40 = vpop.f32.mrb[90].mxu0  ;;  %1298 = vmatmul.mubr.f32.gmra.mrb[114].mxu1 %v4080_v38  ;;  %v709_v38 = vadd.f32 %v5387_v21, %v5251_v26  ;;  %v713_v21 = vadd.f32 %v5392_v32, %v5247_v25  ;;  %v725_v32 = vadd.f32 %v5418_v58, %v5247_v25 }
 0x1a4   :  { %4091 = vtanh.f32 %v665_v31  ;;  %v671_v42 = vadd.f32 %v670_v40, %v5247_v25  ;;  %v672_v43 = vpop.f32.mrb[91].mxu0  ;;  %v739_v58 = vadd.f32 %v5445_v27, %v5251_v26  ;;  %v737_v4 = vadd.f32 %v5442_v18, %v5247_v25 }
 0x1a5   :  { %v4082_v44 = vpop.eup %4081  ;;  %v673_v50 = vadd.f32 %v672_v43, %v5251_v26  ;;  %v745_v27 = vadd.f32 %v5453_v36, %v5251_v26  ;;  %v743_v18 = vadd.f32 %v5449_v33, %v5247_v25  ;;  %v749_v33 = vadd.f32 %v5462_v46, %v5247_v25  ;;  %v2540_v46 = vld [vmem:[%s7365_s9] sm:$0xff] }
 0x1a6   :  { %v4084_v52 = vpop.eup %4083  ;;  %1303 = vmatprep.mubr.f32.mxu1 %v4082_v44  ;;  %v721_v44 = vadd.f32 %v5413_v51, %v5251_v26  ;;  %v733_v51 = vadd.f32 %v5433_v9, %v5251_v26 }
 0x1a7   :  { %4093 = vtanh.f32 %v673_v50  ;;  %v676_v55 = vpop.f32.mrb[92].mxu0  ;;  %1304 = vmatmul.mubr.f32.gmra.mrb[116].mxu1 %v4084_v52 }
 0x1a8   :  { %4095 = vtanh.f32 %v671_v42  ;;  %v677_v59 = vadd.f32 %v676_v55, %v5247_v25  ;;  %v678_v63 = vpop.f32.mrb[93].mxu0  ;;  %v715_v42 = vadd.f32 %v5403_v37, %v5251_v26  ;;  %v727_v37 = vadd.f32 %v5421_v60, %v5251_v26  ;;  %v975_v60 = vld [vmem:[%s7364_s4] sm:$0x3] }
 0x1a9   :  { %v4086_v0 = vpop.eup %4085  ;;  %v679_v2 = vadd.f32 %v678_v63, %v5251_v26  ;;  %v5646_v9 = vrot.slane %v975_v60, %v133_v22 }
 0x1aa   :  { %v4088_v5 = vpop.eup %4087  ;;  %1309 = vmatprep.mubr.f32.mxu1 %v4086_v0 }
 0x1ab   :  { %4097 = vtanh.f32 %v679_v2  ;;  %v682_v7 = vpop.f32.mrb[94].mxu0  ;;  %1310 = vmatmul.mubr.f32.gmra.mrb[118].mxu1 %v4088_v5 }
 0x1ac   :  { %4099 = vtanh.f32 %v677_v59  ;;  %v683_v12 = vadd.f32 %v682_v7, %v5247_v25  ;;  %v684_v13 = vpop.f32.mrb[95].mxu0  ;;  %v5652_v7 = vrot.slane %v975_v60, %v137_v24 }
 0x1ad   :  { %v4090_v15 = vpop.eup %4089  ;;  %v685_v20 = vadd.f32 %v684_v13, %v5251_v26 }
 0x1ae   :  { %v4092_v23 = vpop.eup %4091  ;;  %1315 = vmatprep.mubr.f32.mxu1 %v4090_v15 }
 0x1af   :  { %4101 = vtanh.f32 %v685_v20  ;;  %1316 = vmatmul.mubr.f32.gmra.mrb[120].mxu1 %v4092_v23 }
 0x1b0   :  { %4103 = vtanh.f32 %v683_v12 }
 0x1b1   :  { %v4094_v29 = vpop.eup %4093  ;;  %4105 = vtanh.f32 %v691_v16 }
 0x1b2   :  { %v4096_v31 = vpop.eup %4095  ;;  %1321 = vmatprep.mubr.f32.mxu1 %v4094_v29  ;;  %4107 = vtanh.f32 %v689_v28 }
 0x1b3   :  { %1322 = vmatmul.mubr.f32.gmra.mrb[122].mxu1 %v4096_v31  ;;  %4109 = vtanh.f32 %v697_v30 }
 0x1b4   :  { %4111 = vtanh.f32 %v695_v47 }
 0x1b5   :  { %v4098_v34 = vpop.eup %4097  ;;  %4113 = vtanh.f32 %v703_v49 }
 0x1b6   :  { %v4100_v35 = vpop.eup %4099  ;;  %1327 = vmatprep.mubr.f32.mxu1 %v4098_v34  ;;  %4115 = vtanh.f32 %v701_v45  ;;  %v2541_v45 = vld [vmem:[%s7365_s9 + $0x8] sm:$0xff] }
 0x1b7   :  { %1328 = vmatmul.mubr.f32.gmra.mrb[124].mxu1 %v4100_v35  ;;  %4117 = vtanh.f32 %v709_v38  ;;  %v3867_v38 = vpack.c.bf16 %v2541_v45, %v2540_v46 }
 0x1b8   :  { %4119 = vtanh.f32 %v707_v10 }
 0x1b9   :  { %v4102_v61 = vpop.eup %4101  ;;  %4121 = vtanh.f32 %v715_v42  ;;  %3868 = vmatprep.subr.bf16.mxu0 %v3867_v38 }
 0x1ba   :  { %v4104_v40 = vpop.eup %4103  ;;  %1333 = vmatprep.mubr.f32.mxu1 %v4102_v61  ;;  %4123 = vtanh.f32 %v713_v21 }
 0x1bb   :  { %v4106_v57 = vpop.eup %4105  ;;  %1334 = vmatmul.mubr.f32.gmra.mrb[126].mxu1 %v4104_v40  ;;  %4125 = vtanh.f32 %v721_v44  ;;  %v763_v40 = vadd.f32 %v5484_v17, %v5251_v26 }
 0x1bc   :  { %1339 = vmatprep.mubr.f32.mxu1 %v4106_v57  ;;  %v4108_v43 = vpop.eup %4107  ;;  %4127 = vtanh.f32 %v719_v19 }
 0x1bd   :  { %v4110_v8 = vpop.eup %4109  ;;  %4129 = vtanh.f32 %v727_v37 }
 0x1be   :  { %v4112_v50 = vpop.eup %4111  ;;  %4131 = vtanh.f32 %v725_v32 }
 0x1bf   :  { %1340 = vmatmul.mubr.f32.gmra.mrb[128].mxu1 %v4108_v43  ;;  %v4114_v52 = vpop.eup %4113  ;;  %4133 = vtanh.f32 %v733_v51 }
 0x1c0   :  { %1345 = vmatprep.mubr.f32.mxu1 %v4110_v8  ;;  %v4116_v55 = vpop.eup %4115  ;;  %4135 = vtanh.f32 %v731_v48 }
 0x1c1   :  { %v4118_v59 = vpop.eup %4117  ;;  %4137 = vtanh.f32 %v739_v58 }
 0x1c2   :  { %v4120_v63 = vpop.eup %4119  ;;  %4139 = vtanh.f32 %v737_v4 }
 0x1c3   :  { %1346 = vmatmul.mubr.f32.gmra.mrb[130].mxu1 %v4112_v50  ;;  %v4122_v0 = vpop.eup %4121  ;;  %4141 = vtanh.f32 %v745_v27  ;;  %v769_v50 = vadd.f32 %v5497_v41, %v5251_v26  ;;  %v767_v41 = vadd.f32 %v5495_v39, %v5247_v25  ;;  %v781_v27 = vadd.f32 %v5510_v11, %v5251_v26 }
 0x1c4   :  { %1351 = vmatprep.mubr.f32.mxu1 %v4114_v52  ;;  %v4124_v2 = vpop.eup %4123 }
 0x1c5   :  { %v4126_v5 = vpop.eup %4125 }
 0x1c6   :  { %v4128_v12 = vpop.eup %4127 }
 0x1c7   :  { %1352 = vmatmul.mubr.f32.gmra.mrb[132].mxu1 %v4116_v55  ;;  %v4130_v15 = vpop.eup %4129 }
 0x1c8   :  { %1357 = vmatprep.mubr.f32.mxu1 %v4118_v59  ;;  %v4132_v24 = vpop.eup %4131 }
 0x1c9   :  { %v4134_v23 = vpop.eup %4133 }
 0x1ca   :  { %v4136_v31 = vpop.eup %4135 }
 0x1cb   :  { %1358 = vmatmul.mubr.f32.gmra.mrb[134].mxu1 %v4120_v63  ;;  %v4138_v34 = vpop.eup %4137  ;;  %v775_v63 = vadd.f32 %v5504_v56, %v5251_v26 }
 0x1cc   :  { %1363 = vmatprep.mubr.f32.mxu1 %v4122_v0  ;;  %v4140_v57 = vpop.eup %4139 }
 0x1cd   :  { %v4142_v42 = vpop.eup %4141 }
 0x1cf   :  { %1364 = vmatmul.mubr.f32.gmra.mrb[136].mxu1 %v4124_v2 }
 0x1d0   :  { %1369 = vmatprep.mubr.f32.mxu1 %v4126_v5  ;;  %v773_v5 = vadd.f32 %v5502_v54, %v5247_v25 }
 0x1d2   :  { %v1053_v13 = vpop.f32.mrb[32].mxu1 }
 0x1d3   :  { %v1054_v16 = vadd.f32 %v1053_v13, %v5646_v9  ;;  %v1055_v22 = vpop.f32.mrb[33].mxu1  ;;  %1370 = vmatmul.mubr.f32.gmra.mrb[138].mxu1 %v4128_v12 }
 0x1d4   :  { %v1056_v20 = vadd.f32 %v1055_v22, %v5652_v7  ;;  %1375 = vmatprep.mubr.f32.mxu1 %v4130_v15 }
 0x1d6   :  { %4143 = vtanh.f32 %v1056_v20  ;;  %v1059_v36 = vpop.f32.mrb[34].mxu1 }
 0x1d7   :  { %4145 = vtanh.f32 %v1054_v16  ;;  %v1060_v28 = vadd.f32 %v1059_v36, %v5646_v9  ;;  %v1061_v29 = vpop.f32.mrb[35].mxu1  ;;  %1376 = vmatmul.mubr.f32.gmra.mrb[140].mxu1 %v4132_v24 }
 0x1d8   :  { %4147 = vtanh.f32 %v743_v18  ;;  %v1062_v30 = vadd.f32 %v1061_v29, %v5652_v7  ;;  %1381 = vmatprep.mubr.f32.mxu1 %v4134_v23  ;;  %v779_v18 = vadd.f32 %v5508_v6, %v5247_v25 }
 0x1d9   :  { %4149 = vtanh.f32 %v751_v3 }
 0x1da   :  { %4151 = vtanh.f32 %v1062_v30  ;;  %v1065_v47 = vpop.f32.mrb[36].mxu1 }
 0x1db   :  { %4153 = vtanh.f32 %v1060_v28  ;;  %v1066_v49 = vadd.f32 %v1065_v47, %v5646_v9  ;;  %v1067_v35 = vpop.f32.mrb[37].mxu1  ;;  %1382 = vmatmul.mubr.f32.gmra.mrb[142].mxu1 %v4136_v31 }
 0x1dc   :  { %4155 = vtanh.f32 %v749_v33  ;;  %v1068_v61 = vadd.f32 %v1067_v35, %v5652_v7  ;;  %1387 = vmatprep.mubr.f32.mxu1 %v4138_v34 }
 0x1dd   :  { %4157 = vtanh.f32 %v757_v53 }
 0x1de   :  { %4159 = vtanh.f32 %v1068_v61  ;;  %v1071_v10 = vpop.f32.mrb[38].mxu1 }
 0x1df   :  { %4161 = vtanh.f32 %v1066_v49  ;;  %v1072_v43 = vadd.f32 %v1071_v10, %v5646_v9  ;;  %v1073_v8 = vpop.f32.mrb[39].mxu1  ;;  %1388 = vmatmul.mubr.f32.gmra.mrb[144].mxu1 %v4140_v57 }
 0x1e0   :  { %v5681_v21 = vpop.eup %4143  ;;  %4163 = vtanh.f32 %v755_v1  ;;  %v1074_v44 = vadd.f32 %v1073_v8, %v5652_v7  ;;  %1393 = vmatprep.mubr.f32.mxu1 %v4142_v42  ;;  %v2543_v8 = vld [vmem:[%s7365_s9 + $0x18] sm:$0xff] }
 0x1e1   :  { %v5686_v17 = vpop.eup %4145  ;;  %4165 = vtanh.f32 %v763_v40  ;;  %1667 = vmatprep.mubr.f32.mxu0 %v5681_v21 }
 0x1e2   :  { %v4148_v52 = vpop.eup %4147  ;;  %4167 = vtanh.f32 %v1074_v44  ;;  %v1077_v19 = vpop.f32.mrb[40].mxu1  ;;  %1668 = vmatmul.mubr.f32.vlgmr.msra.gmra.mrb[96].mxu0 %v5686_v17 }
 0x1e3   :  { %v4150_v37 = vpop.eup %4149  ;;  %4169 = vtanh.f32 %v1072_v43  ;;  %v1078_v14 = vadd.f32 %v1077_v19, %v5646_v9  ;;  %v1079_v55 = vpop.f32.mrb[41].mxu1  ;;  %1394 = vmatmul.mubr.f32.gmra.mrb[146].mxu1 %v4148_v52  ;;  %3870 = vmatpush3.bf16.msra.mxu0 %v3867_v38  ;;  %v2542_v43 = vld [vmem:[%s7365_s9 + $0x10] sm:$0xff] }
 0x1e4   :  { %v5693_v59 = vpop.eup %4151  ;;  %4171 = vtanh.f32 %v761_v62  ;;  %v1080_v32 = vadd.f32 %v1079_v55, %v5652_v7  ;;  %1399 = vmatprep.mubr.f32.mxu1 %v4150_v37 }
 0x1e5   :  { %v5698_v51 = vpop.eup %4153  ;;  %4173 = vtanh.f32 %v769_v50  ;;  %1672 = vmatprep.mubr.f32.mxu0 %v5693_v59  ;;  %v3871_v50 = vpack.c.bf16 %v2543_v8, %v2542_v43 }
 0x1e6   :  { %v4156_v0 = vpop.eup %4155  ;;  %4175 = vtanh.f32 %v1080_v32  ;;  %v1083_v48 = vpop.f32.mrb[42].mxu1  ;;  %1673 = vmatmul.mubr.f32.gmra.mrb[98].mxu0 %v5698_v51 }
 0x1e7   :  { %v4158_v60 = vpop.eup %4157  ;;  %4177 = vtanh.f32 %v1078_v14  ;;  %v1084_v39 = vadd.f32 %v1083_v48, %v5646_v9  ;;  %v1085_v58 = vpop.f32.mrb[43].mxu1  ;;  %1400 = vmatmul.mubr.f32.gmra.mrb[148].mxu1 %v4156_v0  ;;  %3872 = vmatprep.subr.bf16.mxu0 %v3871_v50 }
 0x1e8   :  { %v5705_v2 = vpop.eup %4159  ;;  %4179 = vtanh.f32 %v767_v41  ;;  %v1086_v56 = vadd.f32 %v1085_v58, %v5652_v7  ;;  %1405 = vmatprep.mubr.f32.mxu1 %v4158_v60  ;;  %3874 = vmatpush3.bf16.msra.mxu0 %v3871_v50 }
 0x1e9   :  { %v5710_v4 = vpop.eup %4161  ;;  %4181 = vtanh.f32 %v775_v63  ;;  %1677 = vmatprep.mubr.f32.mxu0 %v5705_v2 }
 0x1ea   :  { %v4164_v12 = vpop.eup %4163  ;;  %4183 = vtanh.f32 %v1086_v56  ;;  %v1089_v13 = vpop.f32.mrb[44].mxu1  ;;  %1678 = vmatmul.mubr.f32.gmra.mrb[100].mxu0 %v5710_v4 }
 0x1eb   :  { %v4166_v15 = vpop.eup %4165  ;;  %4185 = vtanh.f32 %v1084_v39  ;;  %v1090_v54 = vadd.f32 %v1089_v13, %v5646_v9  ;;  %v1091_v16 = vpop.f32.mrb[45].mxu1  ;;  %1406 = vmatmul.mubr.f32.gmra.mrb[150].mxu1 %v4164_v12 }
 0x1ec   :  { %v5717_v22 = vpop.eup %4167  ;;  %4187 = vtanh.f32 %v773_v5  ;;  %v1092_v26 = vadd.f32 %v1091_v16, %v5652_v7  ;;  %1411 = vmatprep.mubr.f32.mxu1 %v4166_v15 }
 0x1ed   :  { %v5722_v11 = vpop.eup %4169  ;;  %4189 = vtanh.f32 %v781_v27  ;;  %1682 = vmatprep.mubr.f32.mxu0 %v5717_v22 }
 0x1ee   :  { %v4172_v20 = vpop.eup %4171  ;;  %4191 = vtanh.f32 %v1092_v26  ;;  %v1095_v3 = vpop.f32.mrb[46].mxu1  ;;  %1683 = vmatmul.mubr.f32.gmra.mrb[102].mxu0 %v5722_v11 }
 0x1ef   :  { %v4174_v24 = vpop.eup %4173  ;;  %4193 = vtanh.f32 %v1090_v54  ;;  %v1096_v36 = vadd.f32 %v1095_v3, %v5646_v9  ;;  %v1097_v23 = vpop.f32.mrb[47].mxu1  ;;  %1412 = vmatmul.mubr.f32.gmra.mrb[152].mxu1 %v4172_v20 }
 0x1f0   :  { %v5727_v25 = vpop.eup %4175  ;;  %4195 = vtanh.f32 %v779_v18  ;;  %v1098_v6 = vadd.f32 %v1097_v23, %v5652_v7  ;;  %1417 = vmatprep.mubr.f32.mxu1 %v4174_v24 }
 0x1f1   :  { %v5730_v28 = vpop.eup %4177  ;;  %1687 = vmatprep.mubr.f32.mxu0 %v5727_v25 }
 0x1f2   :  { %v4180_v29 = vpop.eup %4179  ;;  %4197 = vtanh.f32 %v1098_v6  ;;  %v1101_v33 = vpop.f32.mrb[48].mxu1  ;;  %1688 = vmatmul.mubr.f32.gmra.mrb[104].mxu0 %v5730_v28 }
 0x1f3   :  { %v4182_v30 = vpop.eup %4181  ;;  %4199 = vtanh.f32 %v1096_v36  ;;  %v1102_v53 = vadd.f32 %v1101_v33, %v5646_v9  ;;  %v1103_v31 = vpop.f32.mrb[49].mxu1  ;;  %1418 = vmatmul.mubr.f32.gmra.mrb[154].mxu1 %v4180_v29 }
 0x1f4   :  { %v5735_v47 = vpop.eup %4183  ;;  %v1104_v34 = vadd.f32 %v1103_v31, %v5652_v7  ;;  %1423 = vmatprep.mubr.f32.mxu1 %v4182_v30 }
 0x1f5   :  { %v5738_v49 = vpop.eup %4185  ;;  %1692 = vmatprep.mubr.f32.mxu0 %v5735_v47 }
 0x1f6   :  { %v4188_v35 = vpop.eup %4187  ;;  %4201 = vtanh.f32 %v1104_v34  ;;  %v1107_v46 = vpop.f32.mrb[50].mxu1  ;;  %1693 = vmatmul.mubr.f32.gmra.mrb[106].mxu0 %v5738_v49 }
 0x1f7   :  { %v4190_v45 = vpop.eup %4189  ;;  %4203 = vtanh.f32 %v1102_v53  ;;  %v1108_v1 = vadd.f32 %v1107_v46, %v5646_v9  ;;  %v1109_v61 = vpop.f32.mrb[51].mxu1  ;;  %1424 = vmatmul.mubr.f32.gmra.mrb[156].mxu1 %v4188_v35  ;;  %v2545_v35 = vld [vmem:[%s7365_s9 + $0x28] sm:$0xff] }
 0x1f8   :  { %v5743_v38 = vpop.eup %4191  ;;  %v1110_v40 = vadd.f32 %v1109_v61, %v5652_v7  ;;  %1429 = vmatprep.mubr.f32.mxu1 %v4190_v45 }
 0x1f9   :  { %v5746_v57 = vpop.eup %4193  ;;  %1697 = vmatprep.mubr.f32.mxu0 %v5743_v38 }
 0x1fa   :  { %v4196_v10 = vpop.eup %4195  ;;  %4205 = vtanh.f32 %v1110_v40  ;;  %v1113_v42 = vpop.f32.mrb[52].mxu1  ;;  %1698 = vmatmul.mubr.f32.gmra.mrb[108].mxu0 %v5746_v57 }
 0x1fb   :  { %4207 = vtanh.f32 %v1108_v1  ;;  %v1114_v62 = vadd.f32 %v1113_v42, %v5646_v9  ;;  %v1115_v44 = vpop.f32.mrb[53].mxu1  ;;  %1430 = vmatmul.mubr.f32.gmra.mrb[158].mxu1 %v4196_v10 }
 0x1fc   :  { %v5757_v52 = vpop.eup %4197  ;;  %v1116_v19 = vadd.f32 %v1115_v44, %v5652_v7  ;;  %2091 = vmatprep.mubr.f32.mxu1 %v5681_v21 }
 0x1fd   :  { %v5761_v37 = vpop.eup %4199  ;;  %1702 = vmatprep.mubr.f32.mxu0 %v5757_v52 }
 0x1fe   :  { %4209 = vtanh.f32 %v1116_v19  ;;  %v1119_v14 = vpop.f32.mrb[54].mxu1  ;;  %1703 = vmatmul.mubr.f32.gmra.mrb[110].mxu0 %v5761_v37 }
 0x1ff   :  { %4211 = vtanh.f32 %v1114_v62  ;;  %v1120_v55 = vadd.f32 %v1119_v14, %v5646_v9  ;;  %v1121_v41 = vpop.f32.mrb[55].mxu1  ;;  %2092 = vmatmul.mubr.f32.vlgmr.msra.gmra.mrb[160].mxu1 %v5686_v17 }
 0x200   :  { %v5767_v32 = vpop.eup %4201  ;;  %v1122_v21 = vadd.f32 %v1121_v41, %v5652_v7  ;;  %2096 = vmatprep.mubr.f32.mxu1 %v5693_v59 }
 0x201   :  { %v5771_v63 = vpop.eup %4203  ;;  %1707 = vmatprep.mubr.f32.mxu0 %v5767_v32 }
 0x202   :  { %4213 = vtanh.f32 %v1122_v21  ;;  %v1125_v0 = vpop.f32.mrb[56].mxu1  ;;  %1708 = vmatmul.mubr.f32.gmra.mrb[112].mxu0 %v5771_v63 }
 0x203   :  { %4215 = vtanh.f32 %v1120_v55  ;;  %v1126_v48 = vadd.f32 %v1125_v0, %v5646_v9  ;;  %v1127_v60 = vpop.f32.mrb[57].mxu1  ;;  %2097 = vmatmul.mubr.f32.gmra.mrb[162].mxu1 %v5698_v51 }
 0x204   :  { %v5777_v17 = vpop.eup %4205  ;;  %v1128_v39 = vadd.f32 %v1127_v60, %v5652_v7  ;;  %2101 = vmatprep.mubr.f32.mxu1 %v5705_v2 }
 0x205   :  { %v5781_v59 = vpop.eup %4207  ;;  %1712 = vmatprep.mubr.f32.mxu0 %v5777_v17 }
 0x206   :  { %4217 = vtanh.f32 %v1128_v39  ;;  %v1131_v58 = vpop.f32.mrb[58].mxu1  ;;  %1713 = vmatmul.mubr.f32.gmra.mrb[114].mxu0 %v5781_v59 }
 0x207   :  { %4219 = vtanh.f32 %v1126_v48  ;;  %v1132_v5 = vadd.f32 %v1131_v58, %v5646_v9  ;;  %v1133_v56 = vpop.f32.mrb[59].mxu1  ;;  %2102 = vmatmul.mubr.f32.gmra.mrb[164].mxu1 %v5710_v4 }
 0x208   :  { %v5787_v51 = vpop.eup %4209  ;;  %v1134_v27 = vadd.f32 %v1133_v56, %v5652_v7  ;;  %2106 = vmatprep.mubr.f32.mxu1 %v5717_v22 }
 0x209   :  { %v5791_v2 = vpop.eup %4211  ;;  %1717 = vmatprep.mubr.f32.mxu0 %v5787_v51 }
 0x20a   :  { %4221 = vtanh.f32 %v1134_v27  ;;  %v1137_v12 = vpop.f32.mrb[60].mxu1  ;;  %1718 = vmatmul.mubr.f32.gmra.mrb[116].mxu0 %v5791_v2 }
 0x20b   :  { %4223 = vtanh.f32 %v1132_v5  ;;  %v1138_v13 = vadd.f32 %v1137_v12, %v5646_v9  ;;  %v1139_v15 = vpop.f32.mrb[61].mxu1  ;;  %2107 = vmatmul.mubr.f32.gmra.mrb[166].mxu1 %v5722_v11 }
 0x20c   :  { %v5797_v4 = vpop.eup %4213  ;;  %v1140_v54 = vadd.f32 %v1139_v15, %v5652_v7  ;;  %2111 = vmatprep.mubr.f32.mxu1 %v5727_v25 }
 0x20d   :  { %v5801_v16 = vpop.eup %4215  ;;  %1722 = vmatprep.mubr.f32.mxu0 %v5797_v4 }
 0x20e   :  { %4225 = vtanh.f32 %v1140_v54  ;;  %v1143_v22 = vpop.f32.mrb[62].mxu1  ;;  %1723 = vmatmul.mubr.f32.gmra.mrb[118].mxu0 %v5801_v16 }
 0x20f   :  { %4227 = vtanh.f32 %v1138_v13  ;;  %v1144_v18 = vadd.f32 %v1143_v22, %v5646_v9  ;;  %v1145_v26 = vpop.f32.mrb[63].mxu1  ;;  %2112 = vmatmul.mubr.f32.gmra.mrb[168].mxu1 %v5730_v28 }
 0x210   :  { %v5807_v11 = vpop.eup %4217  ;;  %v1146_v20 = vadd.f32 %v1145_v26, %v5652_v7  ;;  %2116 = vmatprep.mubr.f32.mxu1 %v5735_v47 }
 0x211   :  { %v5811_v3 = vpop.eup %4219  ;;  %1727 = vmatprep.mubr.f32.mxu0 %v5807_v11 }
 0x212   :  { %4229 = vtanh.f32 %v1146_v20  ;;  %v1149_v24 = vpop.f32.mrb[64].mxu1  ;;  %1728 = vmatmul.mubr.f32.gmra.mrb[120].mxu0 %v5811_v3 }
 0x213   :  { %4231 = vtanh.f32 %v1144_v18  ;;  %v1150_v36 = vadd.f32 %v1149_v24, %v5646_v9  ;;  %v1151_v23 = vpop.f32.mrb[65].mxu1  ;;  %2117 = vmatmul.mubr.f32.gmra.mrb[170].mxu1 %v5738_v49  ;;  %v2544_v49 = vld [vmem:[%s7365_s9 + $0x20] sm:$0xff] }
 0x214   :  { %v5817_v25 = vpop.eup %4221  ;;  %v1152_v6 = vadd.f32 %v1151_v23, %v5652_v7  ;;  %2121 = vmatprep.mubr.f32.mxu1 %v5743_v38  ;;  %v3875_v1 = vpack.c.bf16 %v2545_v35, %v2544_v49  ;;  %v2546_v23 = vld [vmem:[%s7365_s9 + $0x30] sm:$0xff] }
 0x215   :  { %v5821_v28 = vpop.eup %4223  ;;  %1732 = vmatprep.mubr.f32.mxu0 %v5817_v25 }
 0x216   :  { %4233 = vtanh.f32 %v1152_v6  ;;  %v1155_v29 = vpop.f32.mrb[66].mxu1  ;;  %1733 = vmatmul.mubr.f32.gmra.mrb[122].mxu0 %v5821_v28  ;;  %3876 = vmatprep.subr.bf16.mxu0 %v3875_v1 }
 0x217   :  { %4235 = vtanh.f32 %v1150_v36  ;;  %v1156_v33 = vadd.f32 %v1155_v29, %v5646_v9  ;;  %v1157_v30 = vpop.f32.mrb[67].mxu1  ;;  %2122 = vmatmul.mubr.f32.gmra.mrb[172].mxu1 %v5746_v57  ;;  %3878 = vmatpush3.bf16.msra.mxu0 %v3875_v1 }
 0x218   :  { %v5827_v53 = vpop.eup %4225  ;;  %v1158_v31 = vadd.f32 %v1157_v30, %v5652_v7  ;;  %2126 = vmatprep.mubr.f32.mxu1 %v5757_v52 }
 0x219   :  { %v5831_v47 = vpop.eup %4227  ;;  %1737 = vmatprep.mubr.f32.mxu0 %v5827_v53 }
 0x21a   :  { %4237 = vtanh.f32 %v1158_v31  ;;  %v1161_v34 = vpop.f32.mrb[68].mxu1  ;;  %1738 = vmatmul.mubr.f32.gmra.mrb[124].mxu0 %v5831_v47 }
 0x21b   :  { %4239 = vtanh.f32 %v1156_v33  ;;  %v1162_v46 = vadd.f32 %v1161_v34, %v5646_v9  ;;  %v1163_v45 = vpop.f32.mrb[69].mxu1  ;;  %2127 = vmatmul.mubr.f32.gmra.mrb[174].mxu1 %v5761_v37 }
 0x21c   :  { %v5843_v61 = vpop.eup %4229  ;;  %v1164_v38 = vadd.f32 %v1163_v45, %v5652_v7  ;;  %2131 = vmatprep.mubr.f32.mxu1 %v5767_v32 }
 0x21d   :  { %v5847_v40 = vpop.eup %4231  ;;  %1742 = vmatprep.mubr.f32.mxu0 %v5843_v61 }
 0x21e   :  { %4241 = vtanh.f32 %v1164_v38  ;;  %v1167_v57 = vpop.f32.mrb[70].mxu1  ;;  %1743 = vmatmul.mubr.f32.gmra.mrb[126].mxu0 %v5847_v40 }
 0x21f   :  { %4243 = vtanh.f32 %v1162_v46  ;;  %v1168_v10 = vadd.f32 %v1167_v57, %v5646_v9  ;;  %v1169_v42 = vpop.f32.mrb[71].mxu1  ;;  %2132 = vmatmul.mubr.f32.gmra.mrb[176].mxu1 %v5771_v63 }
 0x220   :  { %v5853_v43 = vpop.eup %4233  ;;  %v1170_v8 = vadd.f32 %v1169_v42, %v5652_v7  ;;  %2136 = vmatprep.mubr.f32.mxu1 %v5777_v17 }
 0x221   :  { %v5857_v62 = vpop.eup %4235  ;;  %1747 = vmatprep.mubr.f32.mxu0 %v5853_v43 }
 0x222   :  { %4245 = vtanh.f32 %v1170_v8  ;;  %v1173_v44 = vpop.f32.mrb[72].mxu1  ;;  %1748 = vmatmul.mubr.f32.gmra.mrb[128].mxu0 %v5857_v62 }
 0x223   :  { %4247 = vtanh.f32 %v1168_v10  ;;  %v1174_v50 = vadd.f32 %v1173_v44, %v5646_v9  ;;  %v1175_v52 = vpop.f32.mrb[73].mxu1  ;;  %2137 = vmatmul.mubr.f32.gmra.mrb[178].mxu1 %v5781_v59 }
 0x224   :  { %v5863_v19 = vpop.eup %4237  ;;  %v1176_v37 = vadd.f32 %v1175_v52, %v5652_v7  ;;  %2141 = vmatprep.mubr.f32.mxu1 %v5787_v51 }
 0x225   :  { %v5867_v14 = vpop.eup %4239  ;;  %1752 = vmatprep.mubr.f32.mxu0 %v5863_v19 }
 0x226   :  { %4249 = vtanh.f32 %v1176_v37  ;;  %v1179_v55 = vpop.f32.mrb[74].mxu1  ;;  %1753 = vmatmul.mubr.f32.gmra.mrb[130].mxu0 %v5867_v14 }
 0x227   :  { %4251 = vtanh.f32 %v1174_v50  ;;  %v1180_v41 = vadd.f32 %v1179_v55, %v5646_v9  ;;  %v1181_v32 = vpop.f32.mrb[75].mxu1  ;;  %2142 = vmatmul.mubr.f32.gmra.mrb[180].mxu1 %v5791_v2 }
 0x228   :  { %v5873_v21 = vpop.eup %4241  ;;  %v1182_v63 = vadd.f32 %v1181_v32, %v5652_v7  ;;  %2146 = vmatprep.mubr.f32.mxu1 %v5797_v4 }
 0x229   :  { %v5877_v0 = vpop.eup %4243  ;;  %1757 = vmatprep.mubr.f32.mxu0 %v5873_v21 }
 0x22a   :  { %4253 = vtanh.f32 %v1182_v63  ;;  %v1185_v48 = vpop.f32.mrb[76].mxu1  ;;  %1758 = vmatmul.mubr.f32.gmra.mrb[132].mxu0 %v5877_v0  ;;  %v2548_v63 = vld [vmem:[%s7365_s9 + $0x40] sm:$0xff] }
 0x22b   :  { %4255 = vtanh.f32 %v1180_v41  ;;  %v1186_v60 = vadd.f32 %v1185_v48, %v5646_v9  ;;  %v1187_v17 = vpop.f32.mrb[77].mxu1  ;;  %2147 = vmatmul.mubr.f32.gmra.mrb[182].mxu1 %v5801_v16 }
 0x22c   :  { %v5883_v39 = vpop.eup %4245  ;;  %v1188_v59 = vadd.f32 %v1187_v17, %v5652_v7  ;;  %2151 = vmatprep.mubr.f32.mxu1 %v5807_v11 }
 0x22d   :  { %v5887_v58 = vpop.eup %4247  ;;  %1762 = vmatprep.mubr.f32.mxu0 %v5883_v39 }
 0x22e   :  { %4257 = vtanh.f32 %v1188_v59  ;;  %v1191_v5 = vpop.f32.mrb[78].mxu1  ;;  %1763 = vmatmul.mubr.f32.gmra.mrb[134].mxu0 %v5887_v58 }
 0x22f   :  { %4259 = vtanh.f32 %v1186_v60  ;;  %v1192_v56 = vadd.f32 %v1191_v5, %v5646_v9  ;;  %v1193_v51 = vpop.f32.mrb[79].mxu1  ;;  %2152 = vmatmul.mubr.f32.gmra.mrb[184].mxu1 %v5811_v3 }
 0x230   :  { %v5893_v27 = vpop.eup %4249  ;;  %v1194_v2 = vadd.f32 %v1193_v51, %v5652_v7  ;;  %2156 = vmatprep.mubr.f32.mxu1 %v5817_v25  ;;  %v2547_v25 = vld [vmem:[%s7365_s9 + $0x38] sm:$0xff] }
 0x231   :  { %v5897_v12 = vpop.eup %4251  ;;  %1767 = vmatprep.mubr.f32.mxu0 %v5893_v27  ;;  %v3879_v29 = vpack.c.bf16 %v2547_v25, %v2546_v23  ;;  %v2551_v51 = vld [vmem:[%s7365_s9 + $0x58] sm:$0xff]  ;;  %v2554_v23 = vld [vmem:[%s7365_s9 + $0x70] sm:$0xff] }
 0x232   :  { %4261 = vtanh.f32 %v1194_v2  ;;  %v1197_v13 = vpop.f32.mrb[80].mxu1  ;;  %1768 = vmatmul.mubr.f32.gmra.mrb[136].mxu0 %v5897_v12  ;;  %v2555_v25 = vld [vmem:[%s7365_s9 + $0x78] sm:$0xff] }
 0x233   :  { %4263 = vtanh.f32 %v1192_v56  ;;  %v1198_v15 = vadd.f32 %v1197_v13, %v5646_v9  ;;  %v1199_v4 = vpop.f32.mrb[81].mxu1  ;;  %2157 = vmatmul.mubr.f32.gmra.mrb[186].mxu1 %v5821_v28  ;;  %3880 = vmatprep.subr.bf16.mxu0 %v3879_v29  ;;  %v2550_v56 = vld [vmem:[%s7365_s9 + $0x50] sm:$0xff] }
 0x234   :  { %v5903_v54 = vpop.eup %4253  ;;  %v1200_v16 = vadd.f32 %v1199_v4, %v5652_v7  ;;  %2161 = vmatprep.mubr.f32.mxu1 %v5827_v53  ;;  %3882 = vmatpush3.bf16.msra.mxu0 %v3879_v29  ;;  %v3895_v29 = vpack.c.bf16 %v2555_v25, %v2554_v23 }
 0x235   :  { %v5907_v22 = vpop.eup %4255  ;;  %1772 = vmatprep.mubr.f32.mxu0 %v5903_v54 }
 0x236   :  { %4265 = vtanh.f32 %v1200_v16  ;;  %v1203_v18 = vpop.f32.mrb[82].mxu1  ;;  %1773 = vmatmul.mubr.f32.gmra.mrb[138].mxu0 %v5907_v22  ;;  %v2552_v16 = vld [vmem:[%s7365_s9 + $0x60] sm:$0xff] }
 0x237   :  { %4267 = vtanh.f32 %v1198_v15  ;;  %v1204_v26 = vadd.f32 %v1203_v18, %v5646_v9  ;;  %v1205_v11 = vpop.f32.mrb[83].mxu1  ;;  %2162 = vmatmul.mubr.f32.gmra.mrb[188].mxu1 %v5831_v47 }
 0x238   :  { %v5913_v20 = vpop.eup %4257  ;;  %v1206_v3 = vadd.f32 %v1205_v11, %v5652_v7  ;;  %2166 = vmatprep.mubr.f32.mxu1 %v5843_v61 }
 0x239   :  { %v5917_v24 = vpop.eup %4259  ;;  %1777 = vmatprep.mubr.f32.mxu0 %v5913_v20 }
 0x23a   :  { %4269 = vtanh.f32 %v1206_v3  ;;  %v1209_v36 = vpop.f32.mrb[84].mxu1  ;;  %1778 = vmatmul.mubr.f32.gmra.mrb[140].mxu0 %v5917_v24 }
 0x23b   :  { %4271 = vtanh.f32 %v1204_v26  ;;  %v1210_v6 = vadd.f32 %v1209_v36, %v5646_v9  ;;  %v1211_v28 = vpop.f32.mrb[85].mxu1  ;;  %2167 = vmatmul.mubr.f32.gmra.mrb[190].mxu1 %v5847_v40 }
 0x23c   :  { %v5929_v33 = vpop.eup %4261  ;;  %v1212_v30 = vadd.f32 %v1211_v28, %v5652_v7  ;;  %2171 = vmatprep.mubr.f32.mxu1 %v5853_v43 }
 0x23d   :  { %v5933_v53 = vpop.eup %4263  ;;  %1782 = vmatprep.mubr.f32.mxu0 %v5929_v33 }
 0x23e   :  { %4273 = vtanh.f32 %v1212_v30  ;;  %v1215_v31 = vpop.f32.mrb[86].mxu1  ;;  %1783 = vmatmul.mubr.f32.gmra.mrb[142].mxu0 %v5933_v53 }
 0x23f   :  { %4275 = vtanh.f32 %v1210_v6  ;;  %v1216_v47 = vadd.f32 %v1215_v31, %v5646_v9  ;;  %v1217_v34 = vpop.f32.mrb[87].mxu1  ;;  %2172 = vmatmul.mubr.f32.gmra.mrb[192].mxu1 %v5857_v62 }
 0x240   :  { %v5939_v49 = vpop.eup %4265  ;;  %v1218_v35 = vadd.f32 %v1217_v34, %v5652_v7  ;;  %2176 = vmatprep.mubr.f32.mxu1 %v5863_v19 }
 0x241   :  { %v5943_v46 = vpop.eup %4267  ;;  %1787 = vmatprep.mubr.f32.mxu0 %v5939_v49 }
 0x242   :  { %4277 = vtanh.f32 %v1218_v35  ;;  %v1221_v45 = vpop.f32.mrb[88].mxu1  ;;  %1788 = vmatmul.mubr.f32.gmra.mrb[144].mxu0 %v5943_v46 }
 0x243   :  { %4279 = vtanh.f32 %v1216_v47  ;;  %v1222_v1 = vadd.f32 %v1221_v45, %v5646_v9  ;;  %v1223_v61 = vpop.f32.mrb[89].mxu1  ;;  %2177 = vmatmul.mubr.f32.gmra.mrb[194].mxu1 %v5867_v14 }
 0x244   :  { %v5949_v38 = vpop.eup %4269  ;;  %v1224_v40 = vadd.f32 %v1223_v61, %v5652_v7  ;;  %2181 = vmatprep.mubr.f32.mxu1 %v5873_v21 }
 0x245   :  { %v5953_v57 = vpop.eup %4271  ;;  %1792 = vmatprep.mubr.f32.mxu0 %v5949_v38 }
 0x246   :  { %4281 = vtanh.f32 %v1224_v40  ;;  %v1227_v10 = vpop.f32.mrb[90].mxu1  ;;  %1793 = vmatmul.mubr.f32.gmra.mrb[146].mxu0 %v5953_v57 }
 0x247   :  { %4283 = vtanh.f32 %v1222_v1  ;;  %v1228_v42 = vadd.f32 %v1227_v10, %v5646_v9  ;;  %v1229_v43 = vpop.f32.mrb[91].mxu1  ;;  %2182 = vmatmul.mubr.f32.gmra.mrb[196].mxu1 %v5877_v0  ;;  %v2549_v0 = vld [vmem:[%s7365_s9 + $0x48] sm:$0xff] }
 0x248   :  { %v5959_v8 = vpop.eup %4273  ;;  %v1230_v62 = vadd.f32 %v1229_v43, %v5652_v7  ;;  %2186 = vmatprep.mubr.f32.mxu1 %v5883_v39  ;;  %v3883_v17 = vpack.c.bf16 %v2549_v0, %v2548_v63 }
 0x249   :  { %v5963_v44 = vpop.eup %4275  ;;  %1797 = vmatprep.mubr.f32.mxu0 %v5959_v8 }
 0x24a   :  { %4285 = vtanh.f32 %v1230_v62  ;;  %v1233_v50 = vpop.f32.mrb[92].mxu1  ;;  %1798 = vmatmul.mubr.f32.gmra.mrb[148].mxu0 %v5963_v44  ;;  %3884 = vmatprep.subr.bf16.mxu0 %v3883_v17 }
 0x24b   :  { %4287 = vtanh.f32 %v1228_v42  ;;  %v1234_v52 = vadd.f32 %v1233_v50, %v5646_v9  ;;  %v1235_v19 = vpop.f32.mrb[93].mxu1  ;;  %2187 = vmatmul.mubr.f32.gmra.mrb[198].mxu1 %v5887_v58  ;;  %3886 = vmatpush3.bf16.msra.mxu0 %v3883_v17 }
 0x24c   :  { %v5969_v37 = vpop.eup %4277  ;;  %v1236_v14 = vadd.f32 %v1235_v19, %v5652_v7  ;;  %2191 = vmatprep.mubr.f32.mxu1 %v5893_v27 }
 0x24d   :  { %v5973_v55 = vpop.eup %4279  ;;  %1802 = vmatprep.mubr.f32.mxu0 %v5969_v37 }
 0x24e   :  { %4289 = vtanh.f32 %v1236_v14  ;;  %v1239_v41 = vpop.f32.mrb[94].mxu1  ;;  %1803 = vmatmul.mubr.f32.gmra.mrb[150].mxu0 %v5973_v55 }
 0x24f   :  { %4291 = vtanh.f32 %v1234_v52  ;;  %v1240_v32 = vadd.f32 %v1239_v41, %v5646_v9  ;;  %v1241_v21 = vpop.f32.mrb[95].mxu1  ;;  %2192 = vmatmul.mubr.f32.gmra.mrb[200].mxu1 %v5897_v12  ;;  %v3887_v12 = vpack.c.bf16 %v2551_v51, %v2550_v56 }
 0x250   :  { %v5985_v48 = vpop.eup %4281  ;;  %v1242_v60 = vadd.f32 %v1241_v21, %v5652_v7  ;;  %2196 = vmatprep.mubr.f32.mxu1 %v5903_v54 }
 0x251   :  { %v5989_v39 = vpop.eup %4283  ;;  %1807 = vmatprep.mubr.f32.mxu0 %v5985_v48  ;;  %3888 = vmatprep.subr.bf16.mxu0 %v3887_v12 }
 0x252   :  { %4293 = vtanh.f32 %v1242_v60  ;;  %v1245_v59 = vpop.f32.mrb[96].mxu1  ;;  %1808 = vmatmul.mubr.f32.gmra.mrb[152].mxu0 %v5989_v39 }
 0x253   :  { %4295 = vtanh.f32 %v1240_v32  ;;  %v1246_v58 = vadd.f32 %v1245_v59, %v5646_v9  ;;  %v1247_v5 = vpop.f32.mrb[97].mxu1  ;;  %2197 = vmatmul.mubr.f32.gmra.mrb[202].mxu1 %v5907_v22  ;;  %3890 = vmatpush3.bf16.msra.mxu0 %v3887_v12  ;;  %v2553_v22 = vld [vmem:[%s7365_s9 + $0x68] sm:$0xff] }
 0x254   :  { %v6001_v27 = vpop.eup %4285  ;;  %v1248_v2 = vadd.f32 %v1247_v5, %v5652_v7  ;;  %2201 = vmatprep.mubr.f32.mxu1 %v5913_v20  ;;  %v3891_v11 = vpack.c.bf16 %v2553_v22, %v2552_v16 }
 0x255   :  { %v6005_v13 = vpop.eup %4287  ;;  %1812 = vmatprep.mubr.f32.mxu0 %v6001_v27 }
 0x256   :  { %4297 = vtanh.f32 %v1248_v2  ;;  %v1251_v15 = vpop.f32.mrb[98].mxu1  ;;  %1813 = vmatmul.mubr.f32.gmra.mrb[154].mxu0 %v6005_v13  ;;  %3892 = vmatprep.subr.bf16.mxu0 %v3891_v11 }
 0x257   :  { %4299 = vtanh.f32 %v1246_v58  ;;  %v1252_v4 = vadd.f32 %v1251_v15, %v5646_v9  ;;  %v1253_v54 = vpop.f32.mrb[99].mxu1  ;;  %2202 = vmatmul.mubr.f32.gmra.mrb[204].mxu1 %v5917_v24  ;;  %3894 = vmatpush3.bf16.msra.mxu0 %v3891_v11 }
 0x258   :  { %v6017_v18 = vpop.eup %4289  ;;  %v1254_v26 = vadd.f32 %v1253_v54, %v5652_v7  ;;  %2206 = vmatprep.mubr.f32.mxu1 %v5929_v33  ;;  %3896 = vmatprep.subr.bf16.mxu0 %v3895_v29 }
 0x259   :  { %v6021_v20 = vpop.eup %4291  ;;  %1817 = vmatprep.mubr.f32.mxu0 %v6017_v18 }
 0x25a   :  { %4301 = vtanh.f32 %v1254_v26  ;;  %v1257_v3 = vpop.f32.mrb[100].mxu1  ;;  %1818 = vmatmul.mubr.f32.gmra.mrb[156].mxu0 %v6021_v20 }
 0x25b   :  { %4303 = vtanh.f32 %v1252_v4  ;;  %v1258_v24 = vadd.f32 %v1257_v3, %v5646_v9  ;;  %v1259_v36 = vpop.f32.mrb[101].mxu1  ;;  %2207 = vmatmul.mubr.f32.gmra.mrb[206].mxu1 %v5933_v53  ;;  %3898 = vmatpush3.bf16.msra.mxu0 %v3895_v29 }
 0x25c   :  { %v6033_v6 = vpop.eup %4293  ;;  %v1260_v28 = vadd.f32 %v1259_v36, %v5652_v7  ;;  %2211 = vmatprep.mubr.f32.mxu1 %v5939_v49 }
 0x25d   :  { %v6037_v33 = vpop.eup %4295  ;;  %1822 = vmatprep.mubr.f32.mxu0 %v6033_v6 }
 0x25e   :  { %4305 = vtanh.f32 %v1260_v28  ;;  %v1263_v30 = vpop.f32.mrb[102].mxu1  ;;  %1823 = vmatmul.mubr.f32.gmra.mrb[158].mxu0 %v6037_v33 }
 0x25f   :  { %4307 = vtanh.f32 %v1258_v24  ;;  %v1264_v53 = vadd.f32 %v1263_v30, %v5646_v9  ;;  %v1265_v31 = vpop.f32.mrb[103].mxu1  ;;  %2212 = vmatmul.mubr.f32.gmra.mrb[208].mxu1 %v5943_v46 }
 0x260   :  { %v6043_v47 = vpop.eup %4297  ;;  %v1266_v34 = vadd.f32 %v1265_v31, %v5652_v7  ;;  %2216 = vmatprep.mubr.f32.mxu1 %v5949_v38 }
 0x261   :  { %v6047_v49 = vpop.eup %4299  ;;  %1827 = vmatprep.mubr.f32.mxu0 %v6043_v47 }
 0x262   :  { %4309 = vtanh.f32 %v1266_v34  ;;  %v1269_v35 = vpop.f32.mrb[104].mxu1  ;;  %1828 = vmatmul.mubr.f32.gmra.mrb[160].mxu0 %v6047_v49 }
 0x263   :  { %4311 = vtanh.f32 %v1264_v53  ;;  %v1270_v45 = vadd.f32 %v1269_v35, %v5646_v9  ;;  %v1271_v1 = vpop.f32.mrb[105].mxu1  ;;  %2217 = vmatmul.mubr.f32.gmra.mrb[210].mxu1 %v5953_v57 }
 0x264   :  { %v6053_v46 = vpop.eup %4301  ;;  %v1272_v61 = vadd.f32 %v1271_v1, %v5652_v7  ;;  %2221 = vmatprep.mubr.f32.mxu1 %v5959_v8 }
 0x265   :  { %v6057_v38 = vpop.eup %4303  ;;  %1832 = vmatprep.mubr.f32.mxu0 %v6053_v46 }
 0x266   :  { %4313 = vtanh.f32 %v1272_v61  ;;  %v1275_v40 = vpop.f32.mrb[106].mxu1  ;;  %1833 = vmatmul.mubr.f32.gmra.mrb[162].mxu0 %v6057_v38 }
 0x267   :  { %4315 = vtanh.f32 %v1270_v45  ;;  %v1276_v10 = vadd.f32 %v1275_v40, %v5646_v9  ;;  %v1277_v42 = vpop.f32.mrb[107].mxu1  ;;  %2222 = vmatmul.mubr.f32.gmra.mrb[212].mxu1 %v5963_v44 }
 0x268   :  { %v6063_v57 = vpop.eup %4305  ;;  %v1278_v43 = vadd.f32 %v1277_v42, %v5652_v7  ;;  %2226 = vmatprep.mubr.f32.mxu1 %v5969_v37 }
 0x269   :  { %v6067_v8 = vpop.eup %4307  ;;  %1837 = vmatprep.mubr.f32.mxu0 %v6063_v57 }
 0x26a   :  { %4317 = vtanh.f32 %v1278_v43  ;;  %v1281_v62 = vpop.f32.mrb[108].mxu1  ;;  %1838 = vmatmul.mubr.f32.gmra.mrb[164].mxu0 %v6067_v8 }
 0x26b   :  { %4319 = vtanh.f32 %v1276_v10  ;;  %v1282_v50 = vadd.f32 %v1281_v62, %v5646_v9  ;;  %v1283_v52 = vpop.f32.mrb[109].mxu1  ;;  %2227 = vmatmul.mubr.f32.gmra.mrb[214].mxu1 %v5973_v55 }
 0x26c   :  { %v6073_v44 = vpop.eup %4309  ;;  %v1284_v19 = vadd.f32 %v1283_v52, %v5652_v7  ;;  %2231 = vmatprep.mubr.f32.mxu1 %v5985_v48 }
 0x26d   :  { %v6077_v37 = vpop.eup %4311  ;;  %1842 = vmatprep.mubr.f32.mxu0 %v6073_v44 }
 0x26e   :  { %4321 = vtanh.f32 %v1284_v19  ;;  %v1287_v14 = vpop.f32.mrb[110].mxu1  ;;  %1843 = vmatmul.mubr.f32.gmra.mrb[166].mxu0 %v6077_v37 }
 0x26f   :  { %4323 = vtanh.f32 %v1282_v50  ;;  %v1288_v41 = vadd.f32 %v1287_v14, %v5646_v9  ;;  %v1289_v32 = vpop.f32.mrb[111].mxu1  ;;  %2232 = vmatmul.mubr.f32.gmra.mrb[216].mxu1 %v5989_v39 }
 0x270   :  { %v6083_v55 = vpop.eup %4313  ;;  %v1290_v21 = vadd.f32 %v1289_v32, %v5652_v7  ;;  %2236 = vmatprep.mubr.f32.mxu1 %v6001_v27 }
 0x271   :  { %v6087_v63 = vpop.eup %4315  ;;  %1847 = vmatprep.mubr.f32.mxu0 %v6083_v55 }
 0x272   :  { %4325 = vtanh.f32 %v1290_v21  ;;  %v1293_v0 = vpop.f32.mrb[112].mxu1  ;;  %1848 = vmatmul.mubr.f32.gmra.mrb[168].mxu0 %v6087_v63 }
 0x273   :  { %4327 = vtanh.f32 %v1288_v41  ;;  %v1294_v48 = vadd.f32 %v1293_v0, %v5646_v9  ;;  %v1295_v60 = vpop.f32.mrb[113].mxu1  ;;  %2237 = vmatmul.mubr.f32.gmra.mrb[218].mxu1 %v6005_v13 }
 0x274   :  { %v6093_v17 = vpop.eup %4317  ;;  %v1296_v39 = vadd.f32 %v1295_v60, %v5652_v7  ;;  %2241 = vmatprep.mubr.f32.mxu1 %v6017_v18 }
 0x275   :  { %v6097_v59 = vpop.eup %4319  ;;  %1852 = vmatprep.mubr.f32.mxu0 %v6093_v17 }
 0x276   :  { %4329 = vtanh.f32 %v1296_v39  ;;  %v1299_v58 = vpop.f32.mrb[114].mxu1  ;;  %1853 = vmatmul.mubr.f32.gmra.mrb[170].mxu0 %v6097_v59 }
 0x277   :  { %4331 = vtanh.f32 %v1294_v48  ;;  %v1300_v5 = vadd.f32 %v1299_v58, %v5646_v9  ;;  %v1301_v56 = vpop.f32.mrb[115].mxu1  ;;  %2242 = vmatmul.mubr.f32.gmra.mrb[220].mxu1 %v6021_v20 }
 0x278   :  { %v6103_v51 = vpop.eup %4321  ;;  %v1302_v27 = vadd.f32 %v1301_v56, %v5652_v7  ;;  %2246 = vmatprep.mubr.f32.mxu1 %v6033_v6 }
 0x279   :  { %v6107_v2 = vpop.eup %4323  ;;  %1857 = vmatprep.mubr.f32.mxu0 %v6103_v51 }
 0x27a   :  { %4333 = vtanh.f32 %v1302_v27  ;;  %v1305_v12 = vpop.f32.mrb[116].mxu1  ;;  %1858 = vmatmul.mubr.f32.gmra.mrb[172].mxu0 %v6107_v2 }
 0x27b   :  { %4335 = vtanh.f32 %v1300_v5  ;;  %v1306_v13 = vadd.f32 %v1305_v12, %v5646_v9  ;;  %v1307_v15 = vpop.f32.mrb[117].mxu1  ;;  %2247 = vmatmul.mubr.f32.gmra.mrb[222].mxu1 %v6037_v33 }
 0x27c   :  { %v6113_v4 = vpop.eup %4325  ;;  %v1308_v54 = vadd.f32 %v1307_v15, %v5652_v7  ;;  %2251 = vmatprep.mubr.f32.mxu1 %v6043_v47 }
 0x27d   :  { %v6117_v16 = vpop.eup %4327  ;;  %1862 = vmatprep.mubr.f32.mxu0 %v6113_v4 }
 0x27e   :  { %4337 = vtanh.f32 %v1308_v54  ;;  %v1311_v22 = vpop.f32.mrb[118].mxu1  ;;  %1863 = vmatmul.mubr.f32.gmra.mrb[174].mxu0 %v6117_v16 }
 0x27f   :  { %4339 = vtanh.f32 %v1306_v13  ;;  %v1312_v18 = vadd.f32 %v1311_v22, %v5646_v9  ;;  %v1313_v26 = vpop.f32.mrb[119].mxu1  ;;  %2252 = vmatmul.mubr.f32.gmra.mrb[224].mxu1 %v6047_v49 }
 0x280   :  { %v6123_v11 = vpop.eup %4329  ;;  %v1314_v20 = vadd.f32 %v1313_v26, %v5652_v7  ;;  %2256 = vmatprep.mubr.f32.mxu1 %v6053_v46 }
 0x281   :  { %v6127_v3 = vpop.eup %4331  ;;  %1867 = vmatprep.mubr.f32.mxu0 %v6123_v11 }
 0x282   :  { %4341 = vtanh.f32 %v1314_v20  ;;  %v1317_v24 = vpop.f32.mrb[120].mxu1  ;;  %1868 = vmatmul.mubr.f32.gmra.mrb[176].mxu0 %v6127_v3 }
 0x283   :  { %4343 = vtanh.f32 %v1312_v18  ;;  %v1318_v36 = vadd.f32 %v1317_v24, %v5646_v9  ;;  %v1319_v23 = vpop.f32.mrb[121].mxu1  ;;  %2257 = vmatmul.mubr.f32.gmra.mrb[226].mxu1 %v6057_v38 }
 0x284   :  { %v6133_v25 = vpop.eup %4333  ;;  %v1320_v6 = vadd.f32 %v1319_v23, %v5652_v7  ;;  %2261 = vmatprep.mubr.f32.mxu1 %v6063_v57 }
 0x285   :  { %v6137_v28 = vpop.eup %4335  ;;  %1872 = vmatprep.mubr.f32.mxu0 %v6133_v25 }
 0x286   :  { %4345 = vtanh.f32 %v1320_v6  ;;  %v1323_v29 = vpop.f32.mrb[122].mxu1  ;;  %1873 = vmatmul.mubr.f32.gmra.mrb[178].mxu0 %v6137_v28 }
 0x287   :  { %4347 = vtanh.f32 %v1318_v36  ;;  %v1324_v33 = vadd.f32 %v1323_v29, %v5646_v9  ;;  %v1325_v30 = vpop.f32.mrb[123].mxu1  ;;  %2262 = vmatmul.mubr.f32.gmra.mrb[228].mxu1 %v6067_v8 }
 0x288   :  { %v6143_v53 = vpop.eup %4337  ;;  %v1326_v31 = vadd.f32 %v1325_v30, %v5652_v7  ;;  %2266 = vmatprep.mubr.f32.mxu1 %v6073_v44 }
 0x289   :  { %v6147_v47 = vpop.eup %4339  ;;  %1877 = vmatprep.mubr.f32.mxu0 %v6143_v53 }
 0x28a   :  { %4349 = vtanh.f32 %v1326_v31  ;;  %v1329_v34 = vpop.f32.mrb[124].mxu1  ;;  %1878 = vmatmul.mubr.f32.gmra.mrb[180].mxu0 %v6147_v47 }
 0x28b   :  { %4351 = vtanh.f32 %v1324_v33  ;;  %v1330_v49 = vadd.f32 %v1329_v34, %v5646_v9  ;;  %v1331_v35 = vpop.f32.mrb[125].mxu1  ;;  %2267 = vmatmul.mubr.f32.gmra.mrb[230].mxu1 %v6077_v37 }
 0x28c   :  { %v6153_v45 = vpop.eup %4341  ;;  %v1332_v1 = vadd.f32 %v1331_v35, %v5652_v7  ;;  %2271 = vmatprep.mubr.f32.mxu1 %v6083_v55 }
 0x28d   :  { %v6157_v46 = vpop.eup %4343  ;;  %1882 = vmatprep.mubr.f32.mxu0 %v6153_v45 }
 0x28e   :  { %4353 = vtanh.f32 %v1332_v1  ;;  %v1335_v61 = vpop.f32.mrb[126].mxu1  ;;  %1883 = vmatmul.mubr.f32.gmra.mrb[182].mxu0 %v6157_v46 }
 0x28f   :  { %4355 = vtanh.f32 %v1330_v49  ;;  %v1336_v38 = vadd.f32 %v1335_v61, %v5646_v9  ;;  %v1337_v40 = vpop.f32.mrb[127].mxu1  ;;  %2272 = vmatmul.mubr.f32.gmra.mrb[232].mxu1 %v6087_v63 }
 0x290   :  { %v6163_v10 = vpop.eup %4345  ;;  %v1338_v42 = vadd.f32 %v1337_v40, %v5652_v7  ;;  %2276 = vmatprep.mubr.f32.mxu1 %v6093_v17 }
 0x291   :  { %v6167_v57 = vpop.eup %4347  ;;  %1887 = vmatprep.mubr.f32.mxu0 %v6163_v10 }
 0x292   :  { %4357 = vtanh.f32 %v1338_v42  ;;  %v1341_v43 = vpop.f32.mrb[128].mxu1  ;;  %1888 = vmatmul.mubr.f32.gmra.mrb[184].mxu0 %v6167_v57 }
 0x293   :  { %4359 = vtanh.f32 %v1336_v38  ;;  %v1342_v8 = vadd.f32 %v1341_v43, %v5646_v9  ;;  %v1343_v62 = vpop.f32.mrb[129].mxu1  ;;  %2277 = vmatmul.mubr.f32.gmra.mrb[234].mxu1 %v6097_v59 }
 0x294   :  { %v6173_v50 = vpop.eup %4349  ;;  %v1344_v52 = vadd.f32 %v1343_v62, %v5652_v7  ;;  %2281 = vmatprep.mubr.f32.mxu1 %v6103_v51 }
 0x295   :  { %v6177_v44 = vpop.eup %4351  ;;  %1892 = vmatprep.mubr.f32.mxu0 %v6173_v50 }
 0x296   :  { %4361 = vtanh.f32 %v1344_v52  ;;  %v1347_v19 = vpop.f32.mrb[130].mxu1  ;;  %1893 = vmatmul.mubr.f32.gmra.mrb[186].mxu0 %v6177_v44 }
 0x297   :  { %4363 = vtanh.f32 %v1342_v8  ;;  %v1348_v37 = vadd.f32 %v1347_v19, %v5646_v9  ;;  %v1349_v14 = vpop.f32.mrb[131].mxu1  ;;  %2282 = vmatmul.mubr.f32.gmra.mrb[236].mxu1 %v6107_v2 }
 0x298   :  { %v6183_v41 = vpop.eup %4353  ;;  %v1350_v32 = vadd.f32 %v1349_v14, %v5652_v7  ;;  %2286 = vmatprep.mubr.f32.mxu1 %v6113_v4 }
 0x299   :  { %v6187_v55 = vpop.eup %4355  ;;  %1897 = vmatprep.mubr.f32.mxu0 %v6183_v41 }
 0x29a   :  { %4365 = vtanh.f32 %v1350_v32  ;;  %v1353_v21 = vpop.f32.mrb[132].mxu1  ;;  %1898 = vmatmul.mubr.f32.gmra.mrb[188].mxu0 %v6187_v55 }
 0x29b   :  { %4367 = vtanh.f32 %v1348_v37  ;;  %v1354_v63 = vadd.f32 %v1353_v21, %v5646_v9  ;;  %v1355_v0 = vpop.f32.mrb[133].mxu1  ;;  %2287 = vmatmul.mubr.f32.gmra.mrb[238].mxu1 %v6117_v16 }
 0x29c   :  { %v6193_v48 = vpop.eup %4357  ;;  %v1356_v60 = vadd.f32 %v1355_v0, %v5652_v7  ;;  %2291 = vmatprep.mubr.f32.mxu1 %v6123_v11 }
 0x29d   :  { %v6197_v17 = vpop.eup %4359  ;;  %1902 = vmatprep.mubr.f32.mxu0 %v6193_v48 }
 0x29e   :  { %4369 = vtanh.f32 %v1356_v60  ;;  %v1359_v39 = vpop.f32.mrb[134].mxu1  ;;  %1903 = vmatmul.mubr.f32.gmra.mrb[190].mxu0 %v6197_v17 }
 0x29f   :  { %4371 = vtanh.f32 %v1354_v63  ;;  %v1360_v59 = vadd.f32 %v1359_v39, %v5646_v9  ;;  %v1361_v58 = vpop.f32.mrb[135].mxu1  ;;  %2292 = vmatmul.mubr.f32.gmra.mrb[240].mxu1 %v6127_v3 }
 0x2a0   :  { %v6203_v5 = vpop.eup %4361  ;;  %v1362_v56 = vadd.f32 %v1361_v58, %v5652_v7  ;;  %2296 = vmatprep.mubr.f32.mxu1 %v6133_v25 }
 0x2a1   :  { %v6207_v51 = vpop.eup %4363  ;;  %1907 = vmatprep.mubr.f32.mxu0 %v6203_v5 }
 0x2a2   :  { %4373 = vtanh.f32 %v1362_v56  ;;  %v1365_v27 = vpop.f32.mrb[136].mxu1  ;;  %1908 = vmatmul.mubr.f32.gmra.mrb[192].mxu0 %v6207_v51 }
 0x2a3   :  { %4375 = vtanh.f32 %v1360_v59  ;;  %v1366_v2 = vadd.f32 %v1365_v27, %v5646_v9  ;;  %v1367_v12 = vpop.f32.mrb[137].mxu1  ;;  %2297 = vmatmul.mubr.f32.gmra.mrb[242].mxu1 %v6137_v28 }
 0x2a4   :  { %v6213_v13 = vpop.eup %4365  ;;  %v1368_v15 = vadd.f32 %v1367_v12, %v5652_v7  ;;  %2301 = vmatprep.mubr.f32.mxu1 %v6143_v53 }
 0x2a5   :  { %v6217_v4 = vpop.eup %4367  ;;  %1912 = vmatprep.mubr.f32.mxu0 %v6213_v13 }
 0x2a6   :  { %4377 = vtanh.f32 %v1368_v15  ;;  %v1371_v54 = vpop.f32.mrb[138].mxu1  ;;  %1913 = vmatmul.mubr.f32.gmra.mrb[194].mxu0 %v6217_v4 }
 0x2a7   :  { %4379 = vtanh.f32 %v1366_v2  ;;  %v1372_v16 = vadd.f32 %v1371_v54, %v5646_v9  ;;  %v1373_v22 = vpop.f32.mrb[139].mxu1  ;;  %2302 = vmatmul.mubr.f32.gmra.mrb[244].mxu1 %v6147_v47 }
 0x2a8   :  { %v6223_v18 = vpop.eup %4369  ;;  %v1374_v26 = vadd.f32 %v1373_v22, %v5652_v7  ;;  %2306 = vmatprep.mubr.f32.mxu1 %v6153_v45 }
 0x2a9   :  { %v6227_v11 = vpop.eup %4371  ;;  %1917 = vmatprep.mubr.f32.mxu0 %v6223_v18 }
 0x2aa   :  { %4381 = vtanh.f32 %v1374_v26  ;;  %v1377_v20 = vpop.f32.mrb[140].mxu1  ;;  %1918 = vmatmul.mubr.f32.gmra.mrb[196].mxu0 %v6227_v11 }
 0x2ab   :  { %4383 = vtanh.f32 %v1372_v16  ;;  %v1378_v3 = vadd.f32 %v1377_v20, %v5646_v9  ;;  %v1379_v24 = vpop.f32.mrb[141].mxu1  ;;  %2307 = vmatmul.mubr.f32.gmra.mrb[246].mxu1 %v6157_v46 }
 0x2ac   :  { %v6233_v36 = vpop.eup %4373  ;;  %v1380_v23 = vadd.f32 %v1379_v24, %v5652_v7  ;;  %2311 = vmatprep.mubr.f32.mxu1 %v6163_v10 }
 0x2ad   :  { %v6237_v25 = vpop.eup %4375  ;;  %1922 = vmatprep.mubr.f32.mxu0 %v6233_v36 }
 0x2ae   :  { %4385 = vtanh.f32 %v1380_v23  ;;  %v1383_v6 = vpop.f32.mrb[142].mxu1  ;;  %1923 = vmatmul.mubr.f32.gmra.mrb[198].mxu0 %v6237_v25 }
 0x2af   :  { %4387 = vtanh.f32 %v1378_v3  ;;  %v1384_v28 = vadd.f32 %v1383_v6, %v5646_v9  ;;  %v1385_v29 = vpop.f32.mrb[143].mxu1  ;;  %2312 = vmatmul.mubr.f32.gmra.mrb[248].mxu1 %v6167_v57 }
 0x2b0   :  { %v6243_v33 = vpop.eup %4377  ;;  %v1386_v30 = vadd.f32 %v1385_v29, %v5652_v7  ;;  %2316 = vmatprep.mubr.f32.mxu1 %v6173_v50 }
 0x2b1   :  { %v6247_v53 = vpop.eup %4379  ;;  %1927 = vmatprep.mubr.f32.mxu0 %v6243_v33 }
 0x2b2   :  { %4389 = vtanh.f32 %v1386_v30  ;;  %v1389_v31 = vpop.f32.mrb[144].mxu1  ;;  %1928 = vmatmul.mubr.f32.gmra.mrb[200].mxu0 %v6247_v53 }
 0x2b3   :  { %4391 = vtanh.f32 %v1384_v28  ;;  %v1390_v47 = vadd.f32 %v1389_v31, %v5646_v9  ;;  %v1391_v34 = vpop.f32.mrb[145].mxu1  ;;  %2317 = vmatmul.mubr.f32.gmra.mrb[250].mxu1 %v6177_v44 }
 0x2b4   :  { %v6253_v49 = vpop.eup %4381  ;;  %v1392_v35 = vadd.f32 %v1391_v34, %v5652_v7  ;;  %2321 = vmatprep.mubr.f32.mxu1 %v6183_v41 }
 0x2b5   :  { %v6257_v45 = vpop.eup %4383  ;;  %v6259_v1 = vpop.f32.mrb[96].mxu0  ;;  %1932 = vmatprep.mubr.f32.mxu0 %v6253_v49 }
 0x2b6   :  { %4393 = vtanh.f32 %v1392_v35  ;;  %v1395_v46 = vpop.f32.mrb[146].mxu1  ;;  %v1671_v61 = vpop.f32.mrb[97].mxu0  ;;  %1933 = vmatmul.mubr.f32.gmra.mrb[202].mxu0 %v6257_v45 }
 0x2b7   :  { %4395 = vtanh.f32 %v1390_v47  ;;  %v1396_v38 = vadd.f32 %v1395_v46, %v5646_v9  ;;  %v1397_v40 = vpop.f32.mrb[147].mxu1  ;;  %2322 = vmatmul.mubr.f32.gmra.mrb[252].mxu1 %v6187_v55  ;;  %v6349_v47 = vld [vmem:[%s7367_s8] ss:$0 sm:$0xff] }
 0x2b8   :  { %v6265_v10 = vpop.eup %4385  ;;  %v1398_v42 = vadd.f32 %v1397_v40, %v5652_v7  ;;  %2326 = vmatprep.mubr.f32.mxu1 %v6193_v48 }
 0x2b9   :  { %v6269_v57 = vpop.eup %4387  ;;  %v6271_v43 = vpop.f32.mrb[98].mxu0  ;;  %1937 = vmatprep.mubr.f32.mxu0 %v6265_v10 }
 0x2ba   :  { %4397 = vtanh.f32 %v1398_v42  ;;  %v1401_v8 = vpop.f32.mrb[148].mxu1  ;;  %v1676_v62 = vpop.f32.mrb[99].mxu0  ;;  %1938 = vmatmul.mubr.f32.gmra.mrb[204].mxu0 %v6269_v57 }
 0x2bb   :  { %4399 = vtanh.f32 %v1396_v38  ;;  %v1402_v50 = vadd.f32 %v1401_v8, %v5646_v9  ;;  %v1403_v52 = vpop.f32.mrb[149].mxu1  ;;  %2327 = vmatmul.mubr.f32.gmra.mrb[254].mxu1 %v6197_v17 }
 0x2bc   :  { %v6277_v44 = vpop.eup %4389  ;;  %v1404_v19 = vadd.f32 %v1403_v52, %v5652_v7  ;;  %2331 = vmatprep.mubr.f32.mxu1 %v6203_v5 }
 0x2bd   :  { %v6281_v37 = vpop.eup %4391  ;;  %v6283_v14 = vpop.f32.mrb[100].mxu0  ;;  %1942 = vmatprep.mubr.f32.mxu0 %v6277_v44 }
 0x2be   :  { %4401 = vtanh.f32 %v1404_v19  ;;  %v1407_v41 = vpop.f32.mrb[150].mxu1  ;;  %v1681_v32 = vpop.f32.mrb[101].mxu0  ;;  %1943 = vmatmul.mubr.f32.gmra.mrb[206].mxu0 %v6281_v37 }
 0x2bf   :  { %4403 = vtanh.f32 %v1402_v50  ;;  %v1408_v55 = vadd.f32 %v1407_v41, %v5646_v9  ;;  %v1409_v21 = vpop.f32.mrb[151].mxu1  ;;  %2332 = vmatmul.mubr.f32.gmra.mrb[0].mxu1 %v6207_v51 }
 0x2c0   :  { %v6289_v63 = vpop.eup %4393  ;;  %v1410_v0 = vadd.f32 %v1409_v21, %v5652_v7  ;;  %2336 = vmatprep.mubr.f32.mxu1 %v6213_v13 }
 0x2c1   :  { %v6293_v48 = vpop.eup %4395  ;;  %v6295_v60 = vpop.f32.mrb[102].mxu0  ;;  %1947 = vmatprep.mubr.f32.mxu0 %v6289_v63 }
 0x2c2   :  { %4405 = vtanh.f32 %v1410_v0  ;;  %v1413_v17 = vpop.f32.mrb[152].mxu1  ;;  %v1686_v39 = vpop.f32.mrb[103].mxu0  ;;  %1948 = vmatmul.mubr.f32.gmra.mrb[208].mxu0 %v6293_v48 }
 0x2c3   :  { %4407 = vtanh.f32 %v1408_v55  ;;  %v1414_v59 = vadd.f32 %v1413_v17, %v5646_v9  ;;  %v1415_v58 = vpop.f32.mrb[153].mxu1  ;;  %2337 = vmatmul.mubr.f32.gmra.mrb[2].mxu1 %v6217_v4 }
 0x2c4   :  { %v6301_v5 = vpop.eup %4397  ;;  %v1416_v56 = vadd.f32 %v1415_v58, %v5652_v7  ;;  %2341 = vmatprep.mubr.f32.mxu1 %v6223_v18 }
 0x2c5   :  { %v6305_v51 = vpop.eup %4399  ;;  %v6307_v27 = vpop.f32.mrb[104].mxu0  ;;  %1952 = vmatprep.mubr.f32.mxu0 %v6301_v5 }
 0x2c6   :  { %4409 = vtanh.f32 %v1416_v56  ;;  %v1419_v2 = vpop.f32.mrb[154].mxu1  ;;  %v1691_v12 = vpop.f32.mrb[105].mxu0  ;;  %1953 = vmatmul.mubr.f32.gmra.mrb[210].mxu0 %v6305_v51 }
 0x2c7   :  { %4411 = vtanh.f32 %v1414_v59  ;;  %v1420_v13 = vadd.f32 %v1419_v2, %v5646_v9  ;;  %v1421_v15 = vpop.f32.mrb[155].mxu1  ;;  %2342 = vmatmul.mubr.f32.gmra.mrb[4].mxu1 %v6227_v11 }
 0x2c8   :  { %v6313_v4 = vpop.eup %4401  ;;  %v1422_v54 = vadd.f32 %v1421_v15, %v5652_v7  ;;  %2346 = vmatprep.mubr.f32.mxu1 %v6233_v36 }
 0x2c9   :  { %v6317_v16 = vpop.eup %4403  ;;  %v6319_v22 = vpop.f32.mrb[106].mxu0  ;;  %1957 = vmatprep.mubr.f32.mxu0 %v6313_v4 }
 0x2ca   :  { %4413 = vtanh.f32 %v1422_v54  ;;  %v1425_v18 = vpop.f32.mrb[156].mxu1  ;;  %v1696_v26 = vpop.f32.mrb[107].mxu0  ;;  %1958 = vmatmul.mubr.f32.gmra.mrb[212].mxu0 %v6317_v16 }
 0x2cb   :  { %4415 = vtanh.f32 %v1420_v13  ;;  %v1426_v11 = vadd.f32 %v1425_v18, %v5646_v9  ;;  %v1427_v20 = vpop.f32.mrb[157].mxu1  ;;  %2347 = vmatmul.mubr.f32.gmra.mrb[6].mxu1 %v6237_v25 }
 0x2cc   :  { %v6325_v3 = vpop.eup %4405  ;;  %v1428_v24 = vadd.f32 %v1427_v20, %v5652_v7  ;;  %2351 = vmatprep.mubr.f32.mxu1 %v6243_v33  ;;  %v6342_v33 = vld [vmem:[%s7366_s6] ss:$0 sm:$0xff] }
 0x2cd   :  { %v6329_v36 = vpop.eup %4407  ;;  %v6331_v23 = vpop.f32.mrb[108].mxu0  ;;  %1962 = vmatprep.mubr.f32.mxu0 %v6325_v3  ;;  %v1675_v62 = vadd.f32 %v6342_v33, %v6271_v43  ;;  %v1680_v55 = vadd.f32 %v6342_v33, %v6283_v14  ;;  %v1690_v18 = vadd.f32 %v6342_v33, %v6307_v27  ;;  %v1695_v27 = vadd.f32 %v6342_v33, %v6319_v22 }
 0x2ce   :  { %4417 = vtanh.f32 %v1428_v24  ;;  %v1431_v6 = vpop.f32.mrb[158].mxu1  ;;  %v1701_v28 = vpop.f32.mrb[109].mxu0  ;;  %1963 = vmatmul.mubr.f32.gmra.mrb[214].mxu0 %v6329_v36  ;;  %v1700_v22 = vadd.f32 %v6342_v33, %v6331_v23 }
 0x2cf   :  { %4419 = vtanh.f32 %v1426_v11  ;;  %v1432_v25 = vadd.f32 %v1431_v6, %v5646_v9  ;;  %v1433_v29 = vpop.f32.mrb[159].mxu1  ;;  %2352 = vmatmul.mubr.f32.gmra.mrb[8].mxu1 %v6247_v53 }
 0x2d0   :  { %v6337_v30 = vpop.eup %4409  ;;  %v1434_v31 = vadd.f32 %v1433_v29, %v5652_v7  ;;  %2356 = vmatprep.mubr.f32.mxu1 %v6253_v49  ;;  %v1670_v7 = vadd.f32 %v6342_v33, %v6259_v1 }
 0x2d1   :  { %v6351_v9 = vpop.eup %4411  ;;  %v6353_v34 = vpop.f32.mrb[110].mxu0  ;;  %1967 = vmatprep.mubr.f32.mxu0 %v6337_v30 }
 0x2d2   :  { %4421 = vtanh.f32 %v1434_v31  ;;  %v1706_v53 = vpop.f32.mrb[111].mxu0  ;;  %1968 = vmatmul.mubr.f32.gmra.mrb[216].mxu0 %v6351_v9  ;;  %v2093_v35 = vpop.f32.mrb[160].mxu1  ;;  %v1705_v23 = vadd.f32 %v6342_v33, %v6353_v34 }
 0x2d3   :  { %4423 = vtanh.f32 %v1432_v25  ;;  %v2094_v49 = vadd.f32 %v6349_v47, %v2093_v35  ;;  %v2095_v46 = vpop.f32.mrb[161].mxu1  ;;  %2357 = vmatmul.mubr.f32.gmra.mrb[10].mxu1 %v6257_v45 }
 0x2d4   :  { %v6361_v61 = vpop.eup %4413  ;;  %2361 = vmatprep.mubr.f32.mxu1 %v6265_v10 }
 0x2d5   :  { %v6364_v38 = vpop.eup %4415  ;;  %v6366_v40 = vsub.f32 %v1670_v7, %v2094_v49  ;;  %v6368_v42 = vpop.f32.mrb[112].mxu0  ;;  %1972 = vmatprep.mubr.f32.mxu0 %v6361_v61 }
 0x2d6   :  { %v1711_v8 = vpop.f32.mrb[113].mxu0  ;;  %1973 = vmatmul.mubr.f32.gmra.mrb[218].mxu0 %v6364_v38  ;;  %v2098_v1 = vpop.f32.mrb[162].mxu1  ;;  %v1710_v34 = vadd.f32 %v6342_v33, %v6368_v42 }
 0x2d7   :  { %v2099_v45 = vadd.f32 %v6349_v47, %v2098_v1  ;;  %v2100_v50 = vpop.f32.mrb[163].mxu1  ;;  %2362 = vmatmul.mubr.f32.gmra.mrb[12].mxu1 %v6269_v57  ;;  %v2476_v14 = vmul.f32 %v6366_v40, %v6366_v40 }
 0x2d8   :  { %v6376_v10 = vpop.eup %4417  ;;  %2366 = vmatprep.mubr.f32.mxu1 %v6277_v44 }
 0x2d9   :  { %v6379_v52 = vpop.eup %4419  ;;  %v6381_v19 = vsub.f32 %v1675_v62, %v2099_v45  ;;  %v6383_v41 = vpop.f32.mrb[114].mxu0  ;;  %1977 = vmatprep.mubr.f32.mxu0 %v6376_v10 }
 0x2da   :  { %v1716_v32 = vpop.f32.mrb[115].mxu0  ;;  %1978 = vmatmul.mubr.f32.gmra.mrb[220].mxu0 %v6379_v52  ;;  %v2103_v43 = vpop.f32.mrb[164].mxu1  ;;  %v1715_v42 = vadd.f32 %v6342_v33, %v6383_v41 }
 0x2db   :  { %v2104_v57 = vadd.f32 %v6349_v47, %v2103_v43  ;;  %v2105_v21 = vpop.f32.mrb[165].mxu1  ;;  %2367 = vmatmul.mubr.f32.gmra.mrb[14].mxu1 %v6281_v37  ;;  %v1685_v37 = vadd.f32 %v6342_v33, %v6295_v60  ;;  %v2477_v2 = vmul.f32 %v6381_v19, %v6381_v19 }
 0x2dc   :  { %v6391_v44 = vpop.eup %4421  ;;  %2371 = vmatprep.mubr.f32.mxu1 %v6289_v63 }
 0x2dd   :  { %v6394_v0 = vpop.eup %4423  ;;  %v6396_v17 = vsub.f32 %v1680_v55, %v2104_v57  ;;  %v6398_v39 = vpop.f32.mrb[116].mxu0  ;;  %1982 = vmatprep.mubr.f32.mxu0 %v6391_v44 }
 0x2de   :  { %v1721_v59 = vpop.f32.mrb[117].mxu0  ;;  %1983 = vmatmul.mubr.f32.gmra.mrb[222].mxu0 %v6394_v0  ;;  %v2108_v58 = vpop.f32.mrb[166].mxu1  ;;  %v1720_v41 = vadd.f32 %v6342_v33, %v6398_v39 }
 0x2df   :  { %v2109_v63 = vadd.f32 %v6349_v47, %v2108_v58  ;;  %v2110_v56 = vpop.f32.mrb[167].mxu1  ;;  %2372 = vmatmul.mubr.f32.gmra.mrb[16].mxu1 %v6293_v48  ;;  %3587 = vmatprep.mubr.f32.mxu0 %v2476_v14  ;;  %v2478_v15 = vmul.f32 %v6396_v17, %v6396_v17 }
 0x2e0   :  { %2376 = vmatprep.mubr.f32.mxu1 %v6301_v5 }
 0x2e1   :  { %v6411_v12 = vsub.f32 %v1685_v37, %v2109_v63  ;;  %v6413_v13 = vpop.f32.mrb[118].mxu0 }
 0x2e2   :  { %v1726_v54 = vpop.f32.mrb[119].mxu0  ;;  %v2113_v60 = vpop.f32.mrb[168].mxu1  ;;  %3588 = vmatmul.mubr.f32.vlgmr.msra.gmra.mrb[224].mxu0 %v2477_v2 }
 0x2e3   :  { %v2114_v48 = vadd.f32 %v6349_v47, %v2113_v60  ;;  %v2115_v26 = vpop.f32.mrb[169].mxu1  ;;  %2377 = vmatmul.mubr.f32.gmra.mrb[18].mxu1 %v6305_v51  ;;  %3590 = vmatprep.mubr.f32.mxu0 %v2478_v15  ;;  %v2479_v5 = vmul.f32 %v6411_v12, %v6411_v12 }
 0x2e4   :  { %2381 = vmatprep.mubr.f32.mxu1 %v6313_v4 }
 0x2e5   :  { %v6424_v11 = vsub.f32 %v1690_v18, %v2114_v48  ;;  %v6426_v20 = vpop.f32.mrb[120].mxu0  ;;  %v1725_v48 = vadd.f32 %v6342_v33, %v6413_v13 }
 0x2e6   :  { %v1731_v24 = vpop.f32.mrb[121].mxu0  ;;  %v2118_v6 = vpop.f32.mrb[170].mxu1  ;;  %3591 = vmatmul.mubr.f32.gmra.mrb[226].mxu0 %v2479_v5 }
 0x2e7   :  { %v2119_v28 = vadd.f32 %v6349_v47, %v2118_v6  ;;  %v2120_v25 = vpop.f32.mrb[171].mxu1  ;;  %2382 = vmatmul.mubr.f32.gmra.mrb[20].mxu1 %v6317_v16  ;;  %v2480_v51 = vmul.f32 %v6424_v11, %v6424_v11 }
 0x2e8   :  { %2386 = vmatprep.mubr.f32.mxu1 %v6325_v3 }
 0x2e9   :  { %v6435_v4 = vsub.f32 %v1695_v27, %v2119_v28  ;;  %v6437_v29 = vpop.f32.mrb[122].mxu0  ;;  %3593 = vmatprep.mubr.f32.mxu0 %v2480_v51  ;;  %v1730_v28 = vadd.f32 %v6342_v33, %v6426_v20 }
 0x2ea   :  { %v1736_v31 = vpop.f32.mrb[123].mxu0  ;;  %v2123_v53 = vpop.f32.mrb[172].mxu1 }
 0x2eb   :  { %v2124_v35 = vadd.f32 %v6349_v47, %v2123_v53  ;;  %v2125_v7 = vpop.f32.mrb[173].mxu1  ;;  %2387 = vmatmul.mubr.f32.gmra.mrb[22].mxu1 %v6329_v36  ;;  %v2481_v16 = vmul.f32 %v6435_v4, %v6435_v4 }
 0x2ec   :  { %2391 = vmatprep.mubr.f32.mxu1 %v6337_v30  ;;  %v1735_v7 = vadd.f32 %v6342_v33, %v6437_v29 }
 0x2ed   :  { %v6446_v3 = vsub.f32 %v1700_v22, %v2124_v35  ;;  %v6448_v49 = vpop.f32.mrb[124].mxu0  ;;  %3594 = vmatmul.mubr.f32.gmra.mrb[228].mxu0 %v2481_v16 }
 0x2ee   :  { %v1741_v46 = vpop.f32.mrb[125].mxu0  ;;  %v2128_v8 = vpop.f32.mrb[174].mxu1 }
 0x2ef   :  { %v2129_v1 = vadd.f32 %v6349_v47, %v2128_v8  ;;  %v2130_v62 = vpop.f32.mrb[175].mxu1  ;;  %2392 = vmatmul.mubr.f32.gmra.mrb[24].mxu1 %v6351_v9  ;;  %v2482_v36 = vmul.f32 %v6446_v3, %v6446_v3 }
 0x2f0   :  { %2396 = vmatprep.mubr.f32.mxu1 %v6361_v61 }
 0x2f1   :  { %v6457_v30 = vsub.f32 %v1705_v23, %v2129_v1  ;;  %v6459_v45 = vpop.f32.mrb[126].mxu0  ;;  %3596 = vmatprep.mubr.f32.mxu0 %v2482_v36  ;;  %v1740_v36 = vadd.f32 %v6342_v33, %v6448_v49 }
 0x2f2   :  { %v1746_v50 = vpop.f32.mrb[127].mxu0  ;;  %v2133_v32 = vpop.f32.mrb[176].mxu1 }
 0x2f3   :  { %v2134_v43 = vadd.f32 %v6349_v47, %v2133_v32  ;;  %v2135_v55 = vpop.f32.mrb[177].mxu1  ;;  %2397 = vmatmul.mubr.f32.gmra.mrb[26].mxu1 %v6364_v38  ;;  %v2483_v9 = vmul.f32 %v6457_v30, %v6457_v30 }
 0x2f4   :  { %2401 = vmatprep.mubr.f32.mxu1 %v6376_v10 }
 0x2f5   :  { %v6468_v61 = vsub.f32 %v1710_v34, %v2134_v43  ;;  %v6470_v57 = vpop.f32.mrb[128].mxu0  ;;  %3597 = vmatmul.mubr.f32.gmra.mrb[230].mxu0 %v2483_v9 }
 0x2f6   :  { %v1751_v21 = vpop.f32.mrb[129].mxu0  ;;  %v2138_v14 = vpop.f32.mrb[178].mxu1 }
 0x2f7   :  { %v2139_v59 = vadd.f32 %v6349_v47, %v2138_v14  ;;  %v2140_v58 = vpop.f32.mrb[179].mxu1  ;;  %2402 = vmatmul.mubr.f32.gmra.mrb[28].mxu1 %v6379_v52  ;;  %v2484_v38 = vmul.f32 %v6468_v61, %v6468_v61  ;;  %v1745_v21 = vadd.f32 %v6342_v33, %v6459_v45 }
 0x2f8   :  { %2406 = vmatprep.mubr.f32.mxu1 %v6391_v44 }
 0x2f9   :  { %v6479_v10 = vsub.f32 %v1715_v42, %v2139_v59  ;;  %v6481_v37 = vpop.f32.mrb[130].mxu0  ;;  %3599 = vmatprep.mubr.f32.mxu0 %v2484_v38 }
 0x2fa   :  { %v1756_v63 = vpop.f32.mrb[131].mxu0  ;;  %v2143_v56 = vpop.f32.mrb[180].mxu1 }
 0x2fb   :  { %v2144_v2 = vadd.f32 %v6349_v47, %v2143_v56  ;;  %v2145_v15 = vpop.f32.mrb[181].mxu1  ;;  %2407 = vmatmul.mubr.f32.gmra.mrb[30].mxu1 %v6394_v0  ;;  %v2485_v52 = vmul.f32 %v6479_v10, %v6479_v10  ;;  %v1750_v56 = vadd.f32 %v6342_v33, %v6470_v57 }
 0x2fd   :  { %v6489_v54 = vsub.f32 %v1720_v41, %v2144_v2  ;;  %v6491_v44 = vpop.f32.mrb[132].mxu0  ;;  %3600 = vmatmul.mubr.f32.gmra.mrb[232].mxu0 %v2485_v52 }
 0x2fe   :  { %v1761_v60 = vpop.f32.mrb[133].mxu0  ;;  %v2148_v18 = vpop.f32.mrb[182].mxu1 }
 0x2ff   :  { %v2149_v39 = vadd.f32 %v6349_v47, %v2148_v18  ;;  %v2150_v26 = vpop.f32.mrb[183].mxu1  ;;  %v2486_v5 = vmul.f32 %v6489_v54, %v6489_v54 }
 0x301   :  { %v6498_v0 = vsub.f32 %v1725_v48, %v2149_v39  ;;  %v6500_v24 = vpop.f32.mrb[134].mxu0  ;;  %3602 = vmatprep.mubr.f32.mxu0 %v2486_v5  ;;  %v1755_v48 = vadd.f32 %v6342_v33, %v6481_v37 }
 0x302   :  { %v1766_v6 = vpop.f32.mrb[135].mxu0  ;;  %v2153_v27 = vpop.f32.mrb[184].mxu1 }
 0x303   :  { %v2154_v25 = vadd.f32 %v6349_v47, %v2153_v27  ;;  %v2155_v51 = vpop.f32.mrb[185].mxu1  ;;  %v2487_v13 = vmul.f32 %v6498_v0, %v6498_v0 }
 0x305   :  { %v6507_v31 = vsub.f32 %v1730_v28, %v2154_v25  ;;  %v6509_v53 = vpop.f32.mrb[136].mxu0  ;;  %3603 = vmatmul.mubr.f32.gmra.mrb[234].mxu0 %v2487_v13  ;;  %v1760_v25 = vadd.f32 %v6342_v33, %v6491_v44 }
 0x306   :  { %v1771_v22 = vpop.f32.mrb[137].mxu0  ;;  %v2158_v35 = vpop.f32.mrb[186].mxu1 }
 0x307   :  { %v2159_v16 = vadd.f32 %v6349_v47, %v2158_v35  ;;  %v2160_v46 = vpop.f32.mrb[187].mxu1  ;;  %v2488_v20 = vmul.f32 %v6507_v31, %v6507_v31 }
 0x308   :  { %v1765_v46 = vadd.f32 %v6342_v33, %v6500_v24 }
 0x309   :  { %v6516_v8 = vsub.f32 %v1735_v7, %v2159_v16  ;;  %v6518_v23 = vpop.f32.mrb[138].mxu0  ;;  %3605 = vmatprep.mubr.f32.mxu0 %v2488_v20 }
 0x30a   :  { %v1776_v1 = vpop.f32.mrb[139].mxu0  ;;  %v2163_v62 = vpop.f32.mrb[188].mxu1 }
 0x30b   :  { %v2164_v50 = vadd.f32 %v6349_v47, %v2163_v62  ;;  %v2165_v32 = vpop.f32.mrb[189].mxu1  ;;  %v2489_v29 = vmul.f32 %v6516_v8, %v6516_v8 }
 0x30d   :  { %v6525_v34 = vsub.f32 %v1740_v36, %v2164_v50  ;;  %v6527_v43 = vpop.f32.mrb[140].mxu0  ;;  %3606 = vmatmul.mubr.f32.gmra.mrb[236].mxu0 %v2489_v29  ;;  %v1770_v29 = vadd.f32 %v6342_v33, %v6509_v53 }
 0x30e   :  { %v1781_v55 = vpop.f32.mrb[141].mxu0  ;;  %v2168_v9 = vpop.f32.mrb[190].mxu1 }
 0x30f   :  { %v2169_v14 = vadd.f32 %v6349_v47, %v2168_v9  ;;  %v2170_v42 = vpop.f32.mrb[191].mxu1  ;;  %v2490_v49 = vmul.f32 %v6525_v34, %v6525_v34 }
 0x311   :  { %v6534_v59 = vsub.f32 %v1745_v21, %v2169_v14  ;;  %v6536_v58 = vpop.f32.mrb[142].mxu0  ;;  %3608 = vmatprep.mubr.f32.mxu0 %v2490_v49 }
 0x312   :  { %v1786_v38 = vpop.f32.mrb[143].mxu0  ;;  %v2173_v63 = vpop.f32.mrb[192].mxu1 }
 0x313   :  { %v2174_v41 = vadd.f32 %v6349_v47, %v2173_v63  ;;  %v2175_v2 = vpop.f32.mrb[193].mxu1  ;;  %v2491_v45 = vmul.f32 %v6534_v59, %v6534_v59  ;;  %v1775_v38 = vadd.f32 %v6342_v33, %v6518_v23 }
 0x315   :  { %v6543_v15 = vsub.f32 %v1750_v56, %v2174_v41  ;;  %v6545_v52 = vpop.f32.mrb[144].mxu0  ;;  %3609 = vmatmul.mubr.f32.gmra.mrb[238].mxu0 %v2491_v45 }
 0x316   :  { %v1791_v60 = vpop.f32.mrb[145].mxu0  ;;  %v2178_v18 = vpop.f32.mrb[194].mxu1 }
 0x317   :  { %v2179_v39 = vadd.f32 %v6349_v47, %v2178_v18  ;;  %v2180_v26 = vpop.f32.mrb[195].mxu1  ;;  %v2492_v57 = vmul.f32 %v6543_v15, %v6543_v15  ;;  %v1780_v18 = vadd.f32 %v6342_v33, %v6527_v43 }
 0x319   :  { %v6552_v5 = vsub.f32 %v1755_v48, %v2179_v39  ;;  %v6554_v6 = vpop.f32.mrb[146].mxu0  ;;  %3611 = vmatprep.mubr.f32.mxu0 %v2492_v57 }
 0x31a   :  { %v1796_v27 = vpop.f32.mrb[147].mxu0  ;;  %v2183_v28 = vpop.f32.mrb[196].mxu1 }
 0x31b   :  { %v2184_v51 = vadd.f32 %v6349_v47, %v2183_v28  ;;  %v2185_v13 = vpop.f32.mrb[197].mxu1  ;;  %v2493_v37 = vmul.f32 %v6552_v5, %v6552_v5 }
 0x31d   :  { %v6561_v22 = vsub.f32 %v1760_v25, %v2184_v51  ;;  %v6563_v35 = vpop.f32.mrb[148].mxu0  ;;  %3612 = vmatmul.mubr.f32.gmra.mrb[240].mxu0 %v2493_v37  ;;  %v1785_v25 = vadd.f32 %v6342_v33, %v6536_v58 }
 0x31e   :  { %v1801_v7 = vpop.f32.mrb[149].mxu0  ;;  %v2188_v16 = vpop.f32.mrb[198].mxu1 }
 0x31f   :  { %v2189_v20 = vadd.f32 %v6349_v47, %v2188_v16  ;;  %v2190_v1 = vpop.f32.mrb[199].mxu1  ;;  %v2494_v44 = vmul.f32 %v6561_v22, %v6561_v22 }
 0x321   :  { %v6570_v62 = vsub.f32 %v1765_v46, %v2189_v20  ;;  %v6572_v36 = vpop.f32.mrb[150].mxu0  ;;  %3614 = vmatprep.mubr.f32.mxu0 %v2494_v44  ;;  %v1790_v20 = vadd.f32 %v6342_v33, %v6545_v52 }
 0x322   :  { %v1806_v50 = vpop.f32.mrb[151].mxu0  ;;  %v2193_v32 = vpop.f32.mrb[200].mxu1 }
 0x323   :  { %v2194_v55 = vadd.f32 %v6349_v47, %v2193_v32  ;;  %v2195_v9 = vpop.f32.mrb[201].mxu1  ;;  %v2495_v24 = vmul.f32 %v6570_v62, %v6570_v62 }
 0x324   :  { %v1795_v9 = vadd.f32 %v6342_v33, %v6554_v6 }
 0x325   :  { %v6579_v21 = vsub.f32 %v1770_v29, %v2194_v55  ;;  %v6581_v14 = vpop.f32.mrb[152].mxu0  ;;  %3615 = vmatmul.mubr.f32.gmra.mrb[242].mxu0 %v2495_v24 }
 0x326   :  { %v1811_v42 = vpop.f32.mrb[153].mxu0  ;;  %v2198_v49 = vpop.f32.mrb[202].mxu1 }
 0x327   :  { %v2199_v63 = vadd.f32 %v6349_v47, %v2198_v49  ;;  %v2200_v56 = vpop.f32.mrb[203].mxu1  ;;  %v2496_v53 = vmul.f32 %v6579_v21, %v6579_v21 }
 0x329   :  { %v6588_v41 = vsub.f32 %v1775_v38, %v2199_v63  ;;  %v6590_v2 = vpop.f32.mrb[154].mxu0  ;;  %3617 = vmatprep.mubr.f32.mxu0 %v2496_v53  ;;  %v1800_v53 = vadd.f32 %v6342_v33, %v6563_v35 }
 0x32a   :  { %v1816_v45 = vpop.f32.mrb[155].mxu0  ;;  %v2203_v60 = vpop.f32.mrb[204].mxu1 }
 0x32b   :  { %v2204_v48 = vadd.f32 %v6349_v47, %v2203_v60  ;;  %v2205_v39 = vpop.f32.mrb[205].mxu1  ;;  %v2497_v23 = vmul.f32 %v6588_v41, %v6588_v41 }
 0x32d   :  { %v6597_v26 = vsub.f32 %v1780_v18, %v2204_v48  ;;  %v6599_v57 = vpop.f32.mrb[156].mxu0  ;;  %3618 = vmatmul.mubr.f32.gmra.mrb[244].mxu0 %v2497_v23 }
 0x32e   :  { %v1821_v27 = vpop.f32.mrb[157].mxu0  ;;  %v2208_v28 = vpop.f32.mrb[206].mxu1 }
 0x32f   :  { %v2209_v51 = vadd.f32 %v6349_v47, %v2208_v28  ;;  %v2210_v13 = vpop.f32.mrb[207].mxu1  ;;  %v2498_v43 = vmul.f32 %v6597_v26, %v6597_v26  ;;  %v1805_v27 = vadd.f32 %v6342_v33, %v6572_v36 }
 0x331   :  { %v6606_v37 = vsub.f32 %v1785_v25, %v2209_v51  ;;  %v6608_v7 = vpop.f32.mrb[158].mxu0  ;;  %3620 = vmatprep.mubr.f32.mxu0 %v2498_v43 }
 0x332   :  { %v1826_v16 = vpop.f32.mrb[159].mxu0  ;;  %v2213_v46 = vpop.f32.mrb[208].mxu1 }
 0x333   :  { %v2214_v1 = vadd.f32 %v6349_v47, %v2213_v46  ;;  %v2215_v44 = vpop.f32.mrb[209].mxu1  ;;  %v2499_v58 = vmul.f32 %v6606_v37, %v6606_v37  ;;  %v1810_v46 = vadd.f32 %v6342_v33, %v6581_v14 }
 0x335   :  { %v6615_v50 = vsub.f32 %v1790_v20, %v2214_v1  ;;  %v6617_v32 = vpop.f32.mrb[160].mxu0  ;;  %3621 = vmatmul.mubr.f32.gmra.mrb[246].mxu0 %v2499_v58 }
 0x336   :  { %v1831_v29 = vpop.f32.mrb[161].mxu0  ;;  %v2218_v55 = vpop.f32.mrb[210].mxu1 }
 0x337   :  { %v2219_v24 = vadd.f32 %v6349_v47, %v2218_v55  ;;  %v2220_v42 = vpop.f32.mrb[211].mxu1  ;;  %v2500_v52 = vmul.f32 %v6615_v50, %v6615_v50 }
 0x339   :  { %v6624_v49 = vsub.f32 %v1795_v9, %v2219_v24  ;;  %v6626_v38 = vpop.f32.mrb[162].mxu0  ;;  %3623 = vmatprep.mubr.f32.mxu0 %v2500_v52  ;;  %v1815_v9 = vadd.f32 %v6342_v33, %v6590_v2 }
 0x33a   :  { %v1836_v63 = vpop.f32.mrb[163].mxu0  ;;  %v2223_v56 = vpop.f32.mrb[212].mxu1 }
 0x33b   :  { %v2224_v45 = vadd.f32 %v6349_v47, %v2223_v56  ;;  %v2225_v60 = vpop.f32.mrb[213].mxu1  ;;  %v2501_v6 = vmul.f32 %v6624_v49, %v6624_v49 }
 0x33d   :  { %v6633_v18 = vsub.f32 %v1800_v53, %v2224_v45  ;;  %v6635_v48 = vpop.f32.mrb[164].mxu0  ;;  %3624 = vmatmul.mubr.f32.gmra.mrb[248].mxu0 %v2501_v6  ;;  %v1820_v45 = vadd.f32 %v6342_v33, %v6599_v57 }
 0x33e   :  { %v1841_v39 = vpop.f32.mrb[165].mxu0  ;;  %v2228_v23 = vpop.f32.mrb[214].mxu1 }
 0x33f   :  { %v2229_v28 = vadd.f32 %v6349_v47, %v2228_v23  ;;  %v2230_v25 = vpop.f32.mrb[215].mxu1  ;;  %v2502_v35 = vmul.f32 %v6633_v18, %v6633_v18 }
 0x340   :  { %v1825_v25 = vadd.f32 %v6342_v33, %v6608_v7 }
 0x341   :  { %v6642_v51 = vsub.f32 %v1805_v27, %v2229_v28  ;;  %v6644_v13 = vpop.f32.mrb[166].mxu0  ;;  %3626 = vmatprep.mubr.f32.mxu0 %v2502_v35 }
 0x342   :  { %v1846_v43 = vpop.f32.mrb[167].mxu0  ;;  %v2233_v16 = vpop.f32.mrb[216].mxu1 }
 0x343   :  { %v2234_v20 = vadd.f32 %v6349_v47, %v2233_v16  ;;  %v2235_v1 = vpop.f32.mrb[217].mxu1  ;;  %v2503_v36 = vmul.f32 %v6642_v51, %v6642_v51 }
 0x345   :  { %v6651_v44 = vsub.f32 %v1810_v46, %v2234_v20  ;;  %v6653_v58 = vpop.f32.mrb[168].mxu0  ;;  %3627 = vmatmul.mubr.f32.gmra.mrb[250].mxu0 %v2503_v36  ;;  %v1830_v36 = vadd.f32 %v6342_v33, %v6617_v32 }
 0x346   :  { %v1851_v29 = vpop.f32.mrb[169].mxu0  ;;  %v2238_v55 = vpop.f32.mrb[218].mxu1 }
 0x347   :  { %v2239_v24 = vadd.f32 %v6349_v47, %v2238_v55  ;;  %v2240_v42 = vpop.f32.mrb[219].mxu1  ;;  %v2504_v14 = vmul.f32 %v6651_v44, %v6651_v44 }
 0x349   :  { %v6660_v52 = vsub.f32 %v1815_v9, %v2239_v24  ;;  %v6662_v63 = vpop.f32.mrb[170].mxu0  ;;  %3629 = vmatprep.mubr.f32.mxu0 %v2504_v14 }
 0x34a   :  { %v1856_v56 = vpop.f32.mrb[171].mxu0  ;;  %v2243_v53 = vpop.f32.mrb[220].mxu1 }
 0x34b   :  { %v2244_v60 = vadd.f32 %v6349_v47, %v2243_v53  ;;  %v2245_v6 = vpop.f32.mrb[221].mxu1  ;;  %v2505_v2 = vmul.f32 %v6660_v52, %v6660_v52  ;;  %v1835_v56 = vadd.f32 %v6342_v33, %v6626_v38 }
 0x34d   :  { %v6669_v39 = vsub.f32 %v1820_v45, %v2244_v60  ;;  %v6671_v23 = vpop.f32.mrb[172].mxu0  ;;  %3630 = vmatmul.mubr.f32.gmra.mrb[252].mxu0 %v2505_v2 }
 0x34e   :  { %v1861_v27 = vpop.f32.mrb[173].mxu0  ;;  %v2248_v28 = vpop.f32.mrb[222].mxu1 }
 0x34f   :  { %v2249_v35 = vadd.f32 %v6349_v47, %v2248_v28  ;;  %v2250_v43 = vpop.f32.mrb[223].mxu1  ;;  %v2506_v57 = vmul.f32 %v6669_v39, %v6669_v39  ;;  %v1840_v28 = vadd.f32 %v6342_v33, %v6635_v48 }
 0x351   :  { %v6678_v16 = vsub.f32 %v1825_v25, %v2249_v35  ;;  %v6680_v46 = vpop.f32.mrb[174].mxu0  ;;  %3632 = vmatprep.mubr.f32.mxu0 %v2506_v57 }
 0x352   :  { %v1866_v20 = vpop.f32.mrb[175].mxu0  ;;  %v2253_v1 = vpop.f32.mrb[224].mxu1 }
 0x353   :  { %v2254_v29 = vadd.f32 %v6349_v47, %v2253_v1  ;;  %v2255_v55 = vpop.f32.mrb[225].mxu1  ;;  %v2507_v7 = vmul.f32 %v6678_v16, %v6678_v16 }
 0x355   :  { %v6687_v9 = vsub.f32 %v1830_v36, %v2254_v29  ;;  %v6689_v24 = vpop.f32.mrb[176].mxu0  ;;  %3633 = vmatmul.mubr.f32.gmra.mrb[254].mxu0 %v2507_v7  ;;  %v1845_v36 = vadd.f32 %v6342_v33, %v6644_v13 }
 0x356   :  { %v1871_v42 = vpop.f32.mrb[177].mxu0  ;;  %v2258_v14 = vpop.f32.mrb[226].mxu1 }
 0x357   :  { %v2259_v53 = vadd.f32 %v6349_v47, %v2258_v14  ;;  %v2260_v45 = vpop.f32.mrb[227].mxu1  ;;  %v2508_v32 = vmul.f32 %v6687_v9, %v6687_v9 }
 0x359   :  { %v6696_v60 = vsub.f32 %v1835_v56, %v2259_v53  ;;  %v6698_v6 = vpop.f32.mrb[178].mxu0  ;;  %3635 = vmatprep.mubr.f32.mxu0 %v2508_v32  ;;  %v1850_v53 = vadd.f32 %v6342_v33, %v6653_v58 }
 0x35a   :  { %v1876_v2 = vpop.f32.mrb[179].mxu0  ;;  %v2263_v27 = vpop.f32.mrb[228].mxu1 }
 0x35b   :  { %v2509_v25 = vmul.f32 %v6696_v60, %v6696_v60  ;;  %v2264_v38 = vadd.f32 %v6349_v47, %v2263_v27  ;;  %v2265_v35 = vpop.f32.mrb[229].mxu1 }
 0x35d   :  { %v6705_v43 = vsub.f32 %v1840_v28, %v2264_v38  ;;  %v6707_v57 = vpop.f32.mrb[180].mxu0  ;;  %3636 = vmatmul.mubr.f32.gmra.mrb[0].mxu0 %v2509_v25  ;;  %v1855_v38 = vadd.f32 %v6342_v33, %v6662_v63 }
 0x35e   :  { %v1881_v20 = vpop.f32.mrb[181].mxu0  ;;  %v2268_v1 = vpop.f32.mrb[230].mxu1 }
 0x35f   :  { %v2269_v29 = vadd.f32 %v6349_v47, %v2268_v1  ;;  %v2270_v55 = vpop.f32.mrb[231].mxu1  ;;  %v2510_v48 = vmul.f32 %v6705_v43, %v6705_v43 }
 0x361   :  { %v6714_v7 = vsub.f32 %v1845_v36, %v2269_v29  ;;  %v6716_v42 = vpop.f32.mrb[182].mxu0  ;;  %3638 = vmatprep.mubr.f32.mxu0 %v2510_v48  ;;  %v1860_v48 = vadd.f32 %v6342_v33, %v6671_v23 }
 0x362   :  { %v1886_v14 = vpop.f32.mrb[183].mxu0  ;;  %v2273_v56 = vpop.f32.mrb[232].mxu1 }
 0x363   :  { %v2511_v45 = vmul.f32 %v6714_v7, %v6714_v7  ;;  %v2274_v13 = vadd.f32 %v6349_v47, %v2273_v56  ;;  %v2275_v32 = vpop.f32.mrb[233].mxu1 }
 0x365   :  { %v6723_v2 = vsub.f32 %v1850_v53, %v2274_v13  ;;  %v6725_v27 = vpop.f32.mrb[184].mxu0  ;;  %3639 = vmatmul.mubr.f32.gmra.mrb[2].mxu0 %v2511_v45 }
 0x366   :  { %v1891_v28 = vpop.f32.mrb[185].mxu0  ;;  %v2278_v25 = vpop.f32.mrb[234].mxu1 }
 0x367   :  { %v2279_v35 = vadd.f32 %v6349_v47, %v2278_v25  ;;  %v2280_v20 = vpop.f32.mrb[235].mxu1  ;;  %v2512_v58 = vmul.f32 %v6723_v2, %v6723_v2  ;;  %v1865_v28 = vadd.f32 %v6342_v33, %v6680_v46 }
 0x369   :  { %v6732_v1 = vsub.f32 %v1855_v38, %v2279_v35  ;;  %v6734_v36 = vpop.f32.mrb[186].mxu0  ;;  %3641 = vmatprep.mubr.f32.mxu0 %v2512_v58 }
 0x36a   :  { %v1896_v29 = vpop.f32.mrb[187].mxu0  ;;  %v2283_v55 = vpop.f32.mrb[236].mxu1 }
 0x36b   :  { %v2513_v14 = vmul.f32 %v6732_v1, %v6732_v1  ;;  %v2284_v63 = vadd.f32 %v6349_v47, %v2283_v55  ;;  %v2285_v56 = vpop.f32.mrb[237].mxu1  ;;  %v1870_v55 = vadd.f32 %v6342_v33, %v6689_v24 }
 0x36d   :  { %v6741_v53 = vsub.f32 %v1860_v48, %v2284_v63  ;;  %v6743_v45 = vpop.f32.mrb[188].mxu0  ;;  %3642 = vmatmul.mubr.f32.gmra.mrb[4].mxu0 %v2513_v14 }
 0x36e   :  { %v1901_v13 = vpop.f32.mrb[189].mxu0  ;;  %v2288_v32 = vpop.f32.mrb[238].mxu1 }
 0x36f   :  { %7390 = vst [vmem:[#allocation2_spill] sm:$0xff] %v6741_v53  ;;  %v2289_v25 = vadd.f32 %v6349_v47, %v2288_v32  ;;  %v2290_v38 = vpop.f32.mrb[239].mxu1  ;;  %v2514_v23 = vmul.f32 %v6741_v53, %v6741_v53 }
 0x371   :  { %v6750_v35 = vsub.f32 %v1865_v28, %v2289_v25  ;;  %v6752_v20 = vpop.f32.mrb[190].mxu0  ;;  %3644 = vmatprep.mubr.f32.mxu0 %v2514_v23  ;;  %v1875_v28 = vadd.f32 %v6342_v33, %v6698_v6 }
 0x372   :  { %v1906_v58 = vpop.f32.mrb[191].mxu0  ;;  %v2293_v29 = vpop.f32.mrb[240].mxu1 }
 0x373   :  { %v2515_v48 = vmul.f32 %v6750_v35, %v6750_v35  ;;  %v2294_v46 = vadd.f32 %v6349_v47, %v2293_v29  ;;  %v2295_v14 = vpop.f32.mrb[241].mxu1 }
 0x375   :  { %v6759_v63 = vsub.f32 %v1870_v55, %v2294_v46  ;;  %v6761_v56 = vpop.f32.mrb[192].mxu0  ;;  %3645 = vmatmul.mubr.f32.gmra.mrb[6].mxu0 %v2515_v48  ;;  %v1880_v48 = vadd.f32 %v6342_v33, %v6707_v57 }
 0x376   :  { %v1911_v13 = vpop.f32.mrb[193].mxu0  ;;  %v2298_v32 = vpop.f32.mrb[242].mxu1 }
 0x377   :  { %7391 = vst [vmem:[#allocation3_spill] sm:$0xff] %v6759_v63  ;;  %v2299_v25 = vadd.f32 %v6349_v47, %v2298_v32  ;;  %v2300_v38 = vpop.f32.mrb[243].mxu1  ;;  %v2516_v24 = vmul.f32 %v6759_v63, %v6759_v63 }
 0x378   :  { %v1885_v38 = vadd.f32 %v6342_v33, %v6716_v42 }
 0x379   :  { %v6768_v23 = vsub.f32 %v1875_v28, %v2299_v25  ;;  %v6770_v58 = vpop.f32.mrb[194].mxu0  ;;  %3647 = vmatprep.mubr.f32.mxu0 %v2516_v24 }
 0x37a   :  { %v1916_v29 = vpop.f32.mrb[195].mxu0  ;;  %v2303_v55 = vpop.f32.mrb[244].mxu1 }
 0x37b   :  { %7392 = vst [vmem:[#allocation4_spill] sm:$0xff] %v6768_v23  ;;  %v2517_v46 = vmul.f32 %v6768_v23, %v6768_v23  ;;  %v2304_v6 = vadd.f32 %v6349_v47, %v2303_v55  ;;  %v2305_v14 = vpop.f32.mrb[245].mxu1 }
 0x37d   :  { %v6777_v13 = vsub.f32 %v1880_v48, %v2304_v6  ;;  %v6779_v32 = vpop.f32.mrb[196].mxu0  ;;  %3648 = vmatmul.mubr.f32.gmra.mrb[8].mxu0 %v2517_v46  ;;  %v1890_v46 = vadd.f32 %v6342_v33, %v6725_v27 }
 0x37e   :  { %v1921_v28 = vpop.f32.mrb[197].mxu0  ;;  %v2308_v25 = vpop.f32.mrb[246].mxu1 }
 0x37f   :  { %7393 = vst [vmem:[#allocation5_spill] sm:$0xff] %v6777_v13  ;;  %v2309_v24 = vadd.f32 %v6349_v47, %v2308_v25  ;;  %v2310_v29 = vpop.f32.mrb[247].mxu1  ;;  %v2518_v57 = vmul.f32 %v6777_v13, %v6777_v13 }
 0x381   :  { %v6786_v63 = vsub.f32 %v1885_v38, %v2309_v24  ;;  %v6788_v55 = vpop.f32.mrb[198].mxu0  ;;  %3650 = vmatprep.mubr.f32.mxu0 %v2518_v57  ;;  %v1895_v57 = vadd.f32 %v6342_v33, %v6734_v36 }
 0x382   :  { %v1926_v48 = vpop.f32.mrb[199].mxu0  ;;  %v2313_v6 = vpop.f32.mrb[248].mxu1 }
 0x383   :  { %7394 = vst [vmem:[#allocation6_spill] sm:$0xff] %v6786_v63  ;;  %v2519_v14 = vmul.f32 %v6786_v63, %v6786_v63  ;;  %v2314_v42 = vadd.f32 %v6349_v47, %v2313_v6  ;;  %v2315_v28 = vpop.f32.mrb[249].mxu1 }
 0x385   :  { %v6795_v25 = vsub.f32 %v1890_v46, %v2314_v42  ;;  %v6797_v29 = vpop.f32.mrb[200].mxu0  ;;  %3651 = vmatmul.mubr.f32.gmra.mrb[10].mxu0 %v2519_v14  ;;  %v1900_v14 = vadd.f32 %v6342_v33, %v6743_v45 }
 0x386   :  { %v1931_v38 = vpop.f32.mrb[201].mxu0  ;;  %v2318_v24 = vpop.f32.mrb[250].mxu1 }
 0x387   :  { %7395 = vst [vmem:[#allocation7_spill] sm:$0xff] %v6795_v25  ;;  %v2319_v48 = vadd.f32 %v6349_v47, %v2318_v24  ;;  %v2320_v13 = vpop.f32.mrb[251].mxu1  ;;  %v2520_v27 = vmul.f32 %v6795_v25, %v6795_v25 }
 0x389   :  { %v6804_v63 = vsub.f32 %v1895_v57, %v2319_v48  ;;  %v6806_v6 = vpop.f32.mrb[202].mxu0  ;;  %3653 = vmatprep.mubr.f32.mxu0 %v2520_v27  ;;  %v1905_v27 = vadd.f32 %v6342_v33, %v6752_v20 }
 0x38a   :  { %v1936_v46 = vpop.f32.mrb[203].mxu0  ;;  %v2323_v42 = vpop.f32.mrb[252].mxu1 }
 0x38b   :  { %7396 = vst [vmem:[#allocation8_spill] sm:$0xff] %v6804_v63  ;;  %v2521_v28 = vmul.f32 %v6804_v63, %v6804_v63  ;;  %v2324_v36 = vadd.f32 %v6349_v47, %v2323_v42  ;;  %v2325_v38 = vpop.f32.mrb[253].mxu1 }
 0x38d   :  { %v6813_v13 = vsub.f32 %v1900_v14, %v2324_v36  ;;  %v6815_v24 = vpop.f32.mrb[204].mxu0  ;;  %3654 = vmatmul.mubr.f32.gmra.mrb[12].mxu0 %v2521_v28  ;;  %v1910_v28 = vadd.f32 %v6342_v33, %v6761_v56 }
 0x38e   :  { %v1941_v57 = vpop.f32.mrb[205].mxu0  ;;  %v2328_v48 = vpop.f32.mrb[254].mxu1 }
 0x38f   :  { %7397 = vst [vmem:[#allocation9_spill] sm:$0xff] %v6813_v13  ;;  %v2329_v46 = vadd.f32 %v6349_v47, %v2328_v48  ;;  %v2330_v25 = vpop.f32.mrb[255].mxu1  ;;  %v2522_v45 = vmul.f32 %v6813_v13, %v6813_v13 }
 0x391   :  { %v6822_v63 = vsub.f32 %v1905_v27, %v2329_v46  ;;  %v6824_v42 = vpop.f32.mrb[206].mxu0  ;;  %3656 = vmatprep.mubr.f32.mxu0 %v2522_v45  ;;  %v1915_v45 = vadd.f32 %v6342_v33, %v6770_v58 }
 0x392   :  { %v1946_v14 = vpop.f32.mrb[207].mxu0  ;;  %v2333_v36 = vpop.f32.mrb[0].mxu1 }
 0x393   :  { %7398 = vst [vmem:[#allocation10_spill] sm:$0xff] %v6822_v63  ;;  %v2523_v38 = vmul.f32 %v6822_v63, %v6822_v63  ;;  %v2334_v20 = vadd.f32 %v6349_v47, %v2333_v36  ;;  %v2335_v57 = vpop.f32.mrb[1].mxu1 }
 0x395   :  { %v6831_v25 = vsub.f32 %v1910_v28, %v2334_v20  ;;  %v6833_v48 = vpop.f32.mrb[208].mxu0  ;;  %3657 = vmatmul.mubr.f32.gmra.mrb[14].mxu0 %v2523_v38  ;;  %v1920_v38 = vadd.f32 %v6342_v33, %v6779_v32 }
 0x396   :  { %v1951_v27 = vpop.f32.mrb[209].mxu0  ;;  %v2338_v46 = vpop.f32.mrb[2].mxu1 }
 0x397   :  { %7399 = vst [vmem:[#allocation11_spill] sm:$0xff] %v6831_v25  ;;  %v2339_v14 = vadd.f32 %v6349_v47, %v2338_v46  ;;  %v2340_v13 = vpop.f32.mrb[3].mxu1  ;;  %v2524_v56 = vmul.f32 %v6831_v25, %v6831_v25 }
 0x399   :  { %v6840_v63 = vsub.f32 %v1915_v45, %v2339_v14  ;;  %v6842_v36 = vpop.f32.mrb[210].mxu0  ;;  %3659 = vmatprep.mubr.f32.mxu0 %v2524_v56  ;;  %v1925_v56 = vadd.f32 %v6342_v33, %v6788_v55 }
 0x39a   :  { %v1956_v28 = vpop.f32.mrb[211].mxu0  ;;  %v2343_v20 = vpop.f32.mrb[4].mxu1 }
 0x39b   :  { %7400 = vst [vmem:[#allocation12_spill] sm:$0xff] %v6840_v63  ;;  %v2525_v57 = vmul.f32 %v6840_v63, %v6840_v63  ;;  %v2344_v58 = vadd.f32 %v6349_v47, %v2343_v20  ;;  %v2345_v27 = vpop.f32.mrb[5].mxu1 }
 0x39d   :  { %v6849_v13 = vsub.f32 %v1920_v38, %v2344_v58  ;;  %v6851_v46 = vpop.f32.mrb[212].mxu0  ;;  %3660 = vmatmul.mubr.f32.gmra.mrb[16].mxu0 %v2525_v57  ;;  %v1930_v57 = vadd.f32 %v6342_v33, %v6797_v29 }
 0x39e   :  { %v1961_v45 = vpop.f32.mrb[213].mxu0  ;;  %v2348_v14 = vpop.f32.mrb[6].mxu1 }
 0x39f   :  { %7401 = vst [vmem:[#allocation13_spill] sm:$0xff] %v6849_v13  ;;  %v2349_v28 = vadd.f32 %v6349_v47, %v2348_v14  ;;  %v2350_v25 = vpop.f32.mrb[7].mxu1  ;;  %v2526_v32 = vmul.f32 %v6849_v13, %v6849_v13 }
 0x3a1   :  { %v6858_v63 = vsub.f32 %v1925_v56, %v2349_v28  ;;  %v6860_v20 = vpop.f32.mrb[214].mxu0  ;;  %3662 = vmatprep.mubr.f32.mxu0 %v2526_v32  ;;  %v6874_v32 = vld [vmem:[%s7366_s6] ss:$0 sm:$0xff] }
 0x3a2   :  { %v1966_v38 = vpop.f32.mrb[215].mxu0  ;;  %v2353_v58 = vpop.f32.mrb[8].mxu1  ;;  %v1935_v33 = vadd.f32 %v6874_v32, %v6806_v6  ;;  %v1940_v6 = vadd.f32 %v6874_v32, %v6815_v24 }
 0x3a3   :  { %7402 = vst [vmem:[#allocation14_spill] sm:$0xff] %v6858_v63  ;;  %v2527_v27 = vmul.f32 %v6858_v63, %v6858_v63  ;;  %v2354_v55 = vadd.f32 %v6349_v47, %v2353_v58  ;;  %v2355_v45 = vpop.f32.mrb[9].mxu1  ;;  %v6881_v47 = vld [vmem:[%s7367_s8] ss:$0 sm:$0xff] }
 0x3a5   :  { %v6867_v25 = vsub.f32 %v1930_v57, %v2354_v55  ;;  %v6869_v14 = vpop.f32.mrb[216].mxu0  ;;  %3663 = vmatmul.mubr.f32.gmra.mrb[18].mxu0 %v2527_v27 }
 0x3a6   :  { %v1971_v56 = vpop.f32.mrb[217].mxu0  ;;  %v2358_v28 = vpop.f32.mrb[10].mxu1 }
 0x3a7   :  { %7403 = vst [vmem:[#allocation15_spill] sm:$0xff] %v6867_v25  ;;  %v2359_v29 = vadd.f32 %v6881_v47, %v2358_v28  ;;  %v2360_v38 = vpop.f32.mrb[11].mxu1  ;;  %v2528_v58 = vmul.f32 %v6867_v25, %v6867_v25 }
 0x3a9   :  { %v6886_v57 = vsub.f32 %v1935_v33, %v2359_v29  ;;  %v6888_v27 = vpop.f32.mrb[218].mxu0  ;;  %3665 = vmatprep.mubr.f32.mxu0 %v2528_v58  ;;  %v1945_v58 = vadd.f32 %v6874_v32, %v6824_v42 }
 0x3aa   :  { %v1976_v55 = vpop.f32.mrb[219].mxu0  ;;  %v2363_v45 = vpop.f32.mrb[12].mxu1 }
 0x3ab   :  { %7404 = vst [vmem:[#allocation16_spill] sm:$0xff] %v6886_v57  ;;  %v2529_v56 = vmul.f32 %v6886_v57, %v6886_v57  ;;  %v2364_v13 = vadd.f32 %v6881_v47, %v2363_v45  ;;  %v2365_v28 = vpop.f32.mrb[13].mxu1 }
 0x3ad   :  { %v6895_v38 = vsub.f32 %v1940_v6, %v2364_v13  ;;  %v6897_v63 = vpop.f32.mrb[220].mxu0  ;;  %3666 = vmatmul.mubr.f32.gmra.mrb[20].mxu0 %v2529_v56  ;;  %v1950_v56 = vadd.f32 %v6874_v32, %v6833_v48 }
 0x3ae   :  { %v1981_v33 = vpop.f32.mrb[221].mxu0  ;;  %v2368_v29 = vpop.f32.mrb[14].mxu1 }
 0x3af   :  { %7405 = vst [vmem:[#allocation17_spill] sm:$0xff] %v6895_v38  ;;  %v2369_v55 = vadd.f32 %v6881_v47, %v2368_v29  ;;  %v2370_v25 = vpop.f32.mrb[15].mxu1  ;;  %v2530_v24 = vmul.f32 %v6895_v38, %v6895_v38 }
 0x3b1   :  { %v6904_v57 = vsub.f32 %v1945_v58, %v2369_v55  ;;  %v6906_v45 = vpop.f32.mrb[222].mxu0  ;;  %3668 = vmatprep.mubr.f32.mxu0 %v2530_v24  ;;  %v1955_v24 = vadd.f32 %v6874_v32, %v6842_v36 }
 0x3b2   :  { %v1986_v13 = vpop.f32.mrb[223].mxu0  ;;  %v2373_v6 = vpop.f32.mrb[16].mxu1 }
 0x3b3   :  { %7406 = vst [vmem:[#allocation18_spill] sm:$0xff] %v6904_v57  ;;  %v2531_v28 = vmul.f32 %v6904_v57, %v6904_v57  ;;  %v2374_v42 = vadd.f32 %v6881_v47, %v2373_v6  ;;  %v2375_v33 = vpop.f32.mrb[17].mxu1 }
 0x3b5   :  { %v6913_v25 = vsub.f32 %v1950_v56, %v2374_v42  ;;  %v3589_v29 = vpop.f32.mrb[224].mxu0  ;;  %3669 = vmatmul.mubr.f32.gmra.mrb[22].mxu0 %v2531_v28  ;;  %v1960_v28 = vadd.f32 %v6874_v32, %v6851_v46 }
 0x3b6   :  { %v2942_v58 = vmul.f32 0.0625, %v3589_v29  ;;  %v2378_v55 = vpop.f32.mrb[18].mxu1  ;;  %v2622_v38 = vpop.f32.mrb[225].mxu0 }
 0x3b7   :  { %v2379_v13 = vadd.f32 %v6881_v47, %v2378_v55  ;;  %v2941_v23 = vmul.f32 0.0625, %v2622_v38  ;;  %v2380_v48 = vpop.f32.mrb[19].mxu1  ;;  %v2532_v57 = vmul.f32 %v6913_v25, %v6913_v25 }
 0x3b8   :  { %v3006_v53 = vadd.f32 1e-05, %v2942_v58 }
 0x3b9   :  { %v6920_v6 = vsub.f32 %v1955_v24, %v2379_v13  ;;  %v3005_v56 = vadd.f32 1e-05, %v2941_v23  ;;  %v3592_v42 = vpop.f32.mrb[226].mxu0  ;;  %3671 = vmatprep.mubr.f32.mxu0 %v2532_v57 }
 0x3ba   :  { %4425 = vrsqrt.f32 %v3006_v53  ;;  %v2944_v33 = vmul.f32 0.0625, %v3592_v42  ;;  %v2383_v29 = vpop.f32.mrb[20].mxu1  ;;  %v2632_v36 = vpop.f32.mrb[227].mxu0  ;;  %v1965_v53 = vadd.f32 %v6874_v32, %v6860_v20 }
 0x3bb   :  { %v2533_v38 = vmul.f32 %v6920_v6, %v6920_v6  ;;  %4427 = vrsqrt.f32 %v3005_v56  ;;  %v2384_v55 = vadd.f32 %v6881_v47, %v2383_v29  ;;  %v2943_v48 = vmul.f32 0.0625, %v2632_v36  ;;  %v2385_v58 = vpop.f32.mrb[21].mxu1 }
 0x3bc   :  { %v3008_v24 = vadd.f32 1e-05, %v2944_v33 }
 0x3bd   :  { %v6927_v13 = vsub.f32 %v1960_v28, %v2384_v55  ;;  %v3007_v23 = vadd.f32 1e-05, %v2943_v48  ;;  %3672 = vmatmul.mubr.f32.gmra.mrb[24].mxu0 %v2533_v38  ;;  %v1970_v48 = vadd.f32 %v6874_v32, %v6869_v14  ;;  %v6952_v14 = vld [vmem:[%s7369_s11] ss:$0 sm:$0xff] }
 0x3be   :  { %4429 = vrsqrt.f32 %v3008_v24  ;;  %v2388_v57 = vpop.f32.mrb[22].mxu1 }
 0x3bf   :  { %7407 = vst [vmem:[#allocation19_spill] sm:$0xff] %v6927_v13  ;;  %4431 = vrsqrt.f32 %v3007_v23  ;;  %v2389_v46 = vadd.f32 %v6881_v47, %v2388_v57  ;;  %v2390_v42 = vpop.f32.mrb[23].mxu1  ;;  %v2534_v56 = vmul.f32 %v6927_v13, %v6927_v13 }
 0x3c0   :  { %v3595_v29 = vpop.f32.mrb[228].mxu0 }
 0x3c1   :  { %v6934_v36 = vsub.f32 %v1965_v53, %v2389_v46  ;;  %v2946_v33 = vmul.f32 0.0625, %v3595_v29  ;;  %v2642_v28 = vpop.f32.mrb[229].mxu0  ;;  %3674 = vmatprep.mubr.f32.mxu0 %v2534_v56  ;;  %v6944_v53 = vld [vmem:[%s7368_s10] ss:$0 sm:$0xff] }
 0x3c2   :  { %v2945_v55 = vmul.f32 0.0625, %v2642_v28  ;;  %v2393_v38 = vpop.f32.mrb[24].mxu1 }
 0x3c3   :  { %v2535_v20 = vmul.f32 %v6934_v36, %v6934_v36  ;;  %v3010_v58 = vadd.f32 1e-05, %v2946_v33  ;;  %v2394_v24 = vadd.f32 %v6881_v47, %v2393_v38  ;;  %v2395_v23 = vpop.f32.mrb[25].mxu1  ;;  %v1975_v38 = vadd.f32 %v6874_v32, %v6888_v27 }
 0x3c4   :  { %v4426_v57 = vpop.eup %4425  ;;  %v3009_v46 = vadd.f32 1e-05, %v2945_v55 }
 0x3c5   :  { %v4428_v42 = vpop.eup %4427  ;;  %v3134_v56 = vmul.f32 %v4426_v57, %v6381_v19  ;;  %4433 = vrsqrt.f32 %v3010_v58  ;;  %v6947_v29 = vsub.f32 %v1970_v48, %v2394_v24  ;;  %3675 = vmatmul.mubr.f32.gmra.mrb[26].mxu0 %v2535_v20 }
 0x3c6   :  { %v3133_v33 = vmul.f32 %v4428_v42, %v6366_v40  ;;  %4435 = vrsqrt.f32 %v3009_v46  ;;  %v2398_v28 = vpop.f32.mrb[26].mxu1 }
 0x3c7   :  { %7408 = vst [vmem:[#allocation20_spill] sm:$0xff] %v6947_v29  ;;  %v3205_v55 = vmul.f32 %v6944_v53, %v3134_v56  ;;  %v2399_v19 = vadd.f32 %v6881_v47, %v2398_v28  ;;  %v2400_v58 = vpop.f32.mrb[27].mxu1  ;;  %v2536_v48 = vmul.f32 %v6947_v29, %v6947_v29  ;;  %v1980_v56 = vadd.f32 %v6874_v32, %v6897_v63 }
 0x3c8   :  { %v4430_v20 = vpop.eup %4429  ;;  %v3204_v24 = vmul.f32 %v6944_v53, %v3133_v33  ;;  %v3598_v23 = vpop.f32.mrb[230].mxu0 }
 0x3c9   :  { %v4432_v57 = vpop.eup %4431  ;;  %v3276_v40 = vadd.f32 %v6952_v14, %v3205_v55  ;;  %v3136_v46 = vmul.f32 %v4430_v20, %v6411_v12  ;;  %v6964_v42 = vsub.f32 %v1975_v38, %v2399_v19  ;;  %v2948_v27 = vmul.f32 0.0625, %v3598_v23  ;;  %v2652_v13 = vpop.f32.mrb[231].mxu0  ;;  %3677 = vmatprep.mubr.f32.mxu0 %v2536_v48 }
 0x3ca   :  { %v3275_v28 = vadd.f32 %v6952_v14, %v3204_v24  ;;  %v3135_v58 = vmul.f32 %v4432_v57, %v6396_v17  ;;  %v2947_v29 = vmul.f32 0.0625, %v2652_v13  ;;  %v2403_v33 = vpop.f32.mrb[28].mxu1 }
 0x3cb   :  { %3340 = vst [vmem:[%s7370_s12 + $0x8] sm:$0xff] %v3276_v40  ;;  %v3207_v12 = vmul.f32 %v6944_v53, %v3136_v46  ;;  %v2537_v38 = vmul.f32 %v6964_v42, %v6964_v42  ;;  %v3012_v55 = vadd.f32 1e-05, %v2948_v27  ;;  %v2404_v19 = vadd.f32 %v6881_v47, %v2403_v33  ;;  %v2405_v48 = vpop.f32.mrb[29].mxu1 }
 0x3cc   :  { %3339 = vst [vmem:[%s7370_s12] sm:$0xff] %v3275_v28  ;;  %v3206_v17 = vmul.f32 %v6944_v53, %v3135_v58  ;;  %v3011_v63 = vadd.f32 1e-05, %v2947_v29  ;;  %v1985_v40 = vadd.f32 %v6874_v32, %v6906_v45 }
 0x3cd   :  { %v3278_v13 = vadd.f32 %v6952_v14, %v3207_v12  ;;  %4437 = vrsqrt.f32 %v3012_v55  ;;  %v6982_v20 = vsub.f32 %v1980_v56, %v2404_v19  ;;  %3678 = vmatmul.mubr.f32.gmra.mrb[28].mxu0 %v2537_v38 }
 0x3ce   :  { %v3277_v24 = vadd.f32 %v6952_v14, %v3206_v17  ;;  %4439 = vrsqrt.f32 %v3011_v63  ;;  %v2408_v23 = vpop.f32.mrb[30].mxu1 }
 0x3cf   :  { %v4434_v57 = vpop.eup %4433  ;;  %3342 = vst [vmem:[%s7370_s12 + $0x18] sm:$0xff] %v3278_v13  ;;  %v2409_v29 = vadd.f32 %v6881_v47, %v2408_v23  ;;  %v2410_v46 = vpop.f32.mrb[31].mxu1  ;;  %v2538_v27 = vmul.f32 %v6982_v20, %v6982_v20 }
 0x3d0   :  { %v4436_v56 = vpop.eup %4435  ;;  %3341 = vst [vmem:[%s7370_s12 + $0x10] sm:$0xff] %v3277_v24  ;;  %v3138_v28 = vmul.f32 %v4434_v57, %v6435_v4  ;;  %v3601_v58 = vpop.f32.mrb[232].mxu0 }
 0x3d1   :  { %v3137_v32 = vmul.f32 %v4436_v56, %v6424_v11  ;;  %v6998_v45 = vsub.f32 %v1985_v40, %v2409_v29  ;;  %v2950_v33 = vmul.f32 0.0625, %v3601_v58  ;;  %v2662_v12 = vpop.f32.mrb[233].mxu0  ;;  %3680 = vmatprep.mubr.f32.mxu0 %v2538_v27 }
 0x3d2   :  { %v3209_v47 = vmul.f32 %v6944_v53, %v3138_v28  ;;  %v2949_v38 = vmul.f32 0.0625, %v2662_v12 }
 0x3d3   :  { %v3208_v55 = vmul.f32 %v6944_v53, %v3137_v32  ;;  %v2539_v19 = vmul.f32 %v6998_v45, %v6998_v45  ;;  %v3014_v48 = vadd.f32 1e-05, %v2950_v33 }
 0x3d4   :  { %v3280_v17 = vadd.f32 %v6952_v14, %v3209_v47  ;;  %v3013_v4 = vadd.f32 1e-05, %v2949_v38 }
 0x3d5   :  { %v3279_v63 = vadd.f32 %v6952_v14, %v3208_v55  ;;  %4441 = vrsqrt.f32 %v3014_v48  ;;  %3681 = vmatmul.mubr.f32.gmra.mrb[30].mxu0 %v2539_v19 }
 0x3d6   :  { %3344 = vst [vmem:[%s7370_s12 + $0x28] sm:$0xff] %v3280_v17  ;;  %4443 = vrsqrt.f32 %v3013_v4 }
 0x3d7   :  { %v4438_v11 = vpop.eup %4437  ;;  %3343 = vst [vmem:[%s7370_s12 + $0x20] sm:$0xff] %v3279_v63 }
 0x3d8   :  { %v4440_v13 = vpop.eup %4439  ;;  %v3140_v24 = vmul.f32 %v4438_v11, %v6457_v30  ;;  %v3604_v23 = vpop.f32.mrb[234].mxu0 }
 0x3d9   :  { %v3139_v57 = vmul.f32 %v4440_v13, %v6446_v3  ;;  %v2952_v40 = vmul.f32 0.0625, %v3604_v23  ;;  %v2672_v29 = vpop.f32.mrb[235].mxu0 }
 0x3da   :  { %v3211_v46 = vmul.f32 %v6944_v53, %v3140_v24  ;;  %v2951_v27 = vmul.f32 0.0625, %v2672_v29 }
 0x3db   :  { %v3210_v56 = vmul.f32 %v6944_v53, %v3139_v57  ;;  %v3016_v28 = vadd.f32 1e-05, %v2952_v40 }
 0x3dc   :  { %v3282_v58 = vadd.f32 %v6952_v14, %v3211_v46  ;;  %v3015_v32 = vadd.f32 1e-05, %v2951_v27 }
 0x3dd   :  { %v3281_v33 = vadd.f32 %v6952_v14, %v3210_v56  ;;  %4445 = vrsqrt.f32 %v3016_v28 }
 0x3de   :  { %3346 = vst [vmem:[%s7370_s12 + $0x38] sm:$0xff] %v3282_v58  ;;  %4447 = vrsqrt.f32 %v3015_v32 }
 0x3df   :  { %v4442_v3 = vpop.eup %4441  ;;  %3345 = vst [vmem:[%s7370_s12 + $0x30] sm:$0xff] %v3281_v33 }
 0x3e0   :  { %v4444_v30 = vpop.eup %4443  ;;  %v3142_v12 = vmul.f32 %v4442_v3, %v6479_v10  ;;  %v3607_v47 = vpop.f32.mrb[236].mxu0 }
 0x3e1   :  { %v3141_v38 = vmul.f32 %v4444_v30, %v6468_v61  ;;  %v2954_v55 = vmul.f32 0.0625, %v3607_v47  ;;  %v2682_v19 = vpop.f32.mrb[237].mxu0 }
 0x3e2   :  { %v3213_v48 = vmul.f32 %v6944_v53, %v3142_v12  ;;  %v2953_v17 = vmul.f32 0.0625, %v2682_v19 }
 0x3e3   :  { %v3212_v4 = vmul.f32 %v6944_v53, %v3141_v38  ;;  %v3018_v63 = vadd.f32 1e-05, %v2954_v55 }
 0x3e4   :  { %v3284_v11 = vadd.f32 %v6952_v14, %v3213_v48  ;;  %v3017_v13 = vadd.f32 1e-05, %v2953_v17 }
 0x3e5   :  { %v3283_v24 = vadd.f32 %v6952_v14, %v3212_v4  ;;  %4449 = vrsqrt.f32 %v3018_v63 }
 0x3e6   :  { %3348 = vst [vmem:[%s7370_s12 + $0x48] sm:$0xff] %v3284_v11  ;;  %4451 = vrsqrt.f32 %v3017_v13 }
 0x3e7   :  { %v4446_v61 = vpop.eup %4445  ;;  %3347 = vst [vmem:[%s7370_s12 + $0x40] sm:$0xff] %v3283_v24 }
 0x3e8   :  { %v4448_v10 = vpop.eup %4447  ;;  %v3144_v23 = vmul.f32 %v4446_v61, %v6498_v0  ;;  %v3610_v57 = vpop.f32.mrb[238].mxu0 }
 0x3e9   :  { %v3143_v40 = vmul.f32 %v4448_v10, %v6489_v54  ;;  %v2956_v29 = vmul.f32 0.0625, %v3610_v57  ;;  %v2692_v46 = vpop.f32.mrb[239].mxu0 }
 0x3ea   :  { %v3215_v27 = vmul.f32 %v6944_v53, %v3144_v23  ;;  %v2955_v56 = vmul.f32 0.0625, %v2692_v46 }
 0x3eb   :  { %v3214_v28 = vmul.f32 %v6944_v53, %v3143_v40  ;;  %v3020_v58 = vadd.f32 1e-05, %v2956_v29 }
 0x3ec   :  { %v3286_v32 = vadd.f32 %v6952_v14, %v3215_v27  ;;  %v3019_v33 = vadd.f32 1e-05, %v2955_v56 }
 0x3ed   :  { %v3285_v3 = vadd.f32 %v6952_v14, %v3214_v28  ;;  %4453 = vrsqrt.f32 %v3020_v58 }
 0x3ee   :  { %3350 = vst [vmem:[%s7370_s12 + $0x58] sm:$0xff] %v3286_v32  ;;  %4455 = vrsqrt.f32 %v3019_v33 }
 0x3ef   :  { %v4450_v54 = vpop.eup %4449  ;;  %3349 = vst [vmem:[%s7370_s12 + $0x50] sm:$0xff] %v3285_v3 }
 0x3f0   :  { %v4452_v0 = vpop.eup %4451  ;;  %v3146_v30 = vmul.f32 %v4450_v54, %v6516_v8  ;;  %v3613_v12 = vpop.f32.mrb[240].mxu0 }
 0x3f1   :  { %v3145_v47 = vmul.f32 %v4452_v0, %v6507_v31  ;;  %v2958_v38 = vmul.f32 0.0625, %v3613_v12  ;;  %v2702_v55 = vpop.f32.mrb[241].mxu0 }
 0x3f2   :  { %v3217_v19 = vmul.f32 %v6944_v53, %v3146_v30  ;;  %v2957_v48 = vmul.f32 0.0625, %v2702_v55 }
 0x3f3   :  { %v3216_v17 = vmul.f32 %v6944_v53, %v3145_v47  ;;  %v3022_v4 = vadd.f32 1e-05, %v2958_v38 }
 0x3f4   :  { %v3288_v63 = vadd.f32 %v6952_v14, %v3217_v19  ;;  %v3021_v11 = vadd.f32 1e-05, %v2957_v48 }
 0x3f5   :  { %v3287_v13 = vadd.f32 %v6952_v14, %v3216_v17  ;;  %4457 = vrsqrt.f32 %v3022_v4 }
 0x3f6   :  { %3352 = vst [vmem:[%s7370_s12 + $0x68] sm:$0xff] %v3288_v63  ;;  %4459 = vrsqrt.f32 %v3021_v11 }
 0x3f7   :  { %v4454_v31 = vpop.eup %4453  ;;  %3351 = vst [vmem:[%s7370_s12 + $0x60] sm:$0xff] %v3287_v13 }
 0x3f8   :  { %v4456_v8 = vpop.eup %4455  ;;  %v3148_v24 = vmul.f32 %v4454_v31, %v6534_v59  ;;  %v3616_v61 = vpop.f32.mrb[242].mxu0 }
 0x3f9   :  { %v3147_v10 = vmul.f32 %v4456_v8, %v6525_v34  ;;  %v2960_v23 = vmul.f32 0.0625, %v3616_v61  ;;  %v2712_v57 = vpop.f32.mrb[243].mxu0 }
 0x3fa   :  { %v3219_v40 = vmul.f32 %v6944_v53, %v3148_v24  ;;  %v2959_v29 = vmul.f32 0.0625, %v2712_v57 }
 0x3fb   :  { %v3218_v46 = vmul.f32 %v6944_v53, %v3147_v10  ;;  %v3024_v27 = vadd.f32 1e-05, %v2960_v23 }
 0x3fc   :  { %v3290_v56 = vadd.f32 %v6952_v14, %v3219_v40  ;;  %v3023_v28 = vadd.f32 1e-05, %v2959_v29 }
 0x3fd   :  { %v3289_v58 = vadd.f32 %v6952_v14, %v3218_v46  ;;  %4461 = vrsqrt.f32 %v3024_v27 }
 0x3fe   :  { %3354 = vst [vmem:[%s7370_s12 + $0x78] sm:$0xff] %v3290_v56  ;;  %4463 = vrsqrt.f32 %v3023_v28 }
 0x3ff   :  { %v4458_v34 = vpop.eup %4457  ;;  %3353 = vst [vmem:[%s7370_s12 + $0x70] sm:$0xff] %v3289_v58 }
 0x400   :  { %v4460_v59 = vpop.eup %4459  ;;  %v3150_v32 = vmul.f32 %v4458_v34, %v6552_v5  ;;  %v3619_v33 = vpop.f32.mrb[244].mxu0 }
 0x401   :  { %v3149_v3 = vmul.f32 %v4460_v59, %v6543_v15  ;;  %v2962_v54 = vmul.f32 0.0625, %v3619_v33  ;;  %v2722_v0 = vpop.f32.mrb[245].mxu0 }
 0x402   :  { %v3221_v30 = vmul.f32 %v6944_v53, %v3150_v32  ;;  %v2961_v12 = vmul.f32 0.0625, %v2722_v0 }
 0x403   :  { %v3220_v47 = vmul.f32 %v6944_v53, %v3149_v3  ;;  %v3026_v38 = vadd.f32 1e-05, %v2962_v54 }
 0x404   :  { %v3292_v55 = vadd.f32 %v6952_v14, %v3221_v30  ;;  %v3025_v19 = vadd.f32 1e-05, %v2961_v12 }
 0x405   :  { %v3291_v48 = vadd.f32 %v6952_v14, %v3220_v47  ;;  %4465 = vrsqrt.f32 %v3026_v38 }
 0x406   :  { %3356 = vst [vmem:[%s7370_s12 + $0x88] sm:$0xff] %v3292_v55  ;;  %4467 = vrsqrt.f32 %v3025_v19 }
 0x407   :  { %v4462_v15 = vpop.eup %4461  ;;  %3355 = vst [vmem:[%s7370_s12 + $0x80] sm:$0xff] %v3291_v48 }
 0x408   :  { %v4464_v5 = vpop.eup %4463  ;;  %v3152_v17 = vmul.f32 %v4462_v15, %v6570_v62  ;;  %v3622_v4 = vpop.f32.mrb[246].mxu0 }
 0x409   :  { %v3151_v63 = vmul.f32 %v4464_v5, %v6561_v22  ;;  %v2964_v11 = vmul.f32 0.0625, %v3622_v4  ;;  %v2732_v13 = vpop.f32.mrb[247].mxu0 }
 0x40a   :  { %v3223_v31 = vmul.f32 %v6944_v53, %v3152_v17  ;;  %v2963_v8 = vmul.f32 0.0625, %v2732_v13 }
 0x40b   :  { %v3222_v24 = vmul.f32 %v6944_v53, %v3151_v63  ;;  %v3028_v61 = vadd.f32 1e-05, %v2964_v11 }
 0x40c   :  { %v3294_v10 = vadd.f32 %v6952_v14, %v3223_v31  ;;  %v3027_v23 = vadd.f32 1e-05, %v2963_v8 }
 0x40d   :  { %v3293_v57 = vadd.f32 %v6952_v14, %v3222_v24  ;;  %4469 = vrsqrt.f32 %v3028_v61 }
 0x40e   :  { %3358 = vst [vmem:[%s7370_s12 + $0x98] sm:$0xff] %v3294_v10  ;;  %4471 = vrsqrt.f32 %v3027_v23 }
 0x40f   :  { %v4466_v22 = vpop.eup %4465  ;;  %3357 = vst [vmem:[%s7370_s12 + $0x90] sm:$0xff] %v3293_v57 }
 0x410   :  { %v4468_v62 = vpop.eup %4467  ;;  %v3154_v40 = vmul.f32 %v4466_v22, %v6588_v41  ;;  %v3625_v29 = vpop.f32.mrb[248].mxu0 }
 0x411   :  { %v3153_v46 = vmul.f32 %v4468_v62, %v6579_v21  ;;  %v2966_v27 = vmul.f32 0.0625, %v3625_v29  ;;  %v2742_v56 = vpop.f32.mrb[249].mxu0 }
 0x412   :  { %v3225_v28 = vmul.f32 %v6944_v53, %v3154_v40  ;;  %v2965_v58 = vmul.f32 0.0625, %v2742_v56 }
 0x413   :  { %v3224_v34 = vmul.f32 %v6944_v53, %v3153_v46  ;;  %v3030_v59 = vadd.f32 1e-05, %v2966_v27 }
 0x414   :  { %v3296_v32 = vadd.f32 %v6952_v14, %v3225_v28  ;;  %v3029_v33 = vadd.f32 1e-05, %v2965_v58 }
 0x415   :  { %v3295_v3 = vadd.f32 %v6952_v14, %v3224_v34  ;;  %4473 = vrsqrt.f32 %v3030_v59 }
 0x416   :  { %3360 = vst [vmem:[%s7370_s12 + $0xa8] sm:$0xff] %v3296_v32  ;;  %4475 = vrsqrt.f32 %v3029_v33 }
 0x417   :  { %v4470_v21 = vpop.eup %4469  ;;  %3359 = vst [vmem:[%s7370_s12 + $0xa0] sm:$0xff] %v3295_v3 }
 0x418   :  { %v4472_v41 = vpop.eup %4471  ;;  %v3156_v54 = vmul.f32 %v4470_v21, %v6606_v37  ;;  %v3628_v0 = vpop.f32.mrb[250].mxu0 }
 0x419   :  { %v3155_v30 = vmul.f32 %v4472_v41, %v6597_v26  ;;  %v2968_v12 = vmul.f32 0.0625, %v3628_v0  ;;  %v2752_v47 = vpop.f32.mrb[251].mxu0 }
 0x41a   :  { %v3227_v38 = vmul.f32 %v6944_v53, %v3156_v54  ;;  %v2967_v55 = vmul.f32 0.0625, %v2752_v47 }
 0x41b   :  { %v3226_v19 = vmul.f32 %v6944_v53, %v3155_v30  ;;  %v3032_v48 = vadd.f32 1e-05, %v2968_v12 }
 0x41c   :  { %v3298_v15 = vadd.f32 %v6952_v14, %v3227_v38  ;;  %v3031_v5 = vadd.f32 1e-05, %v2967_v55 }
 0x41d   :  { %v3297_v17 = vadd.f32 %v6952_v14, %v3226_v19  ;;  %4477 = vrsqrt.f32 %v3032_v48 }
 0x41e   :  { %3362 = vst [vmem:[%s7370_s12 + $0xb8] sm:$0xff] %v3298_v15  ;;  %4479 = vrsqrt.f32 %v3031_v5 }
 0x41f   :  { %v4474_v26 = vpop.eup %4473  ;;  %3361 = vst [vmem:[%s7370_s12 + $0xb0] sm:$0xff] %v3297_v17 }
 0x420   :  { %v4476_v37 = vpop.eup %4475  ;;  %v3158_v4 = vmul.f32 %v4474_v26, %v6624_v49  ;;  %v3631_v63 = vpop.f32.mrb[252].mxu0 }
 0x421   :  { %v3157_v11 = vmul.f32 %v4476_v37, %v6615_v50  ;;  %v2970_v13 = vmul.f32 0.0625, %v3631_v63  ;;  %v2762_v31 = vpop.f32.mrb[253].mxu0 }
 0x422   :  { %v3229_v8 = vmul.f32 %v6944_v53, %v3158_v4  ;;  %v2969_v24 = vmul.f32 0.0625, %v2762_v31 }
 0x423   :  { %v3228_v61 = vmul.f32 %v6944_v53, %v3157_v11  ;;  %v3034_v10 = vadd.f32 1e-05, %v2970_v13 }
 0x424   :  { %v3300_v23 = vadd.f32 %v6952_v14, %v3229_v8  ;;  %v3033_v57 = vadd.f32 1e-05, %v2969_v24 }
 0x425   :  { %v3299_v22 = vadd.f32 %v6952_v14, %v3228_v61  ;;  %4481 = vrsqrt.f32 %v3034_v10 }
 0x426   :  { %3364 = vst [vmem:[%s7370_s12 + $0xc8] sm:$0xff] %v3300_v23  ;;  %4483 = vrsqrt.f32 %v3033_v57 }
 0x427   :  { %v4478_v50 = vpop.eup %4477  ;;  %3363 = vst [vmem:[%s7370_s12 + $0xc0] sm:$0xff] %v3299_v22 }
 0x428   :  { %v4480_v49 = vpop.eup %4479  ;;  %v3160_v62 = vmul.f32 %v4478_v50, %v6642_v51  ;;  %v3634_v40 = vpop.f32.mrb[254].mxu0 }
 0x429   :  { %v3159_v29 = vmul.f32 %v4480_v49, %v6633_v18  ;;  %v2972_v46 = vmul.f32 0.0625, %v3634_v40  ;;  %v2772_v27 = vpop.f32.mrb[255].mxu0 }
 0x42a   :  { %v3231_v56 = vmul.f32 %v6944_v53, %v3160_v62  ;;  %v2971_v28 = vmul.f32 0.0625, %v2772_v27 }
 0x42b   :  { %v3230_v58 = vmul.f32 %v6944_v53, %v3159_v29  ;;  %v3036_v34 = vadd.f32 1e-05, %v2972_v46 }
 0x42c   :  { %v3302_v59 = vadd.f32 %v6952_v14, %v3231_v56  ;;  %v3035_v32 = vadd.f32 1e-05, %v2971_v28 }
 0x42d   :  { %v3301_v33 = vadd.f32 %v6952_v14, %v3230_v58  ;;  %4485 = vrsqrt.f32 %v3036_v34 }
 0x42e   :  { %3366 = vst [vmem:[%s7370_s12 + $0xd8] sm:$0xff] %v3302_v59  ;;  %4487 = vrsqrt.f32 %v3035_v32 }
 0x42f   :  { %v4482_v18 = vpop.eup %4481  ;;  %3365 = vst [vmem:[%s7370_s12 + $0xd0] sm:$0xff] %v3301_v33 }
 0x430   :  { %v4484_v51 = vpop.eup %4483  ;;  %v3162_v3 = vmul.f32 %v4482_v18, %v6660_v52  ;;  %v3637_v21 = vpop.f32.mrb[0].mxu0 }
 0x431   :  { %v3161_v41 = vmul.f32 %v4484_v51, %v6651_v44  ;;  %v2974_v54 = vmul.f32 0.0625, %v3637_v21  ;;  %v2782_v0 = vpop.f32.mrb[1].mxu0 }
 0x432   :  { %v3233_v30 = vmul.f32 %v6944_v53, %v3162_v3  ;;  %v2973_v12 = vmul.f32 0.0625, %v2782_v0 }
 0x433   :  { %v3232_v47 = vmul.f32 %v6944_v53, %v3161_v41  ;;  %v3038_v38 = vadd.f32 1e-05, %v2974_v54 }
 0x434   :  { %v3304_v55 = vadd.f32 %v6952_v14, %v3233_v30  ;;  %v3037_v19 = vadd.f32 1e-05, %v2973_v12 }
 0x435   :  { %v3303_v48 = vadd.f32 %v6952_v14, %v3232_v47  ;;  %4489 = vrsqrt.f32 %v3038_v38 }
 0x436   :  { %3368 = vst [vmem:[%s7370_s12 + $0xe8] sm:$0xff] %v3304_v55  ;;  %4491 = vrsqrt.f32 %v3037_v19 }
 0x437   :  { %v4486_v44 = vpop.eup %4485  ;;  %3367 = vst [vmem:[%s7370_s12 + $0xe0] sm:$0xff] %v3303_v48 }
 0x438   :  { %v4488_v52 = vpop.eup %4487  ;;  %v3164_v15 = vmul.f32 %v4486_v44, %v6678_v16  ;;  %v3640_v5 = vpop.f32.mrb[2].mxu0 }
 0x439   :  { %v3163_v17 = vmul.f32 %v4488_v52, %v6669_v39  ;;  %v2976_v26 = vmul.f32 0.0625, %v3640_v5  ;;  %v2792_v37 = vpop.f32.mrb[3].mxu0 }
 0x43a   :  { %v3235_v4 = vmul.f32 %v6944_v53, %v3164_v15  ;;  %v2975_v63 = vmul.f32 0.0625, %v2792_v37 }
 0x43b   :  { %v3234_v11 = vmul.f32 %v6944_v53, %v3163_v17  ;;  %v3040_v13 = vadd.f32 1e-05, %v2976_v26  ;;  %v7409_v26 = vld [vmem:[#allocation2_spill] sm:$0xff] }
 0x43c   :  { %v3306_v31 = vadd.f32 %v6952_v14, %v3235_v4  ;;  %v3039_v8 = vadd.f32 1e-05, %v2975_v63 }
 0x43d   :  { %v3305_v24 = vadd.f32 %v6952_v14, %v3234_v11  ;;  %4493 = vrsqrt.f32 %v3040_v13 }
 0x43e   :  { %3370 = vst [vmem:[%s7370_s12 + $0xf8] sm:$0xff] %v3306_v31  ;;  %4495 = vrsqrt.f32 %v3039_v8 }
 0x43f   :  { %v4490_v39 = vpop.eup %4489  ;;  %3369 = vst [vmem:[%s7370_s12 + $0xf0] sm:$0xff] %v3305_v24 }
 0x440   :  { %v4492_v16 = vpop.eup %4491  ;;  %v3166_v61 = vmul.f32 %v4490_v39, %v6696_v60  ;;  %v3643_v10 = vpop.f32.mrb[4].mxu0 }
 0x441   :  { %v3165_v23 = vmul.f32 %v4492_v16, %v6687_v9  ;;  %v2978_v57 = vmul.f32 0.0625, %v3643_v10  ;;  %v2802_v22 = vpop.f32.mrb[5].mxu0  ;;  %v7410_v10 = vld [vmem:[#allocation4_spill] sm:$0xff] }
 0x442   :  { %v3237_v50 = vmul.f32 %v6944_v53, %v3166_v61  ;;  %v2977_v49 = vmul.f32 0.0625, %v2802_v22  ;;  %v7411_v22 = vld [vmem:[#allocation3_spill] sm:$0xff] }
 0x443   :  { %v3236_v62 = vmul.f32 %v6944_v53, %v3165_v23  ;;  %v3042_v40 = vadd.f32 1e-05, %v2978_v57 }
 0x444   :  { %v3308_v29 = vadd.f32 %v6952_v14, %v3237_v50  ;;  %v3041_v46 = vadd.f32 1e-05, %v2977_v49 }
 0x445   :  { %v3307_v27 = vadd.f32 %v6952_v14, %v3236_v62  ;;  %4497 = vrsqrt.f32 %v3042_v40 }
 0x446   :  { %3372 = vst [vmem:[%s7370_s12 + $0x108] sm:$0xff] %v3308_v29  ;;  %4499 = vrsqrt.f32 %v3041_v46 }
 0x447   :  { %v4494_v9 = vpop.eup %4493  ;;  %3371 = vst [vmem:[%s7370_s12 + $0x100] sm:$0xff] %v3307_v27 }
 0x448   :  { %v4496_v60 = vpop.eup %4495  ;;  %v3168_v56 = vmul.f32 %v4494_v9, %v6714_v7  ;;  %v3646_v28 = vpop.f32.mrb[6].mxu0 }
 0x449   :  { %v3167_v58 = vmul.f32 %v4496_v60, %v6705_v43  ;;  %v2980_v34 = vmul.f32 0.0625, %v3646_v28  ;;  %v2812_v59 = vpop.f32.mrb[7].mxu0 }
 0x44a   :  { %v3239_v32 = vmul.f32 %v6944_v53, %v3168_v56  ;;  %v2979_v33 = vmul.f32 0.0625, %v2812_v59 }
 0x44b   :  { %v3238_v18 = vmul.f32 %v6944_v53, %v3167_v58  ;;  %v3044_v51 = vadd.f32 1e-05, %v2980_v34  ;;  %v7412_v34 = vld [vmem:[#allocation6_spill] sm:$0xff] }
 0x44c   :  { %v3310_v3 = vadd.f32 %v6952_v14, %v3239_v32  ;;  %v3043_v21 = vadd.f32 1e-05, %v2979_v33  ;;  %v7413_v33 = vld [vmem:[#allocation5_spill] sm:$0xff] }
 0x44d   :  { %v3309_v41 = vadd.f32 %v6952_v14, %v3238_v18  ;;  %4501 = vrsqrt.f32 %v3044_v51 }
 0x44e   :  { %3374 = vst [vmem:[%s7370_s12 + $0x118] sm:$0xff] %v3310_v3  ;;  %4503 = vrsqrt.f32 %v3043_v21 }
 0x44f   :  { %v4498_v43 = vpop.eup %4497  ;;  %3373 = vst [vmem:[%s7370_s12 + $0x110] sm:$0xff] %v3309_v41 }
 0x450   :  { %v4500_v7 = vpop.eup %4499  ;;  %v3170_v54 = vmul.f32 %v4498_v43, %v6732_v1  ;;  %v3649_v0 = vpop.f32.mrb[8].mxu0 }
 0x451   :  { %v3169_v30 = vmul.f32 %v4500_v7, %v6723_v2  ;;  %v2982_v12 = vmul.f32 0.0625, %v3649_v0  ;;  %v2822_v47 = vpop.f32.mrb[9].mxu0 }
 0x452   :  { %v3241_v38 = vmul.f32 %v6944_v53, %v3170_v54  ;;  %v2981_v55 = vmul.f32 0.0625, %v2822_v47 }
 0x453   :  { %v3240_v19 = vmul.f32 %v6944_v53, %v3169_v30  ;;  %v3046_v48 = vadd.f32 1e-05, %v2982_v12 }
 0x454   :  { %v3312_v44 = vadd.f32 %v6952_v14, %v3241_v38  ;;  %v3045_v52 = vadd.f32 1e-05, %v2981_v55  ;;  %v7414_v38 = vld [vmem:[#allocation8_spill] sm:$0xff] }
 0x455   :  { %v3311_v15 = vadd.f32 %v6952_v14, %v3240_v19  ;;  %4505 = vrsqrt.f32 %v3046_v48  ;;  %v7415_v48 = vld [vmem:[#allocation7_spill] sm:$0xff] }
 0x456   :  { %3376 = vst [vmem:[%s7370_s12 + $0x128] sm:$0xff] %v3312_v44  ;;  %4507 = vrsqrt.f32 %v3045_v52 }
 0x457   :  { %v4502_v2 = vpop.eup %4501  ;;  %3375 = vst [vmem:[%s7370_s12 + $0x120] sm:$0xff] %v3311_v15 }
 0x458   :  { %v4504_v1 = vpop.eup %4503  ;;  %v3172_v5 = vmul.f32 %v4502_v2, %v6750_v35  ;;  %v3652_v17 = vpop.f32.mrb[10].mxu0 }
 0x459   :  { %v3171_v37 = vmul.f32 %v4504_v1, %v7409_v26  ;;  %v2984_v4 = vmul.f32 0.0625, %v3652_v17  ;;  %v2832_v63 = vpop.f32.mrb[11].mxu0 }
 0x45a   :  { %v3243_v11 = vmul.f32 %v6944_v53, %v3172_v5  ;;  %v2983_v13 = vmul.f32 0.0625, %v2832_v63 }
 0x45b   :  { %v3242_v31 = vmul.f32 %v6944_v53, %v3171_v37  ;;  %v3048_v8 = vadd.f32 1e-05, %v2984_v4 }
 0x45c   :  { %v3314_v24 = vadd.f32 %v6952_v14, %v3243_v11  ;;  %v3047_v39 = vadd.f32 1e-05, %v2983_v13  ;;  %v7416_v13 = vld [vmem:[#allocation10_spill] sm:$0xff] }
 0x45d   :  { %v3313_v16 = vadd.f32 %v6952_v14, %v3242_v31  ;;  %4509 = vrsqrt.f32 %v3048_v8 }
 0x45e   :  { %3378 = vst [vmem:[%s7370_s12 + $0x138] sm:$0xff] %v3314_v24  ;;  %4511 = vrsqrt.f32 %v3047_v39  ;;  %v7417_v24 = vld [vmem:[#allocation9_spill] sm:$0xff] }
 0x45f   :  { %v4506_v35 = vpop.eup %4505  ;;  %3377 = vst [vmem:[%s7370_s12 + $0x130] sm:$0xff] %v3313_v16 }
 0x460   :  { %v4508_v61 = vpop.eup %4507  ;;  %v3174_v23 = vmul.f32 %v4506_v35, %v7410_v10  ;;  %v3655_v57 = vpop.f32.mrb[12].mxu0 }
 0x461   :  { %v3173_v50 = vmul.f32 %v4508_v61, %v7411_v22  ;;  %v2986_v49 = vmul.f32 0.0625, %v3655_v57  ;;  %v2842_v62 = vpop.f32.mrb[13].mxu0 }
 0x462   :  { %v3245_v40 = vmul.f32 %v6944_v53, %v3174_v23  ;;  %v2985_v29 = vmul.f32 0.0625, %v2842_v62 }
 0x463   :  { %v3244_v46 = vmul.f32 %v6944_v53, %v3173_v50  ;;  %v3050_v27 = vadd.f32 1e-05, %v2986_v49 }
 0x464   :  { %v3316_v9 = vadd.f32 %v6952_v14, %v3245_v40  ;;  %v3049_v60 = vadd.f32 1e-05, %v2985_v29  ;;  %v7418_v29 = vld [vmem:[#allocation12_spill] sm:$0xff] }
 0x465   :  { %v3315_v56 = vadd.f32 %v6952_v14, %v3244_v46  ;;  %4513 = vrsqrt.f32 %v3050_v27 }
 0x466   :  { %3380 = vst [vmem:[%s7370_s12 + $0x148] sm:$0xff] %v3316_v9  ;;  %4515 = vrsqrt.f32 %v3049_v60  ;;  %v7419_v9 = vld [vmem:[#allocation11_spill] sm:$0xff] }
 0x467   :  { %v4510_v28 = vpop.eup %4509  ;;  %3379 = vst [vmem:[%s7370_s12 + $0x140] sm:$0xff] %v3315_v56 }
 0x468   :  { %v4512_v58 = vpop.eup %4511  ;;  %v3176_v59 = vmul.f32 %v4510_v28, %v7412_v34  ;;  %v3658_v32 = vpop.f32.mrb[14].mxu0 }
 0x469   :  { %v3175_v18 = vmul.f32 %v4512_v58, %v7413_v33  ;;  %v2988_v51 = vmul.f32 0.0625, %v3658_v32  ;;  %v2852_v3 = vpop.f32.mrb[15].mxu0 }
 0x46a   :  { %v3247_v21 = vmul.f32 %v6944_v53, %v3176_v59  ;;  %v2987_v41 = vmul.f32 0.0625, %v2852_v3 }
 0x46b   :  { %v3246_v43 = vmul.f32 %v6944_v53, %v3175_v18  ;;  %v3052_v7 = vadd.f32 1e-05, %v2988_v51 }
 0x46c   :  { %v3318_v54 = vadd.f32 %v6952_v14, %v3247_v21  ;;  %v3051_v0 = vadd.f32 1e-05, %v2987_v41  ;;  %v7420_v41 = vld [vmem:[#allocation14_spill] sm:$0xff] }
 0x46d   :  { %v3317_v30 = vadd.f32 %v6952_v14, %v3246_v43  ;;  %4517 = vrsqrt.f32 %v3052_v7 }
 0x46e   :  { %3382 = vst [vmem:[%s7370_s12 + $0x158] sm:$0xff] %v3318_v54  ;;  %4519 = vrsqrt.f32 %v3051_v0  ;;  %v7421_v54 = vld [vmem:[#allocation13_spill] sm:$0xff] }
 0x46f   :  { %v4514_v12 = vpop.eup %4513  ;;  %3381 = vst [vmem:[%s7370_s12 + $0x150] sm:$0xff] %v3317_v30 }
 0x470   :  { %v4516_v47 = vpop.eup %4515  ;;  %v3178_v55 = vmul.f32 %v4514_v12, %v7414_v38  ;;  %v3661_v19 = vpop.f32.mrb[16].mxu0 }
 0x471   :  { %v3177_v44 = vmul.f32 %v4516_v47, %v7415_v48  ;;  %v2990_v52 = vmul.f32 0.0625, %v3661_v19  ;;  %v2862_v15 = vpop.f32.mrb[17].mxu0 }
 0x472   :  { %v3249_v2 = vmul.f32 %v6944_v53, %v3178_v55  ;;  %v2989_v1 = vmul.f32 0.0625, %v2862_v15 }
 0x473   :  { %v3248_v5 = vmul.f32 %v6944_v53, %v3177_v44  ;;  %v3054_v17 = vadd.f32 1e-05, %v2990_v52 }
 0x474   :  { %v3320_v26 = vadd.f32 %v6952_v14, %v3249_v2  ;;  %v3053_v37 = vadd.f32 1e-05, %v2989_v1  ;;  %v7422_v1 = vld [vmem:[#allocation16_spill] sm:$0xff] }
 0x475   :  { %v3319_v4 = vadd.f32 %v6952_v14, %v3248_v5  ;;  %4521 = vrsqrt.f32 %v3054_v17 }
 0x476   :  { %3384 = vst [vmem:[%s7370_s12 + $0x168] sm:$0xff] %v3320_v26  ;;  %4523 = vrsqrt.f32 %v3053_v37  ;;  %v7423_v26 = vld [vmem:[#allocation15_spill] sm:$0xff] }
 0x477   :  { %v4518_v63 = vpop.eup %4517  ;;  %3383 = vst [vmem:[%s7370_s12 + $0x160] sm:$0xff] %v3319_v4 }
 0x478   :  { %v4520_v11 = vpop.eup %4519  ;;  %v3180_v31 = vmul.f32 %v4518_v63, %v7416_v13  ;;  %v3664_v8 = vpop.f32.mrb[18].mxu0 }
 0x479   :  { %v3179_v39 = vmul.f32 %v4520_v11, %v7417_v24  ;;  %v2992_v16 = vmul.f32 0.0625, %v3664_v8  ;;  %v2872_v35 = vpop.f32.mrb[19].mxu0 }
 0x47a   :  { %v3251_v61 = vmul.f32 %v6944_v53, %v3180_v31  ;;  %v2991_v10 = vmul.f32 0.0625, %v2872_v35 }
 0x47b   :  { %v3250_v23 = vmul.f32 %v6944_v53, %v3179_v39  ;;  %v3056_v57 = vadd.f32 1e-05, %v2992_v16 }
 0x47c   :  { %v3322_v22 = vadd.f32 %v6952_v14, %v3251_v61  ;;  %v3055_v50 = vadd.f32 1e-05, %v2991_v10  ;;  %v7424_v10 = vld [vmem:[#allocation18_spill] sm:$0xff] }
 0x47d   :  { %v3321_v49 = vadd.f32 %v6952_v14, %v3250_v23  ;;  %4525 = vrsqrt.f32 %v3056_v57  ;;  %v7425_v57 = vld [vmem:[#allocation17_spill] sm:$0xff] }
 0x47e   :  { %3386 = vst [vmem:[%s7370_s12 + $0x178] sm:$0xff] %v3322_v22  ;;  %4527 = vrsqrt.f32 %v3055_v50 }
 0x47f   :  { %v4522_v62 = vpop.eup %4521  ;;  %3385 = vst [vmem:[%s7370_s12 + $0x170] sm:$0xff] %v3321_v49 }
 0x480   :  { %v4524_v40 = vpop.eup %4523  ;;  %v3182_v46 = vmul.f32 %v4522_v62, %v7418_v29  ;;  %v3667_v27 = vpop.f32.mrb[20].mxu0 }
 0x481   :  { %v3181_v60 = vmul.f32 %v4524_v40, %v7419_v9  ;;  %v2994_v56 = vmul.f32 0.0625, %v3667_v27  ;;  %v2882_v28 = vpop.f32.mrb[21].mxu0  ;;  %v4556_v27 = vld [vmem:[%s7369_s11] ss:$0 sm:$0xff] }
 0x482   :  { %v3253_v58 = vmul.f32 %v6944_v53, %v3182_v46  ;;  %v2993_v34 = vmul.f32 0.0625, %v2882_v28 }
 0x483   :  { %v3252_v59 = vmul.f32 %v6944_v53, %v3181_v60  ;;  %v3058_v32 = vadd.f32 1e-05, %v2994_v56 }
 0x484   :  { %v3324_v33 = vadd.f32 %v6952_v14, %v3253_v58  ;;  %v3057_v18 = vadd.f32 1e-05, %v2993_v34 }
 0x485   :  { %v3323_v51 = vadd.f32 %v6952_v14, %v3252_v59  ;;  %4529 = vrsqrt.f32 %v3058_v32 }
 0x486   :  { %3388 = vst [vmem:[%s7370_s12 + $0x188] sm:$0xff] %v3324_v33  ;;  %4531 = vrsqrt.f32 %v3057_v18 }
 0x487   :  { %v4526_v3 = vpop.eup %4525  ;;  %3387 = vst [vmem:[%s7370_s12 + $0x180] sm:$0xff] %v3323_v51 }
 0x488   :  { %v4528_v21 = vpop.eup %4527  ;;  %v3184_v43 = vmul.f32 %v4526_v3, %v7420_v41  ;;  %v3670_v7 = vpop.f32.mrb[22].mxu0 }
 0x489   :  { %v3183_v0 = vmul.f32 %v4528_v21, %v7421_v54  ;;  %v2996_v30 = vmul.f32 0.0625, %v3670_v7  ;;  %v2892_v12 = vpop.f32.mrb[23].mxu0 }
 0x48a   :  { %v3255_v47 = vmul.f32 %v6944_v53, %v3184_v43  ;;  %v2995_v38 = vmul.f32 0.0625, %v2892_v12  ;;  %v7426_v12 = vld [vmem:[#allocation19_spill] sm:$0xff] }
 0x48b   :  { %v3254_v55 = vmul.f32 %v6944_v53, %v3183_v0  ;;  %v3060_v19 = vadd.f32 1e-05, %v2996_v30 }
 0x48c   :  { %v3326_v48 = vadd.f32 %v6952_v14, %v3255_v47  ;;  %v3059_v44 = vadd.f32 1e-05, %v2995_v38 }
 0x48d   :  { %v3325_v52 = vadd.f32 %v6952_v14, %v3254_v55  ;;  %4533 = vrsqrt.f32 %v3060_v19 }
 0x48e   :  { %3390 = vst [vmem:[%s7370_s12 + $0x198] sm:$0xff] %v3326_v48  ;;  %4535 = vrsqrt.f32 %v3059_v44 }
 0x48f   :  { %v4530_v15 = vpop.eup %4529  ;;  %3389 = vst [vmem:[%s7370_s12 + $0x190] sm:$0xff] %v3325_v52 }
 0x490   :  { %v4532_v2 = vpop.eup %4531  ;;  %v3186_v5 = vmul.f32 %v4530_v15, %v7422_v1  ;;  %v3673_v17 = vpop.f32.mrb[24].mxu0 }
 0x491   :  { %v3185_v37 = vmul.f32 %v4532_v2, %v7423_v26  ;;  %v2998_v4 = vmul.f32 0.0625, %v3673_v17  ;;  %v2902_v63 = vpop.f32.mrb[25].mxu0  ;;  %v7427_v26 = vld [vmem:[#allocation20_spill] sm:$0xff] }
 0x492   :  { %v3257_v11 = vmul.f32 %v6944_v53, %v3186_v5  ;;  %v2997_v13 = vmul.f32 0.0625, %v2902_v63 }
 0x493   :  { %v3256_v31 = vmul.f32 %v6944_v53, %v3185_v37  ;;  %v3062_v8 = vadd.f32 1e-05, %v2998_v4 }
 0x494   :  { %v3328_v24 = vadd.f32 %v6952_v14, %v3257_v11  ;;  %v3061_v39 = vadd.f32 1e-05, %v2997_v13 }
 0x495   :  { %v3327_v16 = vadd.f32 %v6952_v14, %v3256_v31  ;;  %4537 = vrsqrt.f32 %v3062_v8  ;;  %v7305_v14 = vld [vmem:[%s7368_s10] ss:$0 sm:$0xff] }
 0x496   :  { %3392 = vst [vmem:[%s7370_s12 + $0x1a8] sm:$0xff] %v3328_v24  ;;  %4539 = vrsqrt.f32 %v3061_v39 }
 0x497   :  { %v4534_v35 = vpop.eup %4533  ;;  %3391 = vst [vmem:[%s7370_s12 + $0x1a0] sm:$0xff] %v3327_v16 }
 0x498   :  { %v4536_v61 = vpop.eup %4535  ;;  %v3188_v53 = vmul.f32 %v4534_v35, %v7424_v10  ;;  %v3676_v23 = vpop.f32.mrb[26].mxu0 }
 0x499   :  { %v3187_v22 = vmul.f32 %v4536_v61, %v7425_v57  ;;  %v3000_v50 = vmul.f32 0.0625, %v3676_v23  ;;  %v2912_v49 = vpop.f32.mrb[27].mxu0 }
 0x49a   :  { %v3259_v62 = vmul.f32 %v7305_v14, %v3188_v53  ;;  %v2999_v40 = vmul.f32 0.0625, %v2912_v49 }
 0x49b   :  { %v3258_v29 = vmul.f32 %v7305_v14, %v3187_v22  ;;  %v3064_v46 = vadd.f32 1e-05, %v3000_v50 }
 0x49c   :  { %v3330_v9 = vadd.f32 %v4556_v27, %v3259_v62  ;;  %v3063_v60 = vadd.f32 1e-05, %v2999_v40 }
 0x49d   :  { %v3329_v56 = vadd.f32 %v4556_v27, %v3258_v29  ;;  %4541 = vrsqrt.f32 %v3064_v46 }
 0x49e   :  { %3394 = vst [vmem:[%s7370_s12 + $0x1b8] sm:$0xff] %v3330_v9  ;;  %4543 = vrsqrt.f32 %v3063_v60 }
 0x49f   :  { %v4538_v28 = vpop.eup %4537  ;;  %3393 = vst [vmem:[%s7370_s12 + $0x1b0] sm:$0xff] %v3329_v56 }
 0x4a0   :  { %v4540_v58 = vpop.eup %4539  ;;  %v3190_v34 = vmul.f32 %v4538_v28, %v6920_v6  ;;  %v3679_v59 = vpop.f32.mrb[28].mxu0 }
 0x4a1   :  { %v3189_v32 = vmul.f32 %v4540_v58, %v6913_v25  ;;  %v3002_v33 = vmul.f32 0.0625, %v3679_v59  ;;  %v2922_v18 = vpop.f32.mrb[29].mxu0 }
 0x4a2   :  { %v3261_v51 = vmul.f32 %v7305_v14, %v3190_v34  ;;  %v3001_v3 = vmul.f32 0.0625, %v2922_v18 }
 0x4a3   :  { %v3260_v21 = vmul.f32 %v7305_v14, %v3189_v32  ;;  %v3066_v41 = vadd.f32 1e-05, %v3002_v33 }
 0x4a4   :  { %v3332_v43 = vadd.f32 %v4556_v27, %v3261_v51  ;;  %v3065_v7 = vadd.f32 1e-05, %v3001_v3 }
 0x4a5   :  { %v3331_v54 = vadd.f32 %v4556_v27, %v3260_v21  ;;  %4545 = vrsqrt.f32 %v3066_v41 }
 0x4a6   :  { %3396 = vst [vmem:[%s7370_s12 + $0x1c8] sm:$0xff] %v3332_v43  ;;  %4547 = vrsqrt.f32 %v3065_v7 }
 0x4a7   :  { %v4542_v6 = vpop.eup %4541  ;;  %3395 = vst [vmem:[%s7370_s12 + $0x1c0] sm:$0xff] %v3331_v54 }
 0x4a8   :  { %v4544_v25 = vpop.eup %4543  ;;  %v3192_v0 = vmul.f32 %v4542_v6, %v6934_v36  ;;  %v3682_v30 = vpop.f32.mrb[30].mxu0 }
 0x4a9   :  { %v3191_v47 = vmul.f32 %v4544_v25, %v7426_v12  ;;  %v3004_v38 = vmul.f32 0.0625, %v3682_v30  ;;  %v2932_v55 = vpop.f32.mrb[31].mxu0 }
 0x4aa   :  { %v3263_v19 = vmul.f32 %v7305_v14, %v3192_v0  ;;  %v3003_v48 = vmul.f32 0.0625, %v2932_v55 }
 0x4ab   :  { %v3262_v44 = vmul.f32 %v7305_v14, %v3191_v47  ;;  %v3068_v52 = vadd.f32 1e-05, %v3004_v38 }
 0x4ac   :  { %v3334_v15 = vadd.f32 %v4556_v27, %v3263_v19  ;;  %v3067_v2 = vadd.f32 1e-05, %v3003_v48 }
 0x4ad   :  { %v3333_v1 = vadd.f32 %v4556_v27, %v3262_v44  ;;  %4549 = vrsqrt.f32 %v3068_v52 }
 0x4ae   :  { %3398 = vst [vmem:[%s7370_s12 + $0x1d8] sm:$0xff] %v3334_v15  ;;  %4551 = vrsqrt.f32 %v3067_v2 }
 0x4af   :  { %v4546_v36 = vpop.eup %4545  ;;  %3397 = vst [vmem:[%s7370_s12 + $0x1d0] sm:$0xff] %v3333_v1 }
 0x4b0   :  { %v4548_v5 = vpop.eup %4547  ;;  %v3194_v17 = vmul.f32 %v4546_v36, %v6964_v42 }
 0x4b1   :  { %v3193_v37 = vmul.f32 %v4548_v5, %v7427_v26 }
 0x4b2   :  { %v3265_v4 = vmul.f32 %v7305_v14, %v3194_v17 }
 0x4b3   :  { %v3264_v63 = vmul.f32 %v7305_v14, %v3193_v37 }
 0x4b4   :  { %v3336_v11 = vadd.f32 %v4556_v27, %v3265_v4 }
 0x4b5   :  { %v3335_v13 = vadd.f32 %v4556_v27, %v3264_v63 }
 0x4b6   :  { %3400 = vst [vmem:[%s7370_s12 + $0x1e8] sm:$0xff] %v3336_v11 }
 0x4b7   :  { %v4550_v31 = vpop.eup %4549  ;;  %3399 = vst [vmem:[%s7370_s12 + $0x1e0] sm:$0xff] %v3335_v13 }
 0x4b8   :  { %v4552_v8 = vpop.eup %4551  ;;  %v3196_v42 = vmul.f32 %v4550_v31, %v6998_v45 }
 0x4b9   :  { %v3195_v24 = vmul.f32 %v4552_v8, %v6982_v20 }
 0x4ba   :  { %v3267_v39 = vmul.f32 %v7305_v14, %v3196_v42 }
 0x4bb   :  { %v3266_v16 = vmul.f32 %v7305_v14, %v3195_v24 }
 0x4bc   :  { %v3338_v35 = vadd.f32 %v4556_v27, %v3267_v39 }
 0x4bd   :  { %v3337_v61 = vadd.f32 %v4556_v27, %v3266_v16 }
 0x4be   :  { %3402 = vst [vmem:[%s7370_s12 + $0x1f8] sm:$0xff] %v3338_v35 }
 0x4bf   :  { %3401 = vst [vmem:[%s7370_s12 + $0x1f0] sm:$0xff] %v3337_v61 }

</bundles_post_ra>
